<compile_context>
chip_gen: v6e
topology: v6e:2x2x1
jax: 0.10.0
libtpu: 0.0.40
codegen_flags: <defaults>
</compile_context>

<pallas_src>
import functools

import jax
import jax.numpy as jnp
from jax.experimental import pallas as pl
from jax.experimental.pallas import tpu as pltpu

INPUT_SIZE = 603
HIDDEN_SIZE = 100
OUTPUT_SIZE = 1
HP = 128            # hidden size padded to a full 128-lane vreg
GP = 3 * HP         # concatenated [r, z, n] gate width


def _gru_kernel(x_ref, h0_ref, wih_ref, whh_ref, bgi_ref, bhhn_ref,
                wlin_ref, blin_ref, out_ref, gi_ref, *, seq, bp, b):
    # ---- Phase 1: input projection for ALL timesteps in one MXU matmul. ----
    # (seq*bp, 603) @ (603, 384) + folded biases -> VMEM scratch.
    gi_ref[...] = (
        jnp.dot(x_ref[...], wih_ref[...], preferred_element_type=jnp.float32)
        + bgi_ref[...])

    # Hoist loop-invariant loads / broadcasts out of the recurrence.
    whh = whh_ref[...]                                    # (HP, 3*HP)
    bhh_n = jnp.broadcast_to(bhhn_ref[...], (bp, HP))     # (bp, HP)

    # ---- Phase 2: sequential time recurrence, entirely in VMEM / vregs. ----
    def step(t, h_prev):
        gi_t = gi_ref[pl.ds(t * bp, bp), :]               # (bp, 3*HP), aligned slice
        gh = jnp.dot(h_prev, whh, preferred_element_type=jnp.float32)
        r = jax.nn.sigmoid(gi_t[:, 0:HP] + gh[:, 0:HP])
        z = jax.nn.sigmoid(gi_t[:, HP:2 * HP] + gh[:, HP:2 * HP])
        n = jnp.tanh(gi_t[:, 2 * HP:] + r * (gh[:, 2 * HP:] + bhh_n))
        return (1.0 - z) * n + z * h_prev

    h_last = jax.lax.fori_loop(0, seq, step, h0_ref[...], unroll=True)

    # ---- Phase 3: Linear(100 -> 1) as VPU mul + lane reduction, then sigmoid. ----
    logits = jnp.sum(h_last * wlin_ref[...], axis=-1, keepdims=True)   # (bp, 1)
    out_ref[...] = jax.nn.sigmoid(logits[:b, :] + blin_ref[...])


def _pack_params(params):
    """Concatenate per-gate weights into (., 3*HP), pad H 100->128, fold biases."""
    wih, whh, bih, bhh, wlin, blin = params
    wih_c = jnp.zeros((INPUT_SIZE, GP), jnp.float32)
    whh_c = jnp.zeros((HP, GP), jnp.float32)
    bgi = jnp.zeros((1, GP), jnp.float32)
    for g in range(3):
        lo = g * HP
        wih_c = wih_c.at[:, lo:lo + HIDDEN_SIZE].set(wih[g])
        whh_c = whh_c.at[:HIDDEN_SIZE, lo:lo + HIDDEN_SIZE].set(whh[g])
    # b_ih folded into the precomputed input projection for all gates;
    # b_hh additionally folded for r and z (gate n needs b_hh inside r*(...)).
    bgi = bgi.at[:, 0:HIDDEN_SIZE].set(bih[0] + bhh[0])
    bgi = bgi.at[:, HP:HP + HIDDEN_SIZE].set(bih[1] + bhh[1])
    bgi = bgi.at[:, 2 * HP:2 * HP + HIDDEN_SIZE].set(bih[2])
    bhhn = jnp.zeros((1, HP), jnp.float32).at[:, :HIDDEN_SIZE].set(bhh[2])
    wlin_p = jnp.zeros((1, HP), jnp.float32).at[:, :HIDDEN_SIZE].set(wlin[:, 0][None, :])
    return wih_c, whh_c, bgi, bhhn, wlin_p, blin


def gru_forward(x, h0, params):
    """x: (seq, B, 603) f32, h0: (1, B, 100) f32 -> (B, 1) f32."""
    seq, b, _ = x.shape
    bp = max(8, ((b + 7) // 8) * 8)                # pad batch to a sublane multiple
    wih_c, whh_c, bgi, bhhn, wlin_p, blin = _pack_params(params)

    x2 = jnp.zeros((seq, bp, INPUT_SIZE), jnp.float32).at[:, :b, :].set(x)
    x2 = x2.reshape(seq * bp, INPUT_SIZE)
    h0p = jnp.zeros((bp, HP), jnp.float32).at[:b, :HIDDEN_SIZE].set(h0[0])

    kernel = functools.partial(_gru_kernel, seq=seq, bp=bp, b=b)
    return pl.pallas_call(
        kernel,
        out_shape=jax.ShapeDtypeStruct((b, OUTPUT_SIZE), jnp.float32),
        grid_spec=pltpu.PrefetchScalarGridSpec(
            num_scalar_prefetch=0,
            grid=(1,),                              # single step: everything fits VMEM
            in_specs=[
                pl.BlockSpec((seq * bp, INPUT_SIZE), lambda i: (0, 0)),   # x, all steps
                pl.BlockSpec((bp, HP), lambda i: (0, 0)),                 # h0 (padded)
                pl.BlockSpec((INPUT_SIZE, GP), lambda i: (0, 0)),         # W_ih concat
                pl.BlockSpec((HP, GP), lambda i: (0, 0)),                 # W_hh concat
                pl.BlockSpec((1, GP), lambda i: (0, 0)),                  # folded gate bias
                pl.BlockSpec((1, HP), lambda i: (0, 0)),                  # b_hh (n gate)
                pl.BlockSpec((1, HP), lambda i: (0, 0)),                  # linear weight
                pl.BlockSpec((1, OUTPUT_SIZE), lambda i: (0, 0)),         # linear bias
            ],
            out_specs=pl.BlockSpec((b, OUTPUT_SIZE), lambda i: (0, 0)),
            scratch_shapes=[pltpu.VMEM((seq * bp, GP), jnp.float32)],     # GI for all t
        ),
        compiler_params=pltpu.CompilerParams(
            dimension_semantics=("arbitrary",)),
    )(x2, h0p, wih_c, whh_c, bgi, bhhn, wlin_p, blin)


def gru_reference(x, h0, params):
    """Pure-JAX reference replicating torch.nn.GRU + Linear + Sigmoid."""
    wih, whh, bih, bhh, wlin, blin = params
    h = h0[0]
    for t in range(x.shape[0]):
        x_t = x[t]
        r = jax.nn.sigmoid(x_t @ wih[0] + bih[0] + h @ whh[0] + bhh[0])
        z = jax.nn.sigmoid(x_t @ wih[1] + bih[1] + h @ whh[1] + bhh[1])
        n = jnp.tanh(x_t @ wih[2] + bih[2] + r * (h @ whh[2] + bhh[2]))
        h = (1.0 - z) * n + z * h
    return jax.nn.sigmoid(h @ wlin + blin)


def init_params(key):
    """Deterministic init mirroring torch's uniform(-1/sqrt(H), 1/sqrt(H)) shapes."""
    stdv = 1.0 / (HIDDEN_SIZE ** 0.5)
    ks = jax.random.split(key, 6)
    u = lambda k, shape: jax.random.uniform(k, shape, jnp.float32, -stdv, stdv)
    wih = u(ks[0], (3, INPUT_SIZE, HIDDEN_SIZE))    # torch weight_ih_l0, transposed per-gate
    whh = u(ks[1], (3, HIDDEN_SIZE, HIDDEN_SIZE))   # torch weight_hh_l0, transposed per-gate
    bih = u(ks[2], (3, 1, HIDDEN_SIZE))
    bhh = u(ks[3], (3, 1, HIDDEN_SIZE))
    wlin = u(ks[4], (HIDDEN_SIZE, OUTPUT_SIZE))     # torch linear.weight (1, H), transposed
    blin = u(ks[5], (1, OUTPUT_SIZE))
    return wih, whh, bih, bhh, wlin, blin


if __name__ == "__main__":
    key = jax.random.PRNGKey(0)
    k_p, k_x, k_h = jax.random.split(key, 3)

    SEQ, BATCH = 8, 2
    params = init_params(k_p)
    x = jax.random.normal(k_x, (SEQ, BATCH, INPUT_SIZE), jnp.float32)
    h0 = jax.random.normal(k_h, (1, BATCH, HIDDEN_SIZE), jnp.float32)  # == initHidden(BATCH)

    out = jax.block_until_ready(gru_forward(x, h0, params))
    ref = gru_reference(x, h0, params)

    assert out.shape == (BATCH, OUTPUT_SIZE)
    assert bool(jnp.all(jnp.isfinite(out)))
    assert bool(jnp.allclose(out, ref, atol=1e-3, rtol=1e-3)), (out, ref)
    print("KERNEL_OK")
</pallas_src>

<mosaic_0001>
module attributes {stable_mosaic.version = 11 : i64} {
  func.func @_gru_kernel(%arg0: i32, %arg1: memref<64x603xf32, #tpu.memory_space<vmem>>, %arg2: memref<8x128xf32, #tpu.memory_space<vmem>>, %arg3: memref<603x384xf32, #tpu.memory_space<vmem>>, %arg4: memref<128x384xf32, #tpu.memory_space<vmem>>, %arg5: memref<1x384xf32, #tpu.memory_space<vmem>>, %arg6: memref<1x128xf32, #tpu.memory_space<vmem>>, %arg7: memref<1x128xf32, #tpu.memory_space<vmem>>, %arg8: memref<1x1xf32, #tpu.memory_space<vmem>>, %arg9: memref<2x1xf32, #tpu.memory_space<vmem>>, %arg10: memref<64x384xf32, #tpu.memory_space<vmem>>) attributes {dimension_semantics = [#tpu.dimension_semantics<arbitrary>], iteration_bounds = array<i64: 1>, scalar_prefetch = 0 : i64, scratch_operands = 1 : i64, tpu.core_type = #tpu.core_type<tc>, window_params = [{pipeline_mode = #tpu.pipeline_mode<synchronous>, transform_indices = @transform_0, window_bounds = array<i64: 64, 603>}, {pipeline_mode = #tpu.pipeline_mode<synchronous>, transform_indices = @transform_1, window_bounds = array<i64: 8, 128>}, {pipeline_mode = #tpu.pipeline_mode<synchronous>, transform_indices = @transform_2, window_bounds = array<i64: 603, 384>}, {pipeline_mode = #tpu.pipeline_mode<synchronous>, transform_indices = @transform_3, window_bounds = array<i64: 128, 384>}, {pipeline_mode = #tpu.pipeline_mode<synchronous>, transform_indices = @transform_4, window_bounds = array<i64: 1, 384>}, {pipeline_mode = #tpu.pipeline_mode<synchronous>, transform_indices = @transform_5, window_bounds = array<i64: 1, 128>}, {pipeline_mode = #tpu.pipeline_mode<synchronous>, transform_indices = @transform_6, window_bounds = array<i64: 1, 128>}, {pipeline_mode = #tpu.pipeline_mode<synchronous>, transform_indices = @transform_7, window_bounds = array<i64: 1, 1>}, {pipeline_mode = #tpu.pipeline_mode<synchronous>, transform_indices = @transform_8, window_bounds = array<i64: 2, 1>}]} {
    %c0 = arith.constant 0 : index
    %c0_0 = arith.constant 0 : index
    %0 = vector.load %arg1[%c0, %c0_0] : memref<64x603xf32, #tpu.memory_space<vmem>>, vector<64x603xf32>
    %c0_1 = arith.constant 0 : index
    %c0_2 = arith.constant 0 : index
    %1 = vector.load %arg3[%c0_1, %c0_2] : memref<603x384xf32, #tpu.memory_space<vmem>>, vector<603x384xf32>
    %cst = arith.constant dense<0.000000e+00> : vector<64x384xf32>
    %2 = tpu.matmul %0, %1, %cst {dimension_numbers = #tpu.dot_dimension_numbers<[1], [0], [0], [1], [0, 0, 1, 1], [], []>} : vector<64x603xf32>, vector<603x384xf32>, vector<64x384xf32> -> vector<64x384xf32>
    %c0_3 = arith.constant 0 : index
    %c0_4 = arith.constant 0 : index
    %3 = vector.load %arg5[%c0_3, %c0_4] : memref<1x384xf32, #tpu.memory_space<vmem>>, vector<1x384xf32>
    %4 = vector.broadcast %3 : vector<1x384xf32> to vector<64x384xf32>
    %5 = arith.addf %2, %4 : vector<64x384xf32>
    %c0_5 = arith.constant 0 : index
    %c0_6 = arith.constant 0 : index
    %6 = vector.load %arg10[%c0_5, %c0_6] : memref<64x384xf32, #tpu.memory_space<vmem>>, vector<64x384xf32>
    tpu.vector_store %arg10[%c0_5, %c0_6], %5 {strides = array<i32>} : memref<64x384xf32, #tpu.memory_space<vmem>>, vector<64x384xf32>,
    %c0_7 = arith.constant 0 : index
    %c0_8 = arith.constant 0 : index
    %7 = vector.load %arg4[%c0_7, %c0_8] : memref<128x384xf32, #tpu.memory_space<vmem>>, vector<128x384xf32>
    %c0_9 = arith.constant 0 : index
    %c0_10 = arith.constant 0 : index
    %8 = vector.load %arg6[%c0_9, %c0_10] : memref<1x128xf32, #tpu.memory_space<vmem>>, vector<1x128xf32>
    %9 = vector.shape_cast %8 : vector<1x128xf32> to vector<1x128xf32>
    %10 = vector.broadcast %9 : vector<1x128xf32> to vector<8x128xf32>
    %c0_11 = arith.constant 0 : index
    %c0_12 = arith.constant 0 : index
    %11 = vector.load %arg2[%c0_11, %c0_12] : memref<8x128xf32, #tpu.memory_space<vmem>>, vector<8x128xf32>
    %c0_i32 = arith.constant 0 : i32
    %c8_i32 = arith.constant 8 : i32
    %12 = arith.muli %c0_i32, %c8_i32 : i32
    %13 = arith.index_cast %12 : i32 to index
    %c0_13 = arith.constant 0 : index
    %14 = vector.load %arg10[%13, %c0_13] : memref<64x384xf32, #tpu.memory_space<vmem>>, vector<8x384xf32>
    %cst_14 = arith.constant dense<0.000000e+00> : vector<8x384xf32>
    %15 = tpu.matmul %11, %7, %cst_14 {dimension_numbers = #tpu.dot_dimension_numbers<[1], [0], [0], [1], [0, 0, 1, 1], [], []>} : vector<8x128xf32>, vector<128x384xf32>, vector<8x384xf32> -> vector<8x384xf32>
    %16 = vector.extract_strided_slice %14 {offsets = [0, 0], sizes = [8, 128], strides = [1, 1]} : vector<8x384xf32> to vector<8x128xf32>
    %17 = vector.extract_strided_slice %15 {offsets = [0, 0], sizes = [8, 128], strides = [1, 1]} : vector<8x384xf32> to vector<8x128xf32>
    %18 = arith.addf %16, %17 : vector<8x128xf32>
    %19 = arith.negf %18 : vector<8x128xf32>
    %20 = math.exp %19 : vector<8x128xf32>
    %cst_15 = arith.constant 1.000000e+00 : f32
    %21 = vector.broadcast %cst_15 : f32 to vector<8x128xf32>
    %22 = arith.addf %21, %20 : vector<8x128xf32>
    %23 = arith.divf %21, %22 : vector<8x128xf32>
    %24 = vector.extract_strided_slice %14 {offsets = [0, 128], sizes = [8, 128], strides = [1, 1]} : vector<8x384xf32> to vector<8x128xf32>
    %25 = vector.extract_strided_slice %15 {offsets = [0, 128], sizes = [8, 128], strides = [1, 1]} : vector<8x384xf32> to vector<8x128xf32>
    %26 = arith.addf %24, %25 : vector<8x128xf32>
    %27 = arith.negf %26 : vector<8x128xf32>
    %28 = math.exp %27 : vector<8x128xf32>
    %cst_16 = arith.constant 1.000000e+00 : f32
    %29 = vector.broadcast %cst_16 : f32 to vector<8x128xf32>
    %30 = arith.addf %29, %28 : vector<8x128xf32>
    %31 = arith.divf %29, %30 : vector<8x128xf32>
    %32 = vector.extract_strided_slice %14 {offsets = [0, 256], sizes = [8, 128], strides = [1, 1]} : vector<8x384xf32> to vector<8x128xf32>
    %33 = vector.extract_strided_slice %15 {offsets = [0, 256], sizes = [8, 128], strides = [1, 1]} : vector<8x384xf32> to vector<8x128xf32>
    %34 = arith.addf %33, %10 : vector<8x128xf32>
    %35 = arith.mulf %23, %34 : vector<8x128xf32>
    %36 = arith.addf %32, %35 : vector<8x128xf32>
    %37 = math.tanh %36 : vector<8x128xf32>
    %cst_17 = arith.constant 1.000000e+00 : f32
    %38 = vector.broadcast %cst_17 : f32 to vector<8x128xf32>
    %39 = arith.subf %38, %31 : vector<8x128xf32>
    %40 = arith.mulf %39, %37 : vector<8x128xf32>
    %41 = arith.mulf %31, %11 : vector<8x128xf32>
    %42 = arith.addf %40, %41 : vector<8x128xf32>
    %c1_i32 = arith.constant 1 : i32
    %c8_i32_18 = arith.constant 8 : i32
    %43 = arith.muli %c1_i32, %c8_i32_18 : i32
    %44 = arith.index_cast %43 : i32 to index
    %c0_19 = arith.constant 0 : index
    %45 = vector.load %arg10[%44, %c0_19] : memref<64x384xf32, #tpu.memory_space<vmem>>, vector<8x384xf32>
    %cst_20 = arith.constant dense<0.000000e+00> : vector<8x384xf32>
    %46 = tpu.matmul %42, %7, %cst_20 {dimension_numbers = #tpu.dot_dimension_numbers<[1], [0], [0], [1], [0, 0, 1, 1], [], []>} : vector<8x128xf32>, vector<128x384xf32>, vector<8x384xf32> -> vector<8x384xf32>
    %47 = vector.extract_strided_slice %45 {offsets = [0, 0], sizes = [8, 128], strides = [1, 1]} : vector<8x384xf32> to vector<8x128xf32>
    %48 = vector.extract_strided_slice %46 {offsets = [0, 0], sizes = [8, 128], strides = [1, 1]} : vector<8x384xf32> to vector<8x128xf32>
    %49 = arith.addf %47, %48 : vector<8x128xf32>
    %50 = arith.negf %49 : vector<8x128xf32>
    %51 = math.exp %50 : vector<8x128xf32>
    %cst_21 = arith.constant 1.000000e+00 : f32
    %52 = vector.broadcast %cst_21 : f32 to vector<8x128xf32>
    %53 = arith.addf %52, %51 : vector<8x128xf32>
    %54 = arith.divf %52, %53 : vector<8x128xf32>
    %55 = vector.extract_strided_slice %45 {offsets = [0, 128], sizes = [8, 128], strides = [1, 1]} : vector<8x384xf32> to vector<8x128xf32>
    %56 = vector.extract_strided_slice %46 {offsets = [0, 128], sizes = [8, 128], strides = [1, 1]} : vector<8x384xf32> to vector<8x128xf32>
    %57 = arith.addf %55, %56 : vector<8x128xf32>
    %58 = arith.negf %57 : vector<8x128xf32>
    %59 = math.exp %58 : vector<8x128xf32>
    %cst_22 = arith.constant 1.000000e+00 : f32
    %60 = vector.broadcast %cst_22 : f32 to vector<8x128xf32>
    %61 = arith.addf %60, %59 : vector<8x128xf32>
    %62 = arith.divf %60, %61 : vector<8x128xf32>
    %63 = vector.extract_strided_slice %45 {offsets = [0, 256], sizes = [8, 128], strides = [1, 1]} : vector<8x384xf32> to vector<8x128xf32>
    %64 = vector.extract_strided_slice %46 {offsets = [0, 256], sizes = [8, 128], strides = [1, 1]} : vector<8x384xf32> to vector<8x128xf32>
    %65 = arith.addf %64, %10 : vector<8x128xf32>
    %66 = arith.mulf %54, %65 : vector<8x128xf32>
    %67 = arith.addf %63, %66 : vector<8x128xf32>
    %68 = math.tanh %67 : vector<8x128xf32>
    %cst_23 = arith.constant 1.000000e+00 : f32
    %69 = vector.broadcast %cst_23 : f32 to vector<8x128xf32>
    %70 = arith.subf %69, %62 : vector<8x128xf32>
    %71 = arith.mulf %70, %68 : vector<8x128xf32>
    %72 = arith.mulf %62, %42 : vector<8x128xf32>
    %73 = arith.addf %71, %72 : vector<8x128xf32>
    %c2_i32 = arith.constant 2 : i32
    %c8_i32_24 = arith.constant 8 : i32
    %74 = arith.muli %c2_i32, %c8_i32_24 : i32
    %75 = arith.index_cast %74 : i32 to index
    %c0_25 = arith.constant 0 : index
    %76 = vector.load %arg10[%75, %c0_25] : memref<64x384xf32, #tpu.memory_space<vmem>>, vector<8x384xf32>
    %cst_26 = arith.constant dense<0.000000e+00> : vector<8x384xf32>
    %77 = tpu.matmul %73, %7, %cst_26 {dimension_numbers = #tpu.dot_dimension_numbers<[1], [0], [0], [1], [0, 0, 1, 1], [], []>} : vector<8x128xf32>, vector<128x384xf32>, vector<8x384xf32> -> vector<8x384xf32>
    %78 = vector.extract_strided_slice %76 {offsets = [0, 0], sizes = [8, 128], strides = [1, 1]} : vector<8x384xf32> to vector<8x128xf32>
    %79 = vector.extract_strided_slice %77 {offsets = [0, 0], sizes = [8, 128], strides = [1, 1]} : vector<8x384xf32> to vector<8x128xf32>
    %80 = arith.addf %78, %79 : vector<8x128xf32>
    %81 = arith.negf %80 : vector<8x128xf32>
    %82 = math.exp %81 : vector<8x128xf32>
    %cst_27 = arith.constant 1.000000e+00 : f32
    %83 = vector.broadcast %cst_27 : f32 to vector<8x128xf32>
    %84 = arith.addf %83, %82 : vector<8x128xf32>
    %85 = arith.divf %83, %84 : vector<8x128xf32>
    %86 = vector.extract_strided_slice %76 {offsets = [0, 128], sizes = [8, 128], strides = [1, 1]} : vector<8x384xf32> to vector<8x128xf32>
    %87 = vector.extract_strided_slice %77 {offsets = [0, 128], sizes = [8, 128], strides = [1, 1]} : vector<8x384xf32> to vector<8x128xf32>
    %88 = arith.addf %86, %87 : vector<8x128xf32>
    %89 = arith.negf %88 : vector<8x128xf32>
    %90 = math.exp %89 : vector<8x128xf32>
    %cst_28 = arith.constant 1.000000e+00 : f32
    %91 = vector.broadcast %cst_28 : f32 to vector<8x128xf32>
    %92 = arith.addf %91, %90 : vector<8x128xf32>
    %93 = arith.divf %91, %92 : vector<8x128xf32>
    %94 = vector.extract_strided_slice %76 {offsets = [0, 256], sizes = [8, 128], strides = [1, 1]} : vector<8x384xf32> to vector<8x128xf32>
    %95 = vector.extract_strided_slice %77 {offsets = [0, 256], sizes = [8, 128], strides = [1, 1]} : vector<8x384xf32> to vector<8x128xf32>
    %96 = arith.addf %95, %10 : vector<8x128xf32>
    %97 = arith.mulf %85, %96 : vector<8x128xf32>
    %98 = arith.addf %94, %97 : vector<8x128xf32>
    %99 = math.tanh %98 : vector<8x128xf32>
    %cst_29 = arith.constant 1.000000e+00 : f32
    %100 = vector.broadcast %cst_29 : f32 to vector<8x128xf32>
    %101 = arith.subf %100, %93 : vector<8x128xf32>
    %102 = arith.mulf %101, %99 : vector<8x128xf32>
    %103 = arith.mulf %93, %73 : vector<8x128xf32>
    %104 = arith.addf %102, %103 : vector<8x128xf32>
    %c3_i32 = arith.constant 3 : i32
    %c8_i32_30 = arith.constant 8 : i32
    %105 = arith.muli %c3_i32, %c8_i32_30 : i32
    %106 = arith.index_cast %105 : i32 to index
    %c0_31 = arith.constant 0 : index
    %107 = vector.load %arg10[%106, %c0_31] : memref<64x384xf32, #tpu.memory_space<vmem>>, vector<8x384xf32>
    %cst_32 = arith.constant dense<0.000000e+00> : vector<8x384xf32>
    %108 = tpu.matmul %104, %7, %cst_32 {dimension_numbers = #tpu.dot_dimension_numbers<[1], [0], [0], [1], [0, 0, 1, 1], [], []>} : vector<8x128xf32>, vector<128x384xf32>, vector<8x384xf32> -> vector<8x384xf32>
    %109 = vector.extract_strided_slice %107 {offsets = [0, 0], sizes = [8, 128], strides = [1, 1]} : vector<8x384xf32> to vector<8x128xf32>
    %110 = vector.extract_strided_slice %108 {offsets = [0, 0], sizes = [8, 128], strides = [1, 1]} : vector<8x384xf32> to vector<8x128xf32>
    %111 = arith.addf %109, %110 : vector<8x128xf32>
    %112 = arith.negf %111 : vector<8x128xf32>
    %113 = math.exp %112 : vector<8x128xf32>
    %cst_33 = arith.constant 1.000000e+00 : f32
    %114 = vector.broadcast %cst_33 : f32 to vector<8x128xf32>
    %115 = arith.addf %114, %113 : vector<8x128xf32>
    %116 = arith.divf %114, %115 : vector<8x128xf32>
    %117 = vector.extract_strided_slice %107 {offsets = [0, 128], sizes = [8, 128], strides = [1, 1]} : vector<8x384xf32> to vector<8x128xf32>
    %118 = vector.extract_strided_slice %108 {offsets = [0, 128], sizes = [8, 128], strides = [1, 1]} : vector<8x384xf32> to vector<8x128xf32>
    %119 = arith.addf %117, %118 : vector<8x128xf32>
    %120 = arith.negf %119 : vector<8x128xf32>
    %121 = math.exp %120 : vector<8x128xf32>
    %cst_34 = arith.constant 1.000000e+00 : f32
    %122 = vector.broadcast %cst_34 : f32 to vector<8x128xf32>
    %123 = arith.addf %122, %121 : vector<8x128xf32>
    %124 = arith.divf %122, %123 : vector<8x128xf32>
    %125 = vector.extract_strided_slice %107 {offsets = [0, 256], sizes = [8, 128], strides = [1, 1]} : vector<8x384xf32> to vector<8x128xf32>
    %126 = vector.extract_strided_slice %108 {offsets = [0, 256], sizes = [8, 128], strides = [1, 1]} : vector<8x384xf32> to vector<8x128xf32>
    %127 = arith.addf %126, %10 : vector<8x128xf32>
    %128 = arith.mulf %116, %127 : vector<8x128xf32>
    %129 = arith.addf %125, %128 : vector<8x128xf32>
    %130 = math.tanh %129 : vector<8x128xf32>
    %cst_35 = arith.constant 1.000000e+00 : f32
    %131 = vector.broadcast %cst_35 : f32 to vector<8x128xf32>
    %132 = arith.subf %131, %124 : vector<8x128xf32>
    %133 = arith.mulf %132, %130 : vector<8x128xf32>
    %134 = arith.mulf %124, %104 : vector<8x128xf32>
    %135 = arith.addf %133, %134 : vector<8x128xf32>
    %c4_i32 = arith.constant 4 : i32
    %c8_i32_36 = arith.constant 8 : i32
    %136 = arith.muli %c4_i32, %c8_i32_36 : i32
    %137 = arith.index_cast %136 : i32 to index
    %c0_37 = arith.constant 0 : index
    %138 = vector.load %arg10[%137, %c0_37] : memref<64x384xf32, #tpu.memory_space<vmem>>, vector<8x384xf32>
    %cst_38 = arith.constant dense<0.000000e+00> : vector<8x384xf32>
    %139 = tpu.matmul %135, %7, %cst_38 {dimension_numbers = #tpu.dot_dimension_numbers<[1], [0], [0], [1], [0, 0, 1, 1], [], []>} : vector<8x128xf32>, vector<128x384xf32>, vector<8x384xf32> -> vector<8x384xf32>
    %140 = vector.extract_strided_slice %138 {offsets = [0, 0], sizes = [8, 128], strides = [1, 1]} : vector<8x384xf32> to vector<8x128xf32>
    %141 = vector.extract_strided_slice %139 {offsets = [0, 0], sizes = [8, 128], strides = [1, 1]} : vector<8x384xf32> to vector<8x128xf32>
    %142 = arith.addf %140, %141 : vector<8x128xf32>
    %143 = arith.negf %142 : vector<8x128xf32>
    %144 = math.exp %143 : vector<8x128xf32>
    %cst_39 = arith.constant 1.000000e+00 : f32
    %145 = vector.broadcast %cst_39 : f32 to vector<8x128xf32>
    %146 = arith.addf %145, %144 : vector<8x128xf32>
    %147 = arith.divf %145, %146 : vector<8x128xf32>
    %148 = vector.extract_strided_slice %138 {offsets = [0, 128], sizes = [8, 128], strides = [1, 1]} : vector<8x384xf32> to vector<8x128xf32>
    %149 = vector.extract_strided_slice %139 {offsets = [0, 128], sizes = [8, 128], strides = [1, 1]} : vector<8x384xf32> to vector<8x128xf32>
    %150 = arith.addf %148, %149 : vector<8x128xf32>
    %151 = arith.negf %150 : vector<8x128xf32>
    %152 = math.exp %151 : vector<8x128xf32>
    %cst_40 = arith.constant 1.000000e+00 : f32
    %153 = vector.broadcast %cst_40 : f32 to vector<8x128xf32>
    %154 = arith.addf %153, %152 : vector<8x128xf32>
    %155 = arith.divf %153, %154 : vector<8x128xf32>
    %156 = vector.extract_strided_slice %138 {offsets = [0, 256], sizes = [8, 128], strides = [1, 1]} : vector<8x384xf32> to vector<8x128xf32>
    %157 = vector.extract_strided_slice %139 {offsets = [0, 256], sizes = [8, 128], strides = [1, 1]} : vector<8x384xf32> to vector<8x128xf32>
    %158 = arith.addf %157, %10 : vector<8x128xf32>
    %159 = arith.mulf %147, %158 : vector<8x128xf32>
    %160 = arith.addf %156, %159 : vector<8x128xf32>
    %161 = math.tanh %160 : vector<8x128xf32>
    %cst_41 = arith.constant 1.000000e+00 : f32
    %162 = vector.broadcast %cst_41 : f32 to vector<8x128xf32>
    %163 = arith.subf %162, %155 : vector<8x128xf32>
    %164 = arith.mulf %163, %161 : vector<8x128xf32>
    %165 = arith.mulf %155, %135 : vector<8x128xf32>
    %166 = arith.addf %164, %165 : vector<8x128xf32>
    %c5_i32 = arith.constant 5 : i32
    %c8_i32_42 = arith.constant 8 : i32
    %167 = arith.muli %c5_i32, %c8_i32_42 : i32
    %168 = arith.index_cast %167 : i32 to index
    %c0_43 = arith.constant 0 : index
    %169 = vector.load %arg10[%168, %c0_43] : memref<64x384xf32, #tpu.memory_space<vmem>>, vector<8x384xf32>
    %cst_44 = arith.constant dense<0.000000e+00> : vector<8x384xf32>
    %170 = tpu.matmul %166, %7, %cst_44 {dimension_numbers = #tpu.dot_dimension_numbers<[1], [0], [0], [1], [0, 0, 1, 1], [], []>} : vector<8x128xf32>, vector<128x384xf32>, vector<8x384xf32> -> vector<8x384xf32>
    %171 = vector.extract_strided_slice %169 {offsets = [0, 0], sizes = [8, 128], strides = [1, 1]} : vector<8x384xf32> to vector<8x128xf32>
    %172 = vector.extract_strided_slice %170 {offsets = [0, 0], sizes = [8, 128], strides = [1, 1]} : vector<8x384xf32> to vector<8x128xf32>
    %173 = arith.addf %171, %172 : vector<8x128xf32>
    %174 = arith.negf %173 : vector<8x128xf32>
    %175 = math.exp %174 : vector<8x128xf32>
    %cst_45 = arith.constant 1.000000e+00 : f32
    %176 = vector.broadcast %cst_45 : f32 to vector<8x128xf32>
    %177 = arith.addf %176, %175 : vector<8x128xf32>
    %178 = arith.divf %176, %177 : vector<8x128xf32>
    %179 = vector.extract_strided_slice %169 {offsets = [0, 128], sizes = [8, 128], strides = [1, 1]} : vector<8x384xf32> to vector<8x128xf32>
    %180 = vector.extract_strided_slice %170 {offsets = [0, 128], sizes = [8, 128], strides = [1, 1]} : vector<8x384xf32> to vector<8x128xf32>
    %181 = arith.addf %179, %180 : vector<8x128xf32>
    %182 = arith.negf %181 : vector<8x128xf32>
    %183 = math.exp %182 : vector<8x128xf32>
    %cst_46 = arith.constant 1.000000e+00 : f32
    %184 = vector.broadcast %cst_46 : f32 to vector<8x128xf32>
    %185 = arith.addf %184, %183 : vector<8x128xf32>
    %186 = arith.divf %184, %185 : vector<8x128xf32>
    %187 = vector.extract_strided_slice %169 {offsets = [0, 256], sizes = [8, 128], strides = [1, 1]} : vector<8x384xf32> to vector<8x128xf32>
    %188 = vector.extract_strided_slice %170 {offsets = [0, 256], sizes = [8, 128], strides = [1, 1]} : vector<8x384xf32> to vector<8x128xf32>
    %189 = arith.addf %188, %10 : vector<8x128xf32>
    %190 = arith.mulf %178, %189 : vector<8x128xf32>
    %191 = arith.addf %187, %190 : vector<8x128xf32>
    %192 = math.tanh %191 : vector<8x128xf32>
    %cst_47 = arith.constant 1.000000e+00 : f32
    %193 = vector.broadcast %cst_47 : f32 to vector<8x128xf32>
    %194 = arith.subf %193, %186 : vector<8x128xf32>
    %195 = arith.mulf %194, %192 : vector<8x128xf32>
    %196 = arith.mulf %186, %166 : vector<8x128xf32>
    %197 = arith.addf %195, %196 : vector<8x128xf32>
    %c6_i32 = arith.constant 6 : i32
    %c8_i32_48 = arith.constant 8 : i32
    %198 = arith.muli %c6_i32, %c8_i32_48 : i32
    %199 = arith.index_cast %198 : i32 to index
    %c0_49 = arith.constant 0 : index
    %200 = vector.load %arg10[%199, %c0_49] : memref<64x384xf32, #tpu.memory_space<vmem>>, vector<8x384xf32>
    %cst_50 = arith.constant dense<0.000000e+00> : vector<8x384xf32>
    %201 = tpu.matmul %197, %7, %cst_50 {dimension_numbers = #tpu.dot_dimension_numbers<[1], [0], [0], [1], [0, 0, 1, 1], [], []>} : vector<8x128xf32>, vector<128x384xf32>, vector<8x384xf32> -> vector<8x384xf32>
    %202 = vector.extract_strided_slice %200 {offsets = [0, 0], sizes = [8, 128], strides = [1, 1]} : vector<8x384xf32> to vector<8x128xf32>
    %203 = vector.extract_strided_slice %201 {offsets = [0, 0], sizes = [8, 128], strides = [1, 1]} : vector<8x384xf32> to vector<8x128xf32>
    %204 = arith.addf %202, %203 : vector<8x128xf32>
    %205 = arith.negf %204 : vector<8x128xf32>
    %206 = math.exp %205 : vector<8x128xf32>
    %cst_51 = arith.constant 1.000000e+00 : f32
    %207 = vector.broadcast %cst_51 : f32 to vector<8x128xf32>
    %208 = arith.addf %207, %206 : vector<8x128xf32>
    %209 = arith.divf %207, %208 : vector<8x128xf32>
    %210 = vector.extract_strided_slice %200 {offsets = [0, 128], sizes = [8, 128], strides = [1, 1]} : vector<8x384xf32> to vector<8x128xf32>
    %211 = vector.extract_strided_slice %201 {offsets = [0, 128], sizes = [8, 128], strides = [1, 1]} : vector<8x384xf32> to vector<8x128xf32>
    %212 = arith.addf %210, %211 : vector<8x128xf32>
    %213 = arith.negf %212 : vector<8x128xf32>
    %214 = math.exp %213 : vector<8x128xf32>
    %cst_52 = arith.constant 1.000000e+00 : f32
    %215 = vector.broadcast %cst_52 : f32 to vector<8x128xf32>
    %216 = arith.addf %215, %214 : vector<8x128xf32>
    %217 = arith.divf %215, %216 : vector<8x128xf32>
    %218 = vector.extract_strided_slice %200 {offsets = [0, 256], sizes = [8, 128], strides = [1, 1]} : vector<8x384xf32> to vector<8x128xf32>
    %219 = vector.extract_strided_slice %201 {offsets = [0, 256], sizes = [8, 128], strides = [1, 1]} : vector<8x384xf32> to vector<8x128xf32>
    %220 = arith.addf %219, %10 : vector<8x128xf32>
    %221 = arith.mulf %209, %220 : vector<8x128xf32>
    %222 = arith.addf %218, %221 : vector<8x128xf32>
    %223 = math.tanh %222 : vector<8x128xf32>
    %cst_53 = arith.constant 1.000000e+00 : f32
    %224 = vector.broadcast %cst_53 : f32 to vector<8x128xf32>
    %225 = arith.subf %224, %217 : vector<8x128xf32>
    %226 = arith.mulf %225, %223 : vector<8x128xf32>
    %227 = arith.mulf %217, %197 : vector<8x128xf32>
    %228 = arith.addf %226, %227 : vector<8x128xf32>
    %c7_i32 = arith.constant 7 : i32
    %c8_i32_54 = arith.constant 8 : i32
    %229 = arith.muli %c7_i32, %c8_i32_54 : i32
    %230 = arith.index_cast %229 : i32 to index
    %c0_55 = arith.constant 0 : index
    %231 = vector.load %arg10[%230, %c0_55] : memref<64x384xf32, #tpu.memory_space<vmem>>, vector<8x384xf32>
    %cst_56 = arith.constant dense<0.000000e+00> : vector<8x384xf32>
    %232 = tpu.matmul %228, %7, %cst_56 {dimension_numbers = #tpu.dot_dimension_numbers<[1], [0], [0], [1], [0, 0, 1, 1], [], []>} : vector<8x128xf32>, vector<128x384xf32>, vector<8x384xf32> -> vector<8x384xf32>
    %233 = vector.extract_strided_slice %231 {offsets = [0, 0], sizes = [8, 128], strides = [1, 1]} : vector<8x384xf32> to vector<8x128xf32>
    %234 = vector.extract_strided_slice %232 {offsets = [0, 0], sizes = [8, 128], strides = [1, 1]} : vector<8x384xf32> to vector<8x128xf32>
    %235 = arith.addf %233, %234 : vector<8x128xf32>
    %236 = arith.negf %235 : vector<8x128xf32>
    %237 = math.exp %236 : vector<8x128xf32>
    %cst_57 = arith.constant 1.000000e+00 : f32
    %238 = vector.broadcast %cst_57 : f32 to vector<8x128xf32>
    %239 = arith.addf %238, %237 : vector<8x128xf32>
    %240 = arith.divf %238, %239 : vector<8x128xf32>
    %241 = vector.extract_strided_slice %231 {offsets = [0, 128], sizes = [8, 128], strides = [1, 1]} : vector<8x384xf32> to vector<8x128xf32>
    %242 = vector.extract_strided_slice %232 {offsets = [0, 128], sizes = [8, 128], strides = [1, 1]} : vector<8x384xf32> to vector<8x128xf32>
    %243 = arith.addf %241, %242 : vector<8x128xf32>
    %244 = arith.negf %243 : vector<8x128xf32>
    %245 = math.exp %244 : vector<8x128xf32>
    %cst_58 = arith.constant 1.000000e+00 : f32
    %246 = vector.broadcast %cst_58 : f32 to vector<8x128xf32>
    %247 = arith.addf %246, %245 : vector<8x128xf32>
    %248 = arith.divf %246, %247 : vector<8x128xf32>
    %249 = vector.extract_strided_slice %231 {offsets = [0, 256], sizes = [8, 128], strides = [1, 1]} : vector<8x384xf32> to vector<8x128xf32>
    %250 = vector.extract_strided_slice %232 {offsets = [0, 256], sizes = [8, 128], strides = [1, 1]} : vector<8x384xf32> to vector<8x128xf32>
    %251 = arith.addf %250, %10 : vector<8x128xf32>
    %252 = arith.mulf %240, %251 : vector<8x128xf32>
    %253 = arith.addf %249, %252 : vector<8x128xf32>
    %254 = math.tanh %253 : vector<8x128xf32>
    %cst_59 = arith.constant 1.000000e+00 : f32
    %255 = vector.broadcast %cst_59 : f32 to vector<8x128xf32>
    %256 = arith.subf %255, %248 : vector<8x128xf32>
    %257 = arith.mulf %256, %254 : vector<8x128xf32>
    %258 = arith.mulf %248, %228 : vector<8x128xf32>
    %259 = arith.addf %257, %258 : vector<8x128xf32>
    %c8_i32_60 = arith.constant 8 : i32
    %c0_61 = arith.constant 0 : index
    %c0_62 = arith.constant 0 : index
    %260 = vector.load %arg7[%c0_61, %c0_62] : memref<1x128xf32, #tpu.memory_space<vmem>>, vector<1x128xf32>
    %261 = vector.broadcast %260 : vector<1x128xf32> to vector<8x128xf32>
    %262 = arith.mulf %259, %261 : vector<8x128xf32>
    %cst_63 = arith.constant dense<0.000000e+00> : vector<8xf32>
    %263 = vector.multi_reduction <add>, %262, %cst_63 [1] : vector<8x128xf32> to vector<8xf32>
    %264 = vector.shape_cast %263 : vector<8xf32> to vector<8x1xf32>
    %265 = vector.extract_strided_slice %264 {offsets = [0, 0], sizes = [2, 1], strides = [1, 1]} : vector<8x1xf32> to vector<2x1xf32>
    %c0_64 = arith.constant 0 : index
    %c0_65 = arith.constant 0 : index
    %266 = vector.load %arg8[%c0_64, %c0_65] : memref<1x1xf32, #tpu.memory_space<vmem>>, vector<1x1xf32>
    %267 = vector.broadcast %266 : vector<1x1xf32> to vector<2x1xf32>
    %268 = arith.addf %265, %267 : vector<2x1xf32>
    %269 = arith.negf %268 : vector<2x1xf32>
    %270 = math.exp %269 : vector<2x1xf32>
    %cst_66 = arith.constant 1.000000e+00 : f32
    %271 = vector.broadcast %cst_66 : f32 to vector<2x1xf32>
    %272 = arith.addf %271, %270 : vector<2x1xf32>
    %273 = arith.divf %271, %272 : vector<2x1xf32>
    %c0_67 = arith.constant 0 : index
    %c0_68 = arith.constant 0 : index
    %274 = vector.load %arg9[%c0_67, %c0_68] : memref<2x1xf32, #tpu.memory_space<vmem>>, vector<2x1xf32>
    tpu.vector_store %arg9[%c0_67, %c0_68], %273 {strides = array<i32>} : memref<2x1xf32, #tpu.memory_space<vmem>>, vector<2x1xf32>,
    return
  }
  func.func @transform_0(%arg0: i32) -> (i32, i32) {
    %c0_i32 = arith.constant 0 : i32
    %c0_i32_0 = arith.constant 0 : i32
    %c0_i32_1 = arith.constant 0 : i32
    return %c0_i32, %c0_i32_0 : i32, i32
  }
  func.func @transform_1(%arg0: i32) -> (i32, i32) {
    %c0_i32 = arith.constant 0 : i32
    %c0_i32_0 = arith.constant 0 : i32
    %c0_i32_1 = arith.constant 0 : i32
    return %c0_i32, %c0_i32_0 : i32, i32
  }
  func.func @transform_2(%arg0: i32) -> (i32, i32) {
    %c0_i32 = arith.constant 0 : i32
    %c0_i32_0 = arith.constant 0 : i32
    %c0_i32_1 = arith.constant 0 : i32
    return %c0_i32, %c0_i32_0 : i32, i32
  }
  func.func @transform_3(%arg0: i32) -> (i32, i32) {
    %c0_i32 = arith.constant 0 : i32
    %c0_i32_0 = arith.constant 0 : i32
    %c0_i32_1 = arith.constant 0 : i32
    return %c0_i32, %c0_i32_0 : i32, i32
  }
  func.func @transform_4(%arg0: i32) -> (i32, i32) {
    %c0_i32 = arith.constant 0 : i32
    %c0_i32_0 = arith.constant 0 : i32
    %c0_i32_1 = arith.constant 0 : i32
    return %c0_i32, %c0_i32_0 : i32, i32
  }
  func.func @transform_5(%arg0: i32) -> (i32, i32) {
    %c0_i32 = arith.constant 0 : i32
    %c0_i32_0 = arith.constant 0 : i32
    %c0_i32_1 = arith.constant 0 : i32
    return %c0_i32, %c0_i32_0 : i32, i32
  }
  func.func @transform_6(%arg0: i32) -> (i32, i32) {
    %c0_i32 = arith.constant 0 : i32
    %c0_i32_0 = arith.constant 0 : i32
    %c0_i32_1 = arith.constant 0 : i32
    return %c0_i32, %c0_i32_0 : i32, i32
  }
  func.func @transform_7(%arg0: i32) -> (i32, i32) {
    %c0_i32 = arith.constant 0 : i32
    %c0_i32_0 = arith.constant 0 : i32
    %c0_i32_1 = arith.constant 0 : i32
    return %c0_i32, %c0_i32_0 : i32, i32
  }
  func.func @transform_8(%arg0: i32) -> (i32, i32) {
    %c0_i32 = arith.constant 0 : i32
    %c0_i32_0 = arith.constant 0 : i32
    %c0_i32_1 = arith.constant 0 : i32
    return %c0_i32, %c0_i32_0 : i32, i32
  }
}

</mosaic_0001>

<bundles_post_ra>
// kernel: tpu_custom_call.1
= control target key start
LH: loop header
LB: loop body
LE: loop exit
PB: predicated region body
PF: predicated region fallthrough
CT: control target
= control target key end

     0   :  { %s4515_s0 = inlined_call_operand.hbm [shape: f32[64,603], index: 0, kind: input, shape index: {}]   ;;  %s4516_s1 = inlined_call_operand.hbm [shape: f32[8,128], index: 1, kind: input, shape index: {}]   ;;  %s4517_s2 = inlined_call_operand.hbm [shape: f32[603,384], index: 2, kind: input, shape index: {}]   ;;  %s4518_s3 = inlined_call_operand.hbm [shape: f32[128,384], index: 3, kind: input, shape index: {}]   ;;  %s4519_s4 = inlined_call_operand.vmem [shape: f32[1,384], index: 4, kind: input, shape index: {}]   ;;  %s4520_s5 = inlined_call_operand.vmem [shape: f32[1,128], index: 5, kind: input, shape index: {}]   ;;  %s4521_s6 = inlined_call_operand.vmem [shape: f32[1,128], index: 6, kind: input, shape index: {}]   ;;  %s4522_s7 = inlined_call_operand.<no memory space> [shape: f32[1,1], index: 7, kind: input, shape index: {}]   ;;  %s4523_s8 = inlined_call_operand.vmem [shape: f32[2,1], index: 8, kind: output, shape index: {}]  }
   0x1   :  { %v13_v0 = vstv %s4522_s7 }
   0x2   :  { %14 = vst [vmem:[#allocation3] sm:$0x1] %v13_v0 }
   0x3   :  { %15 = vsyncpa [#allocation5], 0 }
   0x4   :  { %16 = vsyncpa [#allocation7], 0 }
   0x5   :  { %17 = vsyncpa [#allocation10], 0  ;;  %s3351_s29 = smov [#allocation6]   ;;  %s3352_s9 = smov [#allocation4]  }
   0x6   :  { %s36_s30 = sshll.u32 %s3351_s29, 4  ;;  %s23_s10 = sshll.u32 %s3352_s9, 4  ;;  %s37_s30 = int_to_ptr.vmem [resolvable:$true] %s36_s30  ;;  %s24_s10 = int_to_ptr.vmem [resolvable:$true] %s23_s10 }
   0x7   :  { %s3273_s11 = scalar_lea.vmem %s37_s30, 128  ;;  %p3278_p1 = scmp.lt.s32.totalorder %s37_s30, %s37_s30 }
   0x8   :  { %p3274_p0 = scmp.ne.s32.totalorder %s37_s30, %s3273_s11  ;;  %p3279_p2 = scmp.lt.s32.totalorder %s3273_s11, %s3273_s11 }
   0xa   :  { %p3280_p3 = por %p3279_p2, %p3278_p1 }
   0xc   :  { %p3281_p4 = pnand %p3280_p3, %p3274_p0 }
   0xe   :  { %3284 = shalt.err (!%p3281_p4)
}
   0xf   :  { %39 = dma.hbm_to_vmem [thread:$0]  %s4516_s1, 128, %s37_s30, [#allocation7]  }
  0x10   :  { %s3293_s7 = scalar_lea.vmem %s24_s10, 5120  ;;  %p3298_p6 = scmp.lt.s32.totalorder %s24_s10, %s24_s10 }
  0x11   :  { %p3294_p5 = scmp.ne.s32.totalorder %s24_s10, %s3293_s7  ;;  %p3299_p7 = scmp.lt.s32.totalorder %s3293_s7, %s3293_s7 }
  0x13   :  { %p3300_p8 = por %p3299_p7, %p3298_p6 }
  0x15   :  { %p3301_p9 = pnand %p3300_p8, %p3294_p5 }
  0x17   :  { %3304 = shalt.err (!%p3301_p9)
}
  0x18   :  { %s3353_s14 = smov 640   ;;  %s3354_s15 = smov 40  }
  0x19   :  { %29 = dma.hbm_to_vmem [thread:$0]  %s4515_s0, 5120, %s24_s10, [#allocation5], %s3353_s14, %s3353_s14, %s3354_s15  }
  0x1a   :  { %s3355_s18 = smov [#allocation8]  }
  0x1b   :  { %s45_s19 = sshll.u32 %s3355_s18, 4  ;;  %s46_s19 = int_to_ptr.vmem [resolvable:$true] %s45_s19 }
  0x1c   :  { %s3313_s20 = scalar_lea.vmem %s46_s19, 29184  ;;  %p3318_p11 = scmp.lt.s32.totalorder %s46_s19, %s46_s19 }
  0x1d   :  { %p3314_p10 = scmp.ne.s32.totalorder %s46_s19, %s3313_s20  ;;  %p3319_p12 = scmp.lt.s32.totalorder %s3313_s20, %s3313_s20 }
  0x1f   :  { %p3320_p13 = por %p3319_p12, %p3318_p11 }
  0x21   :  { %p3321_p0 = pnand %p3320_p13, %p3314_p10 }
  0x23   :  { %3324 = shalt.err (!%p3321_p0)
}
  0x24   :  { %s3356_s1 = smov 384   ;;  %s3357_s21 = smov 24  }
  0x25   :  { %51 = dma.hbm_to_vmem [thread:$0]  %s4517_s2, 29184, %s46_s19, [#allocation7], %s3356_s1, %s3356_s1, %s3357_s21  }
  0x26   :  { %s3358_s24 = smov [#allocation9]  }
  0x27   :  { %s57_s25 = sshll.u32 %s3358_s24, 4  ;;  %s58_s25 = int_to_ptr.vmem [resolvable:$true] %s57_s25 }
  0x28   :  { %s3333_s0 = scalar_lea.vmem %s58_s25, 6144  ;;  %p3338_p2 = scmp.lt.s32.totalorder %s58_s25, %s58_s25 }
  0x29   :  { %p3334_p1 = scmp.ne.s32.totalorder %s58_s25, %s3333_s0  ;;  %p3339_p3 = scmp.lt.s32.totalorder %s3333_s0, %s3333_s0 }
  0x2b   :  { %p3340_p4 = por %p3339_p3, %p3338_p2 }
  0x2d   :  { %p3341_p5 = pnand %p3340_p4, %p3334_p1 }
  0x2f   :  { %3344 = shalt.err (!%p3341_p5)
}
  0x30   :  { %63 = dma.hbm_to_vmem [thread:$0]  %s4518_s3, 6144, %s58_s25, [#allocation10], %s3356_s1, %s3356_s1, %s3357_s21  }
  0x31   :  { %3345 = dma.done.wait [#allocation5], 5120  }
  0x32   :  { %3346 = vsyncadd [#allocation5], 4294962176 }
  0x33   :  { %3347 = dma.done.wait [#allocation7], 29312  }
  0x34   :  { %3348 = vsyncadd [#allocation7], 4294937984 }
  0x35   :  { %3349 = dma.done.wait [#allocation10], 6144  }
  0x36   :  { %3350 = vsyncadd [#allocation10], 4294961152  ;;  %v170_v1 = vld [vmem:[#allocation8 + $0x170] sm:$0xff]  ;;  %v169_v2 = vld [vmem:[#allocation8 + $0x168] sm:$0xff]  ;;  %vm394_vm0 = vcmask 1042432   ;;  %vm369_vm1 = vcmask 744448  }
  0x37   :  { %v167_v3 = vld [vmem:[#allocation8 + $0x158] sm:$0xff]  ;;  %404 = vmatprep.subr.mxu0 %v170_v1  ;;  %v266_v4 = vld [vmem:[#allocation8 + $0x470] sm:$0xff]  ;;  %v265_v6 = vld [vmem:[#allocation8 + $0x468] sm:$0xff]  ;;  %vm3360_vm2 = vmmov 0   ;;  %vm2490_vm3 = vcmask 1024  }
  0x38   :  { %v166_v5 = vld [vmem:[#allocation8 + $0x150] sm:$0xff]  ;;  %405 = vmatpush1.msra.mxu0 %v169_v2  ;;  %517 = vmatprep.subr.mxu1 %v266_v4  ;;  %v164_v7 = vld [vmem:[#allocation8 + $0x140] sm:$0xff]  ;;  %v263_v8 = vld [vmem:[#allocation8 + $0x458] sm:$0xff] }
  0x39   :  { %406 = vmatprep.subr.mxu0 %v167_v3  ;;  %518 = vmatpush1.msra.mxu1 %v265_v6  ;;  %v163_v9 = vld [vmem:[#allocation8 + $0x138] sm:$0xff]  ;;  %v262_v10 = vld [vmem:[#allocation8 + $0x450] sm:$0xff]  ;;  %v260_v11 = vld [vmem:[#allocation8 + $0x440] sm:$0xff] }
  0x3a   :  { %407 = vmatpush1.msra.mxu0 %v166_v5  ;;  %519 = vmatprep.subr.mxu1 %v263_v8  ;;  %v161_v12 = vld [vmem:[#allocation8 + $0x128] sm:$0xff]  ;;  %v259_v13 = vld [vmem:[#allocation8 + $0x438] sm:$0xff]  ;;  %v160_v14 = vld [vmem:[#allocation8 + $0x120] sm:$0xff] }
  0x3b   :  { %408 = vmatprep.subr.mxu0 %v164_v7  ;;  %520 = vmatpush1.msra.mxu1 %v262_v10  ;;  %v257_v15 = vld [vmem:[#allocation8 + $0x428] sm:$0xff]  ;;  %v158_v16 = vld [vmem:[#allocation8 + $0x110] sm:$0xff]  ;;  %v256_v17 = vld [vmem:[#allocation8 + $0x420] sm:$0xff] }
  0x3c   :  { %409 = vmatpush1.msra.mxu0 %v163_v9  ;;  %521 = vmatprep.subr.mxu1 %v260_v11  ;;  %v157_v18 = vld [vmem:[#allocation8 + $0x108] sm:$0xff]  ;;  %v254_v19 = vld [vmem:[#allocation8 + $0x410] sm:$0xff]  ;;  %v155_v20 = vld [vmem:[#allocation8 + $0xf8] sm:$0xff] }
  0x3d   :  { %410 = vmatprep.subr.mxu0 %v161_v12  ;;  %522 = vmatpush1.msra.mxu1 %v259_v13  ;;  %v253_v21 = vld [vmem:[#allocation8 + $0x408] sm:$0xff]  ;;  %v154_v22 = vld [vmem:[#allocation8 + $0xf0] sm:$0xff]  ;;  %v251_v23 = vld [vmem:[#allocation8 + $0x3f8] sm:$0xff] }
  0x3e   :  { %411 = vmatpush1.msra.mxu0 %v160_v14  ;;  %523 = vmatprep.subr.mxu1 %v257_v15  ;;  %v152_v24 = vld [vmem:[#allocation8 + $0xe0] sm:$0xff]  ;;  %v250_v25 = vld [vmem:[#allocation8 + $0x3f0] sm:$0xff]  ;;  %v151_v26 = vld [vmem:[#allocation8 + $0xd8] sm:$0xff] }
  0x3f   :  { %412 = vmatprep.subr.mxu0 %v158_v16  ;;  %524 = vmatpush1.msra.mxu1 %v256_v17  ;;  %v248_v27 = vld [vmem:[#allocation8 + $0x3e0] sm:$0xff]  ;;  %v149_v28 = vld [vmem:[#allocation8 + $0xc8] sm:$0xff]  ;;  %v247_v29 = vld [vmem:[#allocation8 + $0x3d8] sm:$0xff] }
  0x40   :  { %413 = vmatpush1.msra.mxu0 %v157_v18  ;;  %525 = vmatprep.subr.mxu1 %v254_v19  ;;  %v148_v30 = vld [vmem:[#allocation8 + $0xc0] sm:$0xff]  ;;  %v245_v31 = vld [vmem:[#allocation8 + $0x3c8] sm:$0xff]  ;;  %v146_v32 = vld [vmem:[#allocation8 + $0xb0] sm:$0xff] }
  0x41   :  { %414 = vmatprep.subr.mxu0 %v155_v20  ;;  %526 = vmatpush1.msra.mxu1 %v253_v21  ;;  %v244_v33 = vld [vmem:[#allocation8 + $0x3c0] sm:$0xff]  ;;  %v145_v34 = vld [vmem:[#allocation8 + $0xa8] sm:$0xff]  ;;  %v242_v35 = vld [vmem:[#allocation8 + $0x3b0] sm:$0xff] }
  0x42   :  { %415 = vmatpush1.msra.mxu0 %v154_v22  ;;  %527 = vmatprep.subr.mxu1 %v251_v23  ;;  %v143_v36 = vld [vmem:[#allocation8 + $0x98] sm:$0xff]  ;;  %v241_v37 = vld [vmem:[#allocation8 + $0x3a8] sm:$0xff]  ;;  %v142_v38 = vld [vmem:[#allocation8 + $0x90] sm:$0xff] }
  0x43   :  { %416 = vmatprep.subr.mxu0 %v152_v24  ;;  %528 = vmatpush1.msra.mxu1 %v250_v25  ;;  %v239_v39 = vld [vmem:[#allocation8 + $0x398] sm:$0xff]  ;;  %v140_v40 = vld [vmem:[#allocation8 + $0x80] sm:$0xff]  ;;  %v238_v41 = vld [vmem:[#allocation8 + $0x390] sm:$0xff] }
  0x44   :  { %417 = vmatpush1.msra.mxu0 %v151_v26  ;;  %529 = vmatprep.subr.mxu1 %v248_v27  ;;  %v139_v42 = vld [vmem:[#allocation8 + $0x78] sm:$0xff]  ;;  %v236_v43 = vld [vmem:[#allocation8 + $0x380] sm:$0xff]  ;;  %v137_v44 = vld [vmem:[#allocation8 + $0x68] sm:$0xff] }
  0x45   :  { %418 = vmatprep.subr.mxu0 %v149_v28  ;;  %530 = vmatpush1.msra.mxu1 %v247_v29  ;;  %v235_v45 = vld [vmem:[#allocation8 + $0x378] sm:$0xff]  ;;  %v136_v46 = vld [vmem:[#allocation8 + $0x60] sm:$0xff]  ;;  %v233_v47 = vld [vmem:[#allocation8 + $0x368] sm:$0xff] }
  0x46   :  { %419 = vmatpush1.msra.mxu0 %v148_v30  ;;  %531 = vmatprep.subr.mxu1 %v245_v31  ;;  %v134_v48 = vld [vmem:[#allocation8 + $0x50] sm:$0xff]  ;;  %v232_v49 = vld [vmem:[#allocation8 + $0x360] sm:$0xff]  ;;  %v133_v50 = vld [vmem:[#allocation8 + $0x48] sm:$0xff] }
  0x47   :  { %420 = vmatprep.subr.mxu0 %v146_v32  ;;  %532 = vmatpush1.msra.mxu1 %v244_v33  ;;  %v230_v51 = vld [vmem:[#allocation8 + $0x350] sm:$0xff]  ;;  %v131_v52 = vld [vmem:[#allocation8 + $0x38] sm:$0xff]  ;;  %v229_v53 = vld [vmem:[#allocation8 + $0x348] sm:$0xff] }
  0x48   :  { %421 = vmatpush1.msra.mxu0 %v145_v34  ;;  %533 = vmatprep.subr.mxu1 %v242_v35  ;;  %v130_v54 = vld [vmem:[#allocation8 + $0x30] sm:$0xff]  ;;  %v227_v55 = vld [vmem:[#allocation8 + $0x338] sm:$0xff]  ;;  %v128_v56 = vld [vmem:[#allocation8 + $0x20] sm:$0xff] }
  0x49   :  { %422 = vmatprep.subr.mxu0 %v143_v36  ;;  %534 = vmatpush1.msra.mxu1 %v241_v37  ;;  %v226_v57 = vld [vmem:[#allocation8 + $0x330] sm:$0xff]  ;;  %v127_v58 = vld [vmem:[#allocation8 + $0x18] sm:$0xff]  ;;  %v224_v59 = vld [vmem:[#allocation8 + $0x320] sm:$0xff] }
  0x4a   :  { %423 = vmatpush1.msra.mxu0 %v142_v38  ;;  %535 = vmatprep.subr.mxu1 %v239_v39  ;;  %v125_v60 = vld [vmem:[#allocation8 + $0x8] sm:$0xff]  ;;  %v223_v61 = vld [vmem:[#allocation8 + $0x318] sm:$0xff]  ;;  %v124_v62 = vld [vmem:[#allocation8] sm:$0xff] }
  0x4b   :  { %424 = vmatprep.subr.mxu0 %v140_v40  ;;  %536 = vmatpush1.msra.mxu1 %v238_v41  ;;  %v221_v63 = vld [vmem:[#allocation8 + $0x308] sm:$0xff]  ;;  %v218_v0 = vld [vmem:[#allocation8 + $0x2f0] sm:$0xff]  ;;  %v220_v1 = vld [vmem:[#allocation8 + $0x300] sm:$0xff] }
  0x4c   :  { %425 = vmatpush1.msra.mxu0 %v139_v42  ;;  %537 = vmatprep.subr.mxu1 %v236_v43  ;;  %v217_v2 = vld [vmem:[#allocation8 + $0x2e8] sm:$0xff]  ;;  %v314_v3 = vld [vmem:[#allocation8 + $0x5f0] sm:$0xff]  ;;  %v215_v4 = vld [vmem:[#allocation8 + $0x2d8] sm:$0xff] }
  0x4d   :  { %426 = vmatprep.subr.mxu0 %v137_v44  ;;  %538 = vmatpush1.msra.mxu1 %v235_v45  ;;  %v313_v5 = vld [vmem:[#allocation8 + $0x5e8] sm:$0xff]  ;;  %v214_v6 = vld [vmem:[#allocation8 + $0x2d0] sm:$0xff]  ;;  %v311_v7 = vld [vmem:[#allocation8 + $0x5d8] sm:$0xff] }
  0x4e   :  { %427 = vmatpush1.msra.mxu0 %v136_v46  ;;  %539 = vmatprep.subr.mxu1 %v233_v47  ;;  %v212_v8 = vld [vmem:[#allocation8 + $0x2c0] sm:$0xff]  ;;  %v310_v9 = vld [vmem:[#allocation8 + $0x5d0] sm:$0xff]  ;;  %v211_v10 = vld [vmem:[#allocation8 + $0x2b8] sm:$0xff] }
  0x4f   :  { %428 = vmatprep.subr.mxu0 %v134_v48  ;;  %540 = vmatpush1.msra.mxu1 %v232_v49  ;;  %v308_v11 = vld [vmem:[#allocation8 + $0x5c0] sm:$0xff]  ;;  %v209_v12 = vld [vmem:[#allocation8 + $0x2a8] sm:$0xff]  ;;  %v307_v13 = vld [vmem:[#allocation8 + $0x5b8] sm:$0xff] }
  0x50   :  { %429 = vmatpush1.msra.mxu0 %v133_v50  ;;  %541 = vmatprep.subr.mxu1 %v230_v51  ;;  %v208_v14 = vld [vmem:[#allocation8 + $0x2a0] sm:$0xff]  ;;  %v305_v15 = vld [vmem:[#allocation8 + $0x5a8] sm:$0xff]  ;;  %v206_v16 = vld [vmem:[#allocation8 + $0x290] sm:$0xff] }
  0x51   :  { %430 = vmatprep.subr.mxu0 %v131_v52  ;;  %542 = vmatpush1.msra.mxu1 %v229_v53  ;;  %v304_v17 = vld [vmem:[#allocation8 + $0x5a0] sm:$0xff]  ;;  %v205_v18 = vld [vmem:[#allocation8 + $0x288] sm:$0xff]  ;;  %v302_v19 = vld [vmem:[#allocation8 + $0x590] sm:$0xff] }
  0x52   :  { %431 = vmatpush1.msra.mxu0 %v130_v54  ;;  %543 = vmatprep.subr.mxu1 %v227_v55  ;;  %v203_v20 = vld [vmem:[#allocation8 + $0x278] sm:$0xff]  ;;  %v301_v21 = vld [vmem:[#allocation8 + $0x588] sm:$0xff]  ;;  %v202_v22 = vld [vmem:[#allocation8 + $0x270] sm:$0xff] }
  0x53   :  { %432 = vmatprep.subr.mxu0 %v128_v56  ;;  %544 = vmatpush1.msra.mxu1 %v226_v57  ;;  %v299_v23 = vld [vmem:[#allocation8 + $0x578] sm:$0xff]  ;;  %v200_v24 = vld [vmem:[#allocation8 + $0x260] sm:$0xff]  ;;  %v298_v25 = vld [vmem:[#allocation8 + $0x570] sm:$0xff] }
  0x54   :  { %433 = vmatpush1.msra.mxu0 %v127_v58  ;;  %545 = vmatprep.subr.mxu1 %v224_v59  ;;  %v199_v26 = vld [vmem:[#allocation8 + $0x258] sm:$0xff]  ;;  %v296_v27 = vld [vmem:[#allocation8 + $0x560] sm:$0xff]  ;;  %v197_v28 = vld [vmem:[#allocation8 + $0x248] sm:$0xff] }
  0x55   :  { %434 = vmatprep.subr.mxu0 %v125_v60  ;;  %546 = vmatpush1.msra.mxu1 %v223_v61  ;;  %v295_v29 = vld [vmem:[#allocation8 + $0x558] sm:$0xff]  ;;  %v196_v30 = vld [vmem:[#allocation8 + $0x240] sm:$0xff]  ;;  %v293_v31 = vld [vmem:[#allocation8 + $0x548] sm:$0xff] }
  0x56   :  { %435 = vmatpush1.msra.mxu0 %v124_v62  ;;  %547 = vmatprep.subr.mxu1 %v221_v63  ;;  %v194_v32 = vld [vmem:[#allocation8 + $0x230] sm:$0xff]  ;;  %v292_v33 = vld [vmem:[#allocation8 + $0x540] sm:$0xff]  ;;  %v193_v34 = vld [vmem:[#allocation8 + $0x228] sm:$0xff] }
  0x57   :  { %436 = vmatprep.subr.mxu0 %v218_v0  ;;  %548 = vmatpush1.msra.mxu1 %v220_v1  ;;  %v290_v35 = vld [vmem:[#allocation8 + $0x530] sm:$0xff]  ;;  %v191_v36 = vld [vmem:[#allocation8 + $0x218] sm:$0xff]  ;;  %v289_v37 = vld [vmem:[#allocation8 + $0x528] sm:$0xff] }
  0x58   :  { %437 = vmatpush2.msra.mxu0 %v217_v2  ;;  %549 = vmatprep.subr.mxu1 %v314_v3  ;;  %v190_v38 = vld [vmem:[#allocation8 + $0x210] sm:$0xff]  ;;  %v287_v39 = vld [vmem:[#allocation8 + $0x518] sm:$0xff]  ;;  %v188_v40 = vld [vmem:[#allocation8 + $0x200] sm:$0xff] }
  0x59   :  { %438 = vmatprep.subr.mxu0 %v215_v4  ;;  %550 = vmatpush2.msra.mxu1 %v313_v5  ;;  %v286_v41 = vld [vmem:[#allocation8 + $0x510] sm:$0xff]  ;;  %v187_v42 = vld [vmem:[#allocation8 + $0x1f8] sm:$0xff]  ;;  %v284_v43 = vld [vmem:[#allocation8 + $0x500] sm:$0xff] }
  0x5a   :  { %439 = vmatpush2.msra.mxu0 %v214_v6  ;;  %551 = vmatprep.subr.mxu1 %v311_v7  ;;  %v185_v44 = vld [vmem:[#allocation8 + $0x1e8] sm:$0xff]  ;;  %v283_v45 = vld [vmem:[#allocation8 + $0x4f8] sm:$0xff]  ;;  %v184_v46 = vld [vmem:[#allocation8 + $0x1e0] sm:$0xff] }
  0x5b   :  { %440 = vmatprep.subr.mxu0 %v212_v8  ;;  %552 = vmatpush2.msra.mxu1 %v310_v9  ;;  %v281_v47 = vld [vmem:[#allocation8 + $0x4e8] sm:$0xff]  ;;  %v182_v48 = vld [vmem:[#allocation8 + $0x1d0] sm:$0xff]  ;;  %v280_v49 = vld [vmem:[#allocation8 + $0x4e0] sm:$0xff] }
  0x5c   :  { %441 = vmatpush2.msra.mxu0 %v211_v10  ;;  %553 = vmatprep.subr.mxu1 %v308_v11  ;;  %v181_v50 = vld [vmem:[#allocation8 + $0x1c8] sm:$0xff]  ;;  %v278_v51 = vld [vmem:[#allocation8 + $0x4d0] sm:$0xff]  ;;  %v179_v52 = vld [vmem:[#allocation8 + $0x1b8] sm:$0xff] }
  0x5d   :  { %442 = vmatprep.subr.mxu0 %v209_v12  ;;  %554 = vmatpush2.msra.mxu1 %v307_v13  ;;  %v277_v53 = vld [vmem:[#allocation8 + $0x4c8] sm:$0xff]  ;;  %v178_v54 = vld [vmem:[#allocation8 + $0x1b0] sm:$0xff]  ;;  %v275_v55 = vld [vmem:[#allocation8 + $0x4b8] sm:$0xff] }
  0x5e   :  { %443 = vmatpush2.msra.mxu0 %v208_v14  ;;  %555 = vmatprep.subr.mxu1 %v305_v15  ;;  %v176_v56 = vld [vmem:[#allocation8 + $0x1a0] sm:$0xff]  ;;  %v274_v57 = vld [vmem:[#allocation8 + $0x4b0] sm:$0xff]  ;;  %v175_v58 = vld [vmem:[#allocation8 + $0x198] sm:$0xff] }
  0x5f   :  { %444 = vmatprep.subr.mxu0 %v206_v16  ;;  %556 = vmatpush2.msra.mxu1 %v304_v17  ;;  %v272_v59 = vld [vmem:[#allocation8 + $0x4a0] sm:$0xff]  ;;  %v173_v60 = vld [vmem:[#allocation8 + $0x188] sm:$0xff]  ;;  %v271_v63 = vld [vmem:[#allocation8 + $0x498] sm:$0xff] }
  0x60   :  { %445 = vmatpush2.msra.mxu0 %v205_v18  ;;  %557 = vmatprep.subr.mxu1 %v302_v19  ;;  %v3421_v61 = vld [vmem:[#allocation4 + $0x8] sm:$0xff]  ;;  %v3423_v0 = vld [vmem:[#allocation4] sm:$0xff]  ;;  %v269_v1 = vld [vmem:[#allocation8 + $0x488] sm:$0xff] }
  0x61   :  { %446 = vmatprep.subr.mxu0 %v203_v20  ;;  %558 = vmatpush2.msra.mxu1 %v301_v21  ;;  %v172_v62 = vld [vmem:[#allocation8 + $0x180] sm:$0xff]  ;;  %v350_v2 = vld [vmem:[#allocation8 + $0x710] sm:$0x7]  ;;  %v349_v5 = vld [vmem:[#allocation8 + $0x708] sm:$0x7] }
  0x62   :  { %447 = vmatpush2.msra.mxu0 %v202_v22  ;;  %559 = vmatprep.subr.mxu1 %v299_v23  ;;  %v268_v3 = vld [vmem:[#allocation8 + $0x480] sm:$0xff]  ;;  %v3426_v4 = vld [vmem:[#allocation4 + $0x18] sm:$0xff]  ;;  %v3429_v6 = vld [vmem:[#allocation4 + $0x10] sm:$0xff] }
  0x63   :  { %448 = vmatprep.subr.mxu0 %v200_v24  ;;  %560 = vmatpush2.msra.mxu1 %v298_v25  ;;  %v3431_v7 = vld [vmem:[#allocation4 + $0x30] sm:$0xff]  ;;  %v347_v8 = vld [vmem:[#allocation8 + $0x6f8] sm:$0xff]  ;;  %v3434_v9 = vld [vmem:[#allocation4 + $0x28] sm:$0xff] }
  0x64   :  { %449 = vmatpush2.msra.mxu0 %v199_v26  ;;  %561 = vmatprep.subr.mxu1 %v296_v27  ;;  %v346_v10 = vld [vmem:[#allocation8 + $0x6f0] sm:$0xff]  ;;  %v219_v11 = vld [vmem:[#allocation8 + $0x2f8] sm:$0xff]  ;;  %v344_v15 = vld [vmem:[#allocation8 + $0x6e0] sm:$0xff] }
  0x65   :  { %450 = vmatprep.subr.mxu0 %v197_v28  ;;  %562 = vmatpush2.msra.mxu1 %v295_v29  ;;  %v3440_v12 = vld [vmem:[#allocation4 + $0x40] sm:$0xff]  ;;  %v3443_v14 = vld [vmem:[#allocation4 + $0x38] sm:$0xff]  ;;  %v216_v16 = vld [vmem:[#allocation8 + $0x2e0] sm:$0xff] }
  0x66   :  { %451 = vmatpush2.msra.mxu0 %v196_v30  ;;  %563 = vmatprep.subr.mxu1 %v293_v31  ;;  %v171_v13 = vld [vmem:[#allocation8 + $0x178] sm:$0xff]  ;;  %v3445_v17 = vld [vmem:[#allocation4 + $0x58] sm:$0xff]  ;;  %v168_v19 = vld [vmem:[#allocation8 + $0x160] sm:$0xff] }
  0x67   :  { %452 = vmatprep.subr.mxu0 %v194_v32  ;;  %564 = vmatpush2.msra.mxu1 %v292_v33  ;;  %v343_v18 = vld [vmem:[#allocation8 + $0x6d8] sm:$0xff]  ;;  %v3449_v20 = vld [vmem:[#allocation4 + $0x50] sm:$0xff]  ;;  %v3452_v23 = vld [vmem:[#allocation4 + $0x68] sm:$0xff] }
  0x68   :  { %453 = vmatpush2.msra.mxu0 %v193_v34  ;;  %565 = vmatprep.subr.mxu1 %v290_v35  ;;  %v341_v21 = vld [vmem:[#allocation8 + $0x6c8] sm:$0xff]  ;;  %v340_v24 = vld [vmem:[#allocation8 + $0x6c0] sm:$0xff]  ;;  %v3455_v26 = vld [vmem:[#allocation4 + $0x60] sm:$0xff] }
  0x69   :  { %454 = vmatprep.subr.mxu0 %v191_v36  ;;  %566 = vmatpush2.msra.mxu1 %v289_v37  ;;  %v213_v22 = vld [vmem:[#allocation8 + $0x2c8] sm:$0xff]  ;;  %v210_v27 = vld [vmem:[#allocation8 + $0x2b0] sm:$0xff]  ;;  %v3458_v28 = vld [vmem:[#allocation4 + $0x80] sm:$0xff] }
  0x6a   :  { %455 = vmatpush2.msra.mxu0 %v190_v38  ;;  %567 = vmatprep.subr.mxu1 %v287_v39  ;;  %v165_v25 = vld [vmem:[#allocation8 + $0x148] sm:$0xff]  ;;  %v338_v29 = vld [vmem:[#allocation8 + $0x6b0] sm:$0xff]  ;;  %v207_v33 = vld [vmem:[#allocation8 + $0x298] sm:$0xff] }
  0x6b   :  { %456 = vmatprep.subr.mxu0 %v188_v40  ;;  %568 = vmatpush2.msra.mxu1 %v286_v41  ;;  %v162_v30 = vld [vmem:[#allocation8 + $0x130] sm:$0xff]  ;;  %v337_v32 = vld [vmem:[#allocation8 + $0x6a8] sm:$0xff]  ;;  %v159_v35 = vld [vmem:[#allocation8 + $0x118] sm:$0xff] }
  0x6c   :  { %457 = vmatpush2.msra.mxu0 %v187_v42  ;;  %569 = vmatprep.subr.mxu1 %v284_v43  ;;  %v3460_v31 = vld [vmem:[#allocation4 + $0x78] sm:$0xff]  ;;  %v3464_v34 = vld [vmem:[#allocation4 + $0x90] sm:$0xff]  ;;  %v3467_v36 = vld [vmem:[#allocation4 + $0x88] sm:$0xff] }
  0x6d   :  { %458 = vmatprep.subr.mxu0 %v185_v44  ;;  %570 = vmatpush2.msra.mxu1 %v283_v45  ;;  %v335_v37 = vld [vmem:[#allocation8 + $0x698] sm:$0xff]  ;;  %v204_v38 = vld [vmem:[#allocation8 + $0x280] sm:$0xff]  ;;  %v334_v40 = vld [vmem:[#allocation8 + $0x690] sm:$0xff] }
  0x6e   :  { %459 = vmatpush2.msra.mxu0 %v184_v46  ;;  %571 = vmatprep.subr.mxu1 %v281_v47  ;;  %v3469_v39 = vld [vmem:[#allocation4 + $0xa8] sm:$0xff]  ;;  %v3473_v42 = vld [vmem:[#allocation4 + $0xa0] sm:$0xff]  ;;  %v201_v44 = vld [vmem:[#allocation8 + $0x268] sm:$0xff] }
  0x6f   :  { %460 = vmatprep.subr.mxu0 %v182_v48  ;;  %572 = vmatpush2.msra.mxu1 %v280_v49  ;;  %v156_v41 = vld [vmem:[#allocation8 + $0x100] sm:$0xff]  ;;  %v3476_v45 = vld [vmem:[#allocation4 + $0xb8] sm:$0xff]  ;;  %v331_v46 = vld [vmem:[#allocation8 + $0x678] sm:$0xff] }
  0x70   :  { %461 = vmatpush2.msra.mxu0 %v181_v50  ;;  %573 = vmatprep.subr.mxu1 %v278_v51  ;;  %v332_v43 = vld [vmem:[#allocation8 + $0x680] sm:$0xff]  ;;  %v153_v47 = vld [vmem:[#allocation8 + $0xe8] sm:$0xff]  ;;  %v198_v49 = vld [vmem:[#allocation8 + $0x250] sm:$0xff] }
  0x71   :  { %462 = vmatprep.subr.mxu0 %v179_v52  ;;  %574 = vmatpush2.msra.mxu1 %v277_v53  ;;  %v3479_v48 = vld [vmem:[#allocation4 + $0xb0] sm:$0xff]  ;;  %v150_v52 = vld [vmem:[#allocation8 + $0xd0] sm:$0xff]  ;;  %v3484_v53 = vld [vmem:[#allocation4 + $0xc8] sm:$0xff] }
  0x72   :  { %463 = vmatpush2.msra.mxu0 %v178_v54  ;;  %575 = vmatprep.subr.mxu1 %v275_v55  ;;  %v3482_v50 = vld [vmem:[#allocation4 + $0xd0] sm:$0xff]  ;;  %v328_v54 = vld [vmem:[#allocation8 + $0x660] sm:$0xff]  ;;  %v195_v55 = vld [vmem:[#allocation8 + $0x238] sm:$0xff] }
  0x73   :  { %464 = vmatprep.subr.mxu0 %v176_v56  ;;  %576 = vmatpush2.msra.mxu1 %v274_v57  ;;  %v329_v51 = vld [vmem:[#allocation8 + $0x668] sm:$0xff]  ;;  %v3488_v56 = vld [vmem:[#allocation4 + $0xe0] sm:$0xff] }
  0x74   :  { %465 = vmatpush2.msra.mxu0 %v175_v58  ;;  %577 = vmatprep.subr.mxu1 %v272_v59  ;;  %v147_v57 = vld [vmem:[#allocation8 + $0xb8] sm:$0xff]  ;;  %v3491_v58 = vld [vmem:[#allocation4 + $0xd8] sm:$0xff] }
  0x75   :  { %466 = vmatprep.subr.mxu0 %v173_v60  ;;  %468 = vmatprep.mubr.f32.mxu0 %v3421_v61  ;;  %v326_v59 = vld [vmem:[#allocation8 + $0x650] sm:$0xff]  ;;  %v192_v60 = vld [vmem:[#allocation8 + $0x220] sm:$0xff] }
  0x76   :  { %467 = vmatpush2.msra.mxu0 %v172_v62  ;;  %578 = vmatpush2.msra.mxu1 %v271_v63  ;;  %v3493_v62 = vld [vmem:[#allocation4 + $0xf8] sm:$0xff]  ;;  %v325_v63 = vld [vmem:[#allocation8 + $0x648] sm:$0xff] }
  0x77   :  { %469 = vmatmul.mubr.f32.vlgmr.msra.gmra.mxu0 %v3423_v0  ;;  %579 = vmatprep.subr.mxu1 %v269_v1  ;;  %v144_v1 = vld [vmem:[#allocation8 + $0xa0] sm:$0xff] }
  0x78   :  { %2499 = vmatprep.subr.msk.mxu0 %vm394_vm0, %v350_v2  ;;  %580 = vmatpush2.msra.mxu1 %v268_v3  ;;  %v3497_v2 = vld [vmem:[#allocation4 + $0xf0] sm:$0xff]  ;;  %v323_v3 = vld [vmem:[#allocation8 + $0x638] sm:$0xff] }
  0x79   :  { %581 = vmatprep.mubr.f32.mxu1 %v3426_v4  ;;  %2500 = vmatpush1.msk.msra.mxu0 %vm394_vm0, %v349_v5  ;;  %v189_v5 = vld [vmem:[#allocation8 + $0x208] sm:$0xff] }
  0x7a   :  { %582 = vmatmul.mubr.f32.vlgmr.msra.gmra.mxu1 %v3429_v6  ;;  %474 = vmatprep.mubr.f32.mxu0 %v3431_v7 }
  0x7b   :  { %640 = vmatprep.subr.mxu0 %v347_v8  ;;  %475 = vmatmul.mubr.f32.gmra.mxu0 %v3434_v9  ;;  %v3500_v8 = vld [vmem:[#allocation4 + $0x108] sm:$0xff] }
  0x7c   :  { %641 = vmatpush1.msra.mxu0 %v346_v10  ;;  %2538 = vmatprep.subr.mxu1 %v219_v11  ;;  %v322_v10 = vld [vmem:[#allocation8 + $0x630] sm:$0xff]  ;;  %v141_v11 = vld [vmem:[#allocation8 + $0x88] sm:$0xff] }
  0x7d   :  { %587 = vmatprep.mubr.f32.mxu1 %v3440_v12  ;;  %2539 = vmatpush3.msra.mxu1 %v171_v13  ;;  %v3503_v13 = vld [vmem:[#allocation4 + $0x100] sm:$0xff] }
  0x7e   :  { %588 = vmatmul.mubr.f32.gmra.mxu1 %v3443_v14  ;;  %642 = vmatprep.subr.mxu0 %v344_v15  ;;  %v186_v15 = vld [vmem:[#allocation8 + $0x1f0] sm:$0xff] }
  0x7f   :  { %2540 = vmatprep.subr.mxu1 %v216_v16  ;;  %480 = vmatprep.mubr.f32.mxu0 %v3445_v17  ;;  %v3506_v16 = vld [vmem:[#allocation4 + $0x120] sm:$0xff] }
  0x80   :  { %643 = vmatpush1.msra.mxu0 %v343_v18  ;;  %2541 = vmatpush3.msra.mxu1 %v168_v19  ;;  %v320_v18 = vld [vmem:[#allocation8 + $0x620] sm:$0xff]  ;;  %v138_v19 = vld [vmem:[#allocation8 + $0x70] sm:$0xff] }
  0x81   :  { %481 = vmatmul.mubr.f32.gmra.mxu0 %v3449_v20  ;;  %644 = vmatprep.subr.mxu0 %v341_v21  ;;  %v3508_v21 = vld [vmem:[#allocation4 + $0x118] sm:$0xff] }
  0x82   :  { %2542 = vmatprep.subr.mxu1 %v213_v22  ;;  %593 = vmatprep.mubr.f32.mxu1 %v3452_v23  ;;  %v319_v22 = vld [vmem:[#allocation8 + $0x618] sm:$0xff] }
  0x83   :  { %645 = vmatpush1.msra.mxu0 %v340_v24  ;;  %2543 = vmatpush3.msra.mxu1 %v165_v25  ;;  %v183_v24 = vld [vmem:[#allocation8 + $0x1d8] sm:$0xff]  ;;  %v3512_v25 = vld [vmem:[#allocation4 + $0x130] sm:$0xff] }
  0x84   :  { %594 = vmatmul.mubr.f32.gmra.mxu1 %v3455_v26  ;;  %2544 = vmatprep.subr.mxu1 %v210_v27  ;;  %v135_v27 = vld [vmem:[#allocation8 + $0x58] sm:$0xff] }
  0x85   :  { %486 = vmatprep.mubr.f32.mxu0 %v3458_v28  ;;  %646 = vmatprep.subr.mxu0 %v338_v29  ;;  %v3515_v29 = vld [vmem:[#allocation4 + $0x128] sm:$0xff] }
  0x86   :  { %2545 = vmatpush3.msra.mxu1 %v162_v30  ;;  %487 = vmatmul.mubr.f32.gmra.mxu0 %v3460_v31  ;;  %v317_v30 = vld [vmem:[#allocation8 + $0x608] sm:$0xff] }
  0x87   :  { %647 = vmatpush1.msra.mxu0 %v337_v32  ;;  %2546 = vmatprep.subr.mxu1 %v207_v33  ;;  %v180_v32 = vld [vmem:[#allocation8 + $0x1c0] sm:$0xff] }
  0x88   :  { %599 = vmatprep.mubr.f32.mxu1 %v3464_v34  ;;  %2547 = vmatpush3.msra.mxu1 %v159_v35  ;;  %v316_v33 = vld [vmem:[#allocation8 + $0x600] sm:$0xff] }
  0x89   :  { %600 = vmatmul.mubr.f32.gmra.mxu1 %v3467_v36  ;;  %648 = vmatprep.subr.mxu0 %v335_v37  ;;  %v132_v35 = vld [vmem:[#allocation8 + $0x40] sm:$0xff]  ;;  %v3519_v37 = vld [vmem:[#allocation4 + $0x20] sm:$0xff] }
  0x8a   :  { %2548 = vmatprep.subr.mxu1 %v204_v38  ;;  %492 = vmatprep.mubr.f32.mxu0 %v3469_v39  ;;  %v177_v38 = vld [vmem:[#allocation8 + $0x1a8] sm:$0xff] }
  0x8b   :  { %649 = vmatpush1.msra.mxu0 %v334_v40  ;;  %2549 = vmatpush3.msra.mxu1 %v156_v41  ;;  %v315_v40 = vld [vmem:[#allocation8 + $0x5f8] sm:$0xff]  ;;  %v129_v41 = vld [vmem:[#allocation8 + $0x28] sm:$0xff] }
  0x8c   :  { %493 = vmatmul.mubr.f32.gmra.mxu0 %v3473_v42  ;;  %650 = vmatprep.subr.mxu0 %v332_v43  ;;  %v4524_v43 = vmov 0.0  }
  0x8d   :  { %2550 = vmatprep.subr.mxu1 %v201_v44  ;;  %605 = vmatprep.mubr.f32.mxu1 %v3476_v45  ;;  %v267_v44 = vld [vmem:[#allocation8 + $0x478] sm:$0xff] }
  0x8e   :  { %651 = vmatpush1.msra.mxu0 %v331_v46  ;;  %2551 = vmatpush3.msra.mxu1 %v153_v47  ;;  %v174_v46 = vld [vmem:[#allocation8 + $0x190] sm:$0xff]  ;;  %v312_v47 = vld [vmem:[#allocation8 + $0x5e0] sm:$0xff] }
  0x8f   :  { %606 = vmatmul.mubr.f32.gmra.mxu1 %v3479_v48  ;;  %2552 = vmatprep.subr.mxu1 %v198_v49  ;;  %v126_v49 = vld [vmem:[#allocation8 + $0x10] sm:$0xff] }
  0x90   :  { %498 = vmatprep.mubr.f32.mxu0 %v3482_v50  ;;  %652 = vmatprep.subr.mxu0 %v329_v51  ;;  %v264_v51 = vld [vmem:[#allocation8 + $0x460] sm:$0xff] }
  0x91   :  { %2553 = vmatpush3.msra.mxu1 %v150_v52  ;;  %499 = vmatmul.mubr.f32.gmra.mxu0 %v3484_v53  ;;  %v3525_v52 = vld [vmem:[#allocation4 + $0x48] sm:$0xff] }
  0x92   :  { %653 = vmatpush1.msra.mxu0 %v328_v54  ;;  %2554 = vmatprep.subr.mxu1 %v195_v55  ;;  %v309_v54 = vld [vmem:[#allocation8 + $0x5c8] sm:$0xff] }
  0x93   :  { %611 = vmatprep.mubr.f32.mxu1 %v3488_v56  ;;  %2555 = vmatpush3.msra.mxu1 %v147_v57  ;;  %v261_v55 = vld [vmem:[#allocation8 + $0x448] sm:$0xff]  ;;  %v306_v57 = vld [vmem:[#allocation8 + $0x5b0] sm:$0xff] }
  0x94   :  { %612 = vmatmul.mubr.f32.gmra.mxu1 %v3491_v58  ;;  %654 = vmatprep.subr.mxu0 %v326_v59  ;;  %v258_v59 = vld [vmem:[#allocation8 + $0x430] sm:$0xff] }
  0x95   :  { %2556 = vmatprep.subr.mxu1 %v192_v60  ;;  %504 = vmatprep.mubr.f32.mxu0 %v3493_v62  ;;  %v3532_v60 = vld [vmem:[#allocation4 + $0x70] sm:$0xff] }
  0x96   :  { %655 = vmatpush1.msra.mxu0 %v325_v63  ;;  %2557 = vmatpush3.msra.mxu1 %v144_v1  ;;  %v303_v63 = vld [vmem:[#allocation8 + $0x598] sm:$0xff]  ;;  %v252_v1 = vld [vmem:[#allocation8 + $0x400] sm:$0xff] }
  0x97   :  { %505 = vmatmul.mubr.f32.gmra.mxu0 %v3497_v2  ;;  %656 = vmatprep.subr.mxu0 %v323_v3  ;;  %v3539_v3 = vld [vmem:[#allocation4 + $0x98] sm:$0xff] }
  0x98   :  { %2558 = vmatprep.subr.mxu1 %v189_v5  ;;  %617 = vmatprep.mubr.f32.mxu1 %v3500_v8  ;;  %v297_v5 = vld [vmem:[#allocation8 + $0x568] sm:$0xff] }
  0x99   :  { %657 = vmatpush1.msra.mxu0 %v322_v10  ;;  %2559 = vmatpush3.msra.mxu1 %v141_v11  ;;  %v249_v10 = vld [vmem:[#allocation8 + $0x3e8] sm:$0xff]  ;;  %v348_v11 = vld [vmem:[#allocation8 + $0x700] sm:$0xff] }
  0x9a   :  { %618 = vmatmul.mubr.f32.gmra.mxu1 %v3503_v13  ;;  %2560 = vmatprep.subr.mxu1 %v186_v15  ;;  %v246_v15 = vld [vmem:[#allocation8 + $0x3d0] sm:$0xff] }
  0x9b   :  { %510 = vmatprep.mubr.f32.mxu0 %v3506_v16  ;;  %658 = vmatprep.subr.mxu0 %v320_v18  ;;  %v3547_v18 = vld [vmem:[#allocation4 + $0xc0] sm:$0xff] }
  0x9c   :  { %2561 = vmatpush3.msra.mxu1 %v138_v19  ;;  %511 = vmatmul.mubr.f32.gmra.mxu0 %v3508_v21  ;;  %v243_v19 = vld [vmem:[#allocation8 + $0x3b8] sm:$0xff] }
  0x9d   :  { %659 = vmatpush1.msra.mxu0 %v319_v22  ;;  %2562 = vmatprep.subr.mxu1 %v183_v24  ;;  %v288_v22 = vld [vmem:[#allocation8 + $0x520] sm:$0xff]  ;;  %v342_v24 = vld [vmem:[#allocation8 + $0x6d0] sm:$0xff] }
  0x9e   :  { %623 = vmatprep.mubr.f32.mxu1 %v3512_v25  ;;  %2563 = vmatpush3.msra.mxu1 %v135_v27  ;;  %v240_v27 = vld [vmem:[#allocation8 + $0x3a0] sm:$0xff] }
  0x9f   :  { %624 = vmatmul.mubr.f32.gmra.mxu1 %v3515_v29  ;;  %660 = vmatprep.subr.mxu0 %v317_v30  ;;  %v3554_v30 = vld [vmem:[#allocation4 + $0xe8] sm:$0xff] }
  0xa0   :  { %2564 = vmatprep.subr.mxu1 %v180_v32  ;;  %661 = vmatpush1.msra.mxu0 %v316_v33  ;;  %v339_v32 = vld [vmem:[#allocation8 + $0x6b8] sm:$0xff]  ;;  %v237_v33 = vld [vmem:[#allocation8 + $0x388] sm:$0xff] }
  0xa1   :  { %694 = vmatprep.mubr.f32.mxu0 %v4524_v43  ;;  %2565 = vmatpush3.msra.mxu1 %v132_v35  ;;  %v336_v35 = vld [vmem:[#allocation8 + $0x6a0] sm:$0xff] }
  0xa2   :  { %2501 = vmatmul.mubr.msk.f32.vlgmr.msra.gmra.mxu0 %vm369_vm1, %v3519_v37  ;;  %2566 = vmatprep.subr.mxu1 %v177_v38  ;;  %v234_v38 = vld [vmem:[#allocation8 + $0x370] sm:$0xff] }
  0xa3   :  { %2594 = vmatprep.subr.mxu0 %v315_v40  ;;  %2567 = vmatpush3.msra.mxu1 %v129_v41  ;;  %v3561_v40 = vld [vmem:[#allocation4 + $0x110] sm:$0xff] }
  0xa4   :  { %2595 = vmatpush3.msra.mxu0 %v267_v44  ;;  %2568 = vmatprep.subr.mxu1 %v174_v46  ;;  %v333_v41 = vld [vmem:[#allocation8 + $0x688] sm:$0xff]  ;;  %v231_v44 = vld [vmem:[#allocation8 + $0x358] sm:$0xff]  ;;  %v330_v46 = vld [vmem:[#allocation8 + $0x670] sm:$0xff] }
  0xa5   :  { %2596 = vmatprep.subr.mxu0 %v312_v47  ;;  %700 = vmatprep.mubr.f32.mxu0 %v4524_v43  ;;  %v228_v47 = vld [vmem:[#allocation8 + $0x340] sm:$0xff] }
  0xa6   :  { %2569 = vmatpush3.msra.mxu1 %v126_v49  ;;  %807 = vmatprep.mubr.f32.mxu1 %v3421_v61  ;;  %v255_v61 = vld [vmem:[#allocation8 + $0x418] sm:$0xff]  ;;  %v3568_v49 = vld [vmem:[#allocation4 + $0x138] sm:$0xff] }
  0xa7   :  { %2597 = vmatpush3.msra.mxu0 %v264_v51  ;;  %808 = vmatmul.mubr.f32.vlgmr.msra.gmra.mxu1 %v3423_v0  ;;  %v300_v0 = vld [vmem:[#allocation8 + $0x580] sm:$0xff]  ;;  %v327_v51 = vld [vmem:[#allocation8 + $0x658] sm:$0xff] }
  0xa8   :  { %2502 = vmatmul.mubr.msk.f32.gmra.mxu0 %vm369_vm1, %v3525_v52  ;;  %2598 = vmatprep.subr.mxu0 %v309_v54  ;;  %v225_v54 = vld [vmem:[#allocation8 + $0x328] sm:$0xff] }
  0xa9   :  { %2599 = vmatpush3.msra.mxu0 %v261_v55  ;;  %706 = vmatprep.mubr.f32.mxu0 %v4524_v43  ;;  %v324_v55 = vld [vmem:[#allocation8 + $0x640] sm:$0xff] }
  0xaa   :  { %2600 = vmatprep.subr.mxu0 %v306_v57  ;;  %812 = vmatprep.mubr.f32.mxu1 %v3431_v7  ;;  %v351_v7 = vld [vmem:[#allocation8 + $0x718] sm:$0x7]  ;;  %v222_v57 = vld [vmem:[#allocation8 + $0x310] sm:$0xff] }
  0xab   :  { %2601 = vmatpush3.msra.mxu0 %v258_v59  ;;  %813 = vmatmul.mubr.f32.gmra.mxu1 %v3434_v9  ;;  %v294_v9 = vld [vmem:[#allocation8 + $0x550] sm:$0xff] }
  0xac   :  { %2503 = vmatmul.mubr.msk.f32.gmra.mxu0 %vm369_vm1, %v3532_v60  ;;  %2602 = vmatprep.subr.mxu0 %v303_v63  ;;  %v3577_v59 = vld [vmem:[#allocation9 + $0x170] sm:$0xff] }
  0xad   :  { %2603 = vmatpush3.msra.mxu0 %v255_v61  ;;  %712 = vmatprep.mubr.f32.mxu0 %v4524_v43  ;;  %4583 = vst [vmem:[#allocation14_spill] sm:$0xff] %v3577_v59  ;;  %v318_v63 = vld [vmem:[#allocation8 + $0x610] sm:$0xff]  ;;  %v3583_v61 = vld [vmem:[#allocation9 + $0x158] sm:$0xff] }
  0xae   :  { %2604 = vmatprep.subr.mxu0 %v300_v0  ;;  %817 = vmatprep.mubr.f32.mxu1 %v3445_v17  ;;  %v291_v17 = vld [vmem:[#allocation8 + $0x538] sm:$0xff]  ;;  %v3611_v0 = vld [vmem:[#allocation9 + $0x108] sm:$0xff] }
  0xaf   :  { %2605 = vmatpush3.msra.mxu0 %v252_v1  ;;  %818 = vmatmul.mubr.f32.gmra.mxu1 %v3449_v20  ;;  %v345_v20 = vld [vmem:[#allocation8 + $0x6e8] sm:$0xff]  ;;  %v3644_v1 = vld [vmem:[#allocation9 + $0xb0] sm:$0xff] }
  0xb0   :  { %2504 = vmatmul.mubr.msk.f32.gmra.mxu0 %vm369_vm1, %v3539_v3  ;;  %2606 = vmatprep.subr.mxu0 %v297_v5  ;;  %v3660_v5 = vld [vmem:[#allocation9 + $0x178] sm:$0xff] }
  0xb1   :  { %2806 = vmatprep.subr.msk.mxu1 %vm394_vm0, %v351_v7  ;;  %2607 = vmatpush3.msra.mxu0 %v249_v10  ;;  %v3667_v10 = vld [vmem:[#allocation9 + $0x78] sm:$0xff] }
  0xb2   :  { %2807 = vmatpush3.msk.msra.mxu1 %vm394_vm0, %v351_v7  ;;  %2608 = vmatprep.subr.mxu0 %v294_v9  ;;  %v3664_v7 = vld [vmem:[#allocation9 + $0x80] sm:$0xff]  ;;  %4588 = vst [vmem:[#allocation19_spill] sm:$0xff] %v3667_v10 }
  0xb3   :  { %2808 = vmatprep.subr.mxu1 %v348_v11  ;;  %718 = vmatprep.mubr.f32.mxu0 %v4524_v43  ;;  %4587 = vst [vmem:[#allocation18_spill] sm:$0xff] %v3664_v7  ;;  %v3676_v9 = vld [vmem:[#allocation9 + $0x60] sm:$0xff] }
  0xb4   :  { %822 = vmatprep.mubr.f32.mxu1 %v3458_v28  ;;  %2609 = vmatpush3.msra.mxu0 %v246_v15  ;;  %v285_v28 = vld [vmem:[#allocation8 + $0x508] sm:$0xff]  ;;  %4590 = vst [vmem:[#allocation21_spill] sm:$0xff] %v3676_v9 }
  0xb5   :  { %2809 = vmatpush3.msra.mxu1 %v348_v11  ;;  %2505 = vmatmul.mubr.msk.f32.gmra.mxu0 %vm369_vm1, %v3547_v18  ;;  %v3682_v11 = vld [vmem:[#allocation9 + $0x50] sm:$0xff]  ;;  %v3685_v15 = vld [vmem:[#allocation9 + $0x48] sm:$0xff] }
  0xb6   :  { %823 = vmatmul.mubr.f32.gmra.mxu1 %v3460_v31  ;;  %2610 = vmatprep.subr.mxu0 %v291_v17  ;;  %v282_v31 = vld [vmem:[#allocation8 + $0x4f0] sm:$0xff]  ;;  %4591 = vst [vmem:[#allocation22_spill] sm:$0xff] %v3682_v11  ;;  %4592 = vst [vmem:[#allocation23_spill] sm:$0xff] %v3685_v15  ;;  %v3700_v17 = vld [vmem:[#allocation9 + $0x20] sm:$0xff] }
  0xb7   :  { %2810 = vmatprep.subr.mxu1 %v345_v20  ;;  %2611 = vmatpush3.msra.mxu0 %v243_v19  ;;  %4595 = vst [vmem:[#allocation26_spill] sm:$0xff] %v3700_v17  ;;  %v3712_v19 = vld [vmem:[#allocation9] sm:$0xff] }
  0xb8   :  { %2811 = vmatpush3.msra.mxu1 %v345_v20  ;;  %2612 = vmatprep.subr.mxu0 %v288_v22  ;;  %v3703_v20 = vld [vmem:[#allocation9 + $0x18] sm:$0xff]  ;;  %4598 = vst [vmem:[#allocation29_spill] sm:$0xff] %v3712_v19 }
  0xb9   :  { %2812 = vmatprep.subr.mxu1 %v342_v24  ;;  %724 = vmatprep.mubr.f32.mxu0 %v4524_v43  ;;  %4596 = vst [vmem:[#allocation27_spill] sm:$0xff] %v3703_v20  ;;  %v3718_v22 = vld [vmem:[#allocation6] sm:$0xff] }
  0xba   :  { %827 = vmatprep.mubr.f32.mxu1 %v3469_v39  ;;  %2613 = vmatpush3.msra.mxu0 %v240_v27  ;;  %v279_v39 = vld [vmem:[#allocation8 + $0x4d8] sm:$0xff]  ;;  %v3734_v27 = vld [vmem:[#allocation9 + $0xe8] sm:$0xff] }
  0xbb   :  { %2813 = vmatpush3.msra.mxu1 %v342_v24  ;;  %2506 = vmatmul.mubr.msk.f32.gmra.mxu0 %vm369_vm1, %v3554_v30  ;;  %v3722_v24 = vld [vmem:[#allocation9 + $0x118] sm:$0xff] }
  0xbc   :  { %828 = vmatmul.mubr.f32.gmra.mxu1 %v3473_v42  ;;  %2614 = vmatprep.subr.mxu0 %v285_v28  ;;  %v276_v42 = vld [vmem:[#allocation8 + $0x4c0] sm:$0xff]  ;;  %v3746_v28 = vld [vmem:[#allocation9 + $0xb8] sm:$0xff] }
  0xbd   :  { %2814 = vmatprep.subr.mxu1 %v339_v32  ;;  %2615 = vmatpush3.msra.mxu0 %v237_v33  ;;  %4599 = vst [vmem:[#allocation30_spill] sm:$0xff] %v3746_v28  ;;  %v3758_v33 = vld [vmem:[#allocation9 + $0x88] sm:$0xff] }
  0xbe   :  { %2815 = vmatpush3.msra.mxu1 %v339_v32  ;;  %2616 = vmatprep.subr.mxu0 %v282_v31  ;;  %v3752_v32 = vld [vmem:[#allocation9 + $0xa0] sm:$0xff]  ;;  %4601 = vst [vmem:[#allocation32_spill] sm:$0xff] %v3758_v33  ;;  %v3764_v31 = vld [vmem:[#allocation9 + $0x70] sm:$0xff] }
  0xbf   :  { %2816 = vmatprep.subr.mxu1 %v336_v35  ;;  %730 = vmatprep.mubr.f32.mxu0 %v4524_v43  ;;  %4600 = vst [vmem:[#allocation31_spill] sm:$0xff] %v3752_v32  ;;  %4602 = vst [vmem:[#allocation33_spill] sm:$0xff] %v3764_v31 }
  0xc0   :  { %832 = vmatprep.mubr.f32.mxu1 %v3482_v50  ;;  %2617 = vmatpush3.msra.mxu0 %v234_v38  ;;  %v273_v50 = vld [vmem:[#allocation8 + $0x4a8] sm:$0xff]  ;;  %v3776_v38 = vld [vmem:[#allocation9 + $0x40] sm:$0xff] }
  0xc1   :  { %2817 = vmatpush3.msra.mxu1 %v336_v35  ;;  %2507 = vmatmul.mubr.msk.f32.gmra.mxu0 %vm369_vm1, %v3561_v40  ;;  %v3770_v35 = vld [vmem:[#allocation9 + $0x58] sm:$0xff]  ;;  %4604 = vst [vmem:[#allocation35_spill] sm:$0xff] %v3776_v38 }
  0xc2   :  { %833 = vmatmul.mubr.f32.gmra.mxu1 %v3484_v53  ;;  %2618 = vmatprep.subr.mxu0 %v279_v39  ;;  %v270_v53 = vld [vmem:[#allocation8 + $0x490] sm:$0xff]  ;;  %4603 = vst [vmem:[#allocation34_spill] sm:$0xff] %v3770_v35 }
  0xc3   :  { %2818 = vmatprep.subr.mxu1 %v333_v41  ;;  %2619 = vmatpush3.msra.mxu0 %v231_v44  ;;  %v3788_v39 = vld [vmem:[#allocation9 + $0x10] sm:$0xff] }
  0xc4   :  { %2819 = vmatpush3.msra.mxu1 %v333_v41  ;;  %2620 = vmatprep.subr.mxu0 %v276_v42  ;;  %4606 = vst [vmem:[#allocation37_spill] sm:$0xff] %v3788_v39  ;;  %v354_v41 = vlaneseq }
  0xc5   :  { %2820 = vmatprep.subr.mxu1 %v330_v46  ;;  %736 = vmatprep.mubr.f32.mxu0 %v4524_v43 }
  0xc6   :  { %837 = vmatprep.mubr.f32.mxu1 %v3493_v62  ;;  %2621 = vmatpush3.msra.mxu0 %v228_v47  ;;  %v321_v62 = vld [vmem:[#allocation8 + $0x628] sm:$0xff]  ;;  %v3845_v44 = vshrl.u32 %v354_v41, 7 }
  0xc7   :  { %2821 = vmatpush3.msra.mxu1 %v330_v46  ;;  %2508 = vmatmul.mubr.msk.f32.gmra.mxu0 %vm369_vm1, %v3568_v49  ;;  %v3851_v46 = vld [vmem:[%s4519_s4] sm:$0x7] }
  0xc8   :  { %838 = vmatmul.mubr.f32.gmra.mxu1 %v3497_v2  ;;  %2622 = vmatprep.subr.mxu0 %v273_v50  ;;  %v3580_v2 = vld [vmem:[#allocation9 + $0x168] sm:$0xff]  ;;  %v360_v42 = vsub.s32 1, %v3845_v44  ;;  %v356_v47 = vsub.s32 0, %v3845_v44 }
  0xc9   :  { %2822 = vmatprep.subr.mxu1 %v327_v51  ;;  %2623 = vmatpush3.msra.mxu0 %v225_v54 }
  0xca   :  { %2823 = vmatpush3.msra.mxu1 %v327_v51  ;;  %2624 = vmatprep.subr.mxu0 %v270_v53  ;;  %v3858_v54 = vrot.slane %v3851_v46, %v356_v47 }
  0xcb   :  { %2824 = vmatprep.subr.mxu1 %v324_v55  ;;  %842 = vmatprep.mubr.f32.mxu1 %v3506_v16  ;;  %v3595_v16 = vld [vmem:[#allocation9 + $0x138] sm:$0xff] }
  0xcc   :  { %2625 = vmatpush3.msra.mxu0 %v222_v57  ;;  %912 = vmatprep.mubr.f32.mxu0 %v3426_v4  ;;  %v3587_v4 = vld [vmem:[#allocation9 + $0x150] sm:$0xff] }
  0xcd   :  { %2825 = vmatpush3.msra.mxu1 %v324_v55  ;;  %913 = vmatmul.mubr.f32.vlgmr.msra.gmra.mxu0 %v3429_v6  ;;  %v3591_v6 = vld [vmem:[#allocation9 + $0x140] sm:$0xff] }
  0xce   :  { %843 = vmatmul.mubr.f32.gmra.mxu1 %v3508_v21  ;;  %2826 = vmatprep.subr.mxu1 %v321_v62  ;;  %v3600_v21 = vld [vmem:[#allocation9 + $0x128] sm:$0xff] }
  0xcf   :  { %1141 = vmatprep.subr.mxu0 %v3577_v59  ;;  %2827 = vmatpush3.msra.mxu1 %v321_v62 }
  0xd0   :  { %1142 = vmatpush1.msra.mxu0 %v3580_v2  ;;  %2828 = vmatprep.subr.mxu1 %v318_v63 }
  0xd1   :  { %1143 = vmatprep.subr.mxu0 %v3583_v61  ;;  %917 = vmatprep.mubr.f32.mxu0 %v3440_v12  ;;  %v3604_v12 = vld [vmem:[#allocation9 + $0x120] sm:$0xff] }
  0xd2   :  { %2829 = vmatpush3.msra.mxu1 %v318_v63  ;;  %2830 = vmatprep.mubr.msk.f32.mxu1 %vm369_vm1, %v3519_v37  ;;  %v3608_v37 = vld [vmem:[#allocation9 + $0x110] sm:$0xff] }
  0xd3   :  { %1144 = vmatpush1.msra.mxu0 %v3587_v4  ;;  %2831 = vmatmul.mubr.msk.f32.vlgmr.msra.gmra.mxu1 %vm369_vm1, %v3525_v52  ;;  %v3626_v52 = vld [vmem:[#allocation9 + $0xe0] sm:$0xff] }
  0xd4   :  { %918 = vmatmul.mubr.f32.gmra.mxu0 %v3443_v14  ;;  %1145 = vmatprep.subr.mxu0 %v3591_v6  ;;  %v3616_v14 = vld [vmem:[#allocation9 + $0xf8] sm:$0xff] }
  0xd5   :  { %1146 = vmatpush1.msra.mxu0 %v3595_v16  ;;  %922 = vmatprep.mubr.f32.mxu0 %v3452_v23  ;;  %v3622_v23 = vld [vmem:[#allocation9 + $0xf0] sm:$0xff] }
  0xd6   :  { %1147 = vmatprep.subr.mxu0 %v3600_v21  ;;  %2833 = vmatprep.mubr.msk.f32.mxu1 %vm369_vm1, %v3532_v60  ;;  %v3629_v60 = vld [vmem:[#allocation9 + $0xd8] sm:$0xff] }
  0xd7   :  { %1148 = vmatpush1.msra.mxu0 %v3604_v12  ;;  %2834 = vmatmul.mubr.msk.f32.gmra.mxu1 %vm369_vm1, %v3539_v3  ;;  %v3647_v3 = vld [vmem:[#allocation9 + $0xa8] sm:$0xff] }
  0xd8   :  { %923 = vmatmul.mubr.f32.gmra.mxu0 %v3455_v26  ;;  %1149 = vmatprep.subr.mxu0 %v3608_v37  ;;  %v3634_v26 = vld [vmem:[#allocation9 + $0xc8] sm:$0xff]  ;;  %4584 = vst [vmem:[#allocation15_spill] sm:$0xff] %v3647_v3 }
  0xd9   :  { %1150 = vmatpush1.msra.mxu0 %v3611_v0  ;;  %927 = vmatprep.mubr.f32.mxu0 %v3464_v34  ;;  %v3640_v34 = vld [vmem:[#allocation9 + $0xc0] sm:$0xff] }
  0xda   :  { %1151 = vmatprep.subr.mxu0 %v3616_v14  ;;  %2836 = vmatprep.mubr.msk.f32.mxu1 %vm369_vm1, %v3547_v18  ;;  %v3694_v18 = vld [vmem:[#allocation9 + $0x30] sm:$0xff] }
  0xdb   :  { %1152 = vmatpush1.msra.mxu0 %v3622_v23  ;;  %2837 = vmatmul.mubr.msk.f32.gmra.mxu1 %vm369_vm1, %v3554_v30  ;;  %4594 = vst [vmem:[#allocation25_spill] sm:$0xff] %v3694_v18  ;;  %v3740_v30 = vld [vmem:[#allocation9 + $0xd0] sm:$0xff] }
  0xdc   :  { %928 = vmatmul.mubr.f32.gmra.mxu0 %v3467_v36  ;;  %1153 = vmatprep.subr.mxu0 %v3626_v52  ;;  %v3652_v36 = vld [vmem:[#allocation9 + $0x98] sm:$0xff] }
  0xdd   :  { %1154 = vmatpush1.msra.mxu0 %v3629_v60  ;;  %932 = vmatprep.mubr.f32.mxu0 %v3476_v45  ;;  %4585 = vst [vmem:[#allocation16_spill] sm:$0xff] %v3652_v36  ;;  %v3658_v45 = vld [vmem:[#allocation9 + $0x90] sm:$0xff] }
  0xde   :  { %1155 = vmatprep.subr.mxu0 %v3634_v26  ;;  %2839 = vmatprep.mubr.msk.f32.mxu1 %vm369_vm1, %v3561_v40  ;;  %4586 = vst [vmem:[#allocation17_spill] sm:$0xff] %v3658_v45  ;;  %v3782_v40 = vld [vmem:[#allocation9 + $0x28] sm:$0xff] }
  0xdf   :  { %1156 = vmatpush1.msra.mxu0 %v3640_v34  ;;  %2840 = vmatmul.mubr.msk.f32.gmra.mxu1 %vm369_vm1, %v3568_v49  ;;  %4605 = vst [vmem:[#allocation36_spill] sm:$0xff] %v3782_v40  ;;  %v361_v49 = vrot.slane %v3851_v46, %v360_v42 }
  0xe0   :  { %933 = vmatmul.mubr.f32.gmra.mxu0 %v3479_v48  ;;  %1157 = vmatprep.subr.mxu0 %v3644_v1  ;;  %v3671_v48 = vld [vmem:[#allocation9 + $0x68] sm:$0xff] }
  0xe1   :  { %1158 = vmatpush1.msra.mxu0 %v3647_v3  ;;  %937 = vmatprep.mubr.f32.mxu0 %v3488_v56  ;;  %4589 = vst [vmem:[#allocation20_spill] sm:$0xff] %v3671_v48  ;;  %v3678_v56 = vld [vmem:[#allocation9 + $0x160] sm:$0xff] }
  0xe2   :  { %1159 = vmatprep.subr.mxu0 %v3652_v36  ;;  %2842 = vmatprep.subr.mxu1 %v4524_v43 }
  0xe3   :  { %1160 = vmatpush1.msra.mxu0 %v3658_v45  ;;  %2843 = vmatpush3.msra.mxu1 %v3660_v5 }
  0xe4   :  { %938 = vmatmul.mubr.f32.gmra.mxu0 %v3491_v58  ;;  %1161 = vmatprep.subr.mxu0 %v3664_v7  ;;  %v3689_v58 = vld [vmem:[#allocation9 + $0x38] sm:$0xff] }
  0xe5   :  { %1162 = vmatpush1.msra.mxu0 %v3667_v10  ;;  %942 = vmatprep.mubr.f32.mxu0 %v3500_v8  ;;  %4593 = vst [vmem:[#allocation24_spill] sm:$0xff] %v3689_v58  ;;  %v3696_v8 = vld [vmem:[#allocation9 + $0x148] sm:$0xff] }
  0xe6   :  { %1163 = vmatprep.subr.mxu0 %v3671_v48  ;;  %2844 = vmatprep.subr.mxu1 %v4524_v43 }
  0xe7   :  { %1164 = vmatpush1.msra.mxu0 %v3676_v9  ;;  %2845 = vmatpush3.msra.mxu1 %v3678_v56 }
  0xe8   :  { %943 = vmatmul.mubr.f32.gmra.mxu0 %v3503_v13  ;;  %1165 = vmatprep.subr.mxu0 %v3682_v11  ;;  %v3707_v13 = vld [vmem:[#allocation9 + $0x8] sm:$0xff] }
  0xe9   :  { %1166 = vmatpush1.msra.mxu0 %v3685_v15  ;;  %947 = vmatprep.mubr.f32.mxu0 %v3512_v25  ;;  %4597 = vst [vmem:[#allocation28_spill] sm:$0xff] %v3707_v13  ;;  %v3714_v25 = vld [vmem:[#allocation9 + $0x130] sm:$0xff] }
  0xea   :  { %1167 = vmatprep.subr.mxu0 %v3689_v58  ;;  %2846 = vmatprep.subr.mxu1 %v4524_v43 }
  0xeb   :  { %1168 = vmatpush1.msra.mxu0 %v3694_v18  ;;  %2847 = vmatpush3.msra.mxu1 %v3696_v8 }
  0xec   :  { %948 = vmatmul.mubr.f32.gmra.mxu0 %v3515_v29  ;;  %1169 = vmatprep.subr.mxu0 %v3700_v17  ;;  %v3728_v29 = vld [vmem:[#allocation9 + $0x100] sm:$0xff] }
  0xed   :  { %1170 = vmatpush1.msra.mxu0 %v3703_v20  ;;  %1205 = vmatprep.mubr.f32.mxu0 %v4524_v43 }
  0xee   :  { %1171 = vmatprep.subr.mxu0 %v3707_v13  ;;  %2848 = vmatprep.subr.mxu1 %v4524_v43 }
  0xef   :  { %1172 = vmatpush1.msra.mxu0 %v3712_v19  ;;  %2849 = vmatpush3.msra.mxu1 %v3714_v25 }
  0xf0   :  { %1206 = vmatmul.mubr.f32.vlgmr.msra.gmra.mxu0 %v3718_v22  ;;  %2850 = vmatprep.subr.mxu1 %v4524_v43 }
  0xf1   :  { %2851 = vmatpush3.msra.mxu1 %v3722_v24  ;;  %2874 = vmatprep.mubr.msk.f32.mxu1 %vm3360_vm2, %v4524_v43 }
  0xf2   :  { %2852 = vmatprep.subr.mxu1 %v4524_v43  ;;  %1307 = vmatprep.subr.mxu0 %v3577_v59 }
  0xf3   :  { %2853 = vmatpush3.msra.mxu1 %v3728_v29  ;;  %1308 = vmatpush1.msra.mxu0 %v3580_v2 }
  0xf4   :  { %2854 = vmatprep.subr.mxu1 %v4524_v43  ;;  %1309 = vmatprep.subr.mxu0 %v3583_v61 }
  0xf5   :  { %2855 = vmatpush3.msra.mxu1 %v3734_v27  ;;  %1310 = vmatpush1.msra.mxu0 %v3587_v4 }
  0xf6   :  { %2856 = vmatprep.subr.mxu1 %v4524_v43  ;;  %1311 = vmatprep.subr.mxu0 %v3591_v6 }
  0xf7   :  { %2857 = vmatpush3.msra.mxu1 %v3740_v30  ;;  %1312 = vmatpush1.msra.mxu0 %v3595_v16 }
  0xf8   :  { %2858 = vmatprep.subr.mxu1 %v4524_v43  ;;  %1313 = vmatprep.subr.mxu0 %v3600_v21 }
  0xf9   :  { %2859 = vmatpush3.msra.mxu1 %v3746_v28  ;;  %1314 = vmatpush1.msra.mxu0 %v3604_v12 }
  0xfa   :  { %2860 = vmatprep.subr.mxu1 %v4524_v43  ;;  %1315 = vmatprep.subr.mxu0 %v3608_v37 }
  0xfb   :  { %2861 = vmatpush3.msra.mxu1 %v3752_v32  ;;  %1316 = vmatpush1.msra.mxu0 %v3611_v0 }
  0xfc   :  { %2862 = vmatprep.subr.mxu1 %v4524_v43  ;;  %1317 = vmatprep.subr.mxu0 %v3616_v14 }
  0xfd   :  { %2863 = vmatpush3.msra.mxu1 %v3758_v33  ;;  %1318 = vmatpush1.msra.mxu0 %v3622_v23 }
  0xfe   :  { %2864 = vmatprep.subr.mxu1 %v4524_v43  ;;  %1319 = vmatprep.subr.mxu0 %v3626_v52 }
  0xff   :  { %2865 = vmatpush3.msra.mxu1 %v3764_v31  ;;  %1320 = vmatpush1.msra.mxu0 %v3629_v60 }
 0x100   :  { %2866 = vmatprep.subr.mxu1 %v4524_v43  ;;  %1321 = vmatprep.subr.mxu0 %v3634_v26 }
 0x101   :  { %2867 = vmatpush3.msra.mxu1 %v3770_v35  ;;  %1322 = vmatpush1.msra.mxu0 %v3640_v34 }
 0x102   :  { %2868 = vmatprep.subr.mxu1 %v4524_v43  ;;  %1323 = vmatprep.subr.mxu0 %v3644_v1 }
 0x103   :  { %2869 = vmatpush3.msra.mxu1 %v3776_v38  ;;  %1324 = vmatpush1.msra.mxu0 %v3647_v3 }
 0x104   :  { %2870 = vmatprep.subr.mxu1 %v4524_v43  ;;  %1325 = vmatprep.subr.mxu0 %v3652_v36 }
 0x105   :  { %2871 = vmatpush3.msra.mxu1 %v3782_v40  ;;  %1326 = vmatpush1.msra.mxu0 %v3658_v45 }
 0x106   :  { %2872 = vmatprep.subr.mxu1 %v4524_v43  ;;  %1327 = vmatprep.subr.mxu0 %v3664_v7 }
 0x107   :  { %2873 = vmatpush3.msra.mxu1 %v3788_v39  ;;  %1328 = vmatpush1.msra.mxu0 %v3667_v10 }
 0x108   :  { %2875 = vmatmul.mubr.f32.vlgmr.msra.gmra.mxu1 %v3718_v22  ;;  %2877 = vmatprep.subr.mxu1 %v4524_v43 }
 0x109   :  { %2878 = vmatpush3.msra.mxu1 %v3660_v5  ;;  %1329 = vmatprep.subr.mxu0 %v3671_v48 }
 0x10a   :  { %2879 = vmatprep.subr.mxu1 %v4524_v43  ;;  %1330 = vmatpush1.msra.mxu0 %v3676_v9 }
 0x10b   :  { %2880 = vmatpush3.msra.mxu1 %v3678_v56  ;;  %1331 = vmatprep.subr.mxu0 %v3682_v11 }
 0x10c   :  { %2881 = vmatprep.subr.mxu1 %v4524_v43  ;;  %1332 = vmatpush1.msra.mxu0 %v3685_v15 }
 0x10d   :  { %2882 = vmatpush3.msra.mxu1 %v3696_v8  ;;  %1333 = vmatprep.subr.mxu0 %v3689_v58 }
 0x10e   :  { %2883 = vmatprep.subr.mxu1 %v4524_v43  ;;  %1334 = vmatpush1.msra.mxu0 %v3694_v18 }
 0x10f   :  { %2884 = vmatpush3.msra.mxu1 %v3714_v25  ;;  %1335 = vmatprep.subr.mxu0 %v3700_v17 }
 0x110   :  { %2885 = vmatprep.subr.mxu1 %v4524_v43  ;;  %1336 = vmatpush1.msra.mxu0 %v3703_v20 }
 0x111   :  { %2886 = vmatpush3.msra.mxu1 %v3722_v24  ;;  %1337 = vmatprep.subr.mxu0 %v3707_v13 }
 0x112   :  { %2887 = vmatprep.subr.mxu1 %v4524_v43  ;;  %1338 = vmatpush1.msra.mxu0 %v3712_v19 }
 0x113   :  { %2888 = vmatpush3.msra.mxu1 %v3728_v29  ;;  %1371 = vmatprep.mubr.f32.mxu0 %v4524_v43 }
 0x114   :  { %2889 = vmatprep.subr.mxu1 %v4524_v43  ;;  %2909 = vmatprep.mubr.msk.f32.mxu1 %vm3360_vm2, %v4524_v43 }
 0x115   :  { %2890 = vmatpush3.msra.mxu1 %v3734_v27  ;;  %1473 = vmatprep.subr.mxu0 %v3577_v59 }
 0x116   :  { %2891 = vmatprep.subr.mxu1 %v4524_v43 }
 0x117   :  { %2892 = vmatpush3.msra.mxu1 %v3740_v30 }
 0x118   :  { %2893 = vmatprep.subr.mxu1 %v4524_v43 }
 0x119   :  { %2894 = vmatpush3.msra.mxu1 %v3746_v28 }
 0x11a   :  { %2895 = vmatprep.subr.mxu1 %v4524_v43 }
 0x11b   :  { %2896 = vmatpush3.msra.mxu1 %v3752_v32 }
 0x11c   :  { %2897 = vmatprep.subr.mxu1 %v4524_v43 }
 0x11d   :  { %2898 = vmatpush3.msra.mxu1 %v3758_v33 }
 0x11e   :  { %2899 = vmatprep.subr.mxu1 %v4524_v43 }
 0x11f   :  { %2900 = vmatpush3.msra.mxu1 %v3764_v31 }
 0x120   :  { %2901 = vmatprep.subr.mxu1 %v4524_v43 }
 0x121   :  { %2902 = vmatpush3.msra.mxu1 %v3770_v35 }
 0x122   :  { %2903 = vmatprep.subr.mxu1 %v4524_v43 }
 0x123   :  { %2904 = vmatpush3.msra.mxu1 %v3776_v38 }
 0x124   :  { %2905 = vmatprep.subr.mxu1 %v4524_v43 }
 0x125   :  { %2906 = vmatpush3.msra.mxu1 %v3782_v40 }
 0x126   :  { %2907 = vmatprep.subr.mxu1 %v4524_v43 }
 0x127   :  { %2908 = vmatpush3.msra.mxu1 %v3788_v39 }
 0x128   :  { %2912 = vmatprep.subr.mxu1 %v4524_v43 }
 0x137   :  { %v3855_v50 = vpop.f32.mrf.mxu0 }
 0x139   :  { %v472_v51 = vpop.f32.mrf.mxu0 }
 0x13a   :  { %v473_v53 = vadd.f32 %v472_v51, %v361_v49  ;;  %v3860_v55 = vpop.f32.mrf.mxu1 }
 0x13b   :  { %v476_v57 = vpop.f32.mrf.mxu0 }
 0x13c   :  { %v477_v62 = vadd.f32 %v476_v57, %v3858_v54  ;;  %v585_v63 = vpop.f32.mrf.mxu1 }
 0x13d   :  { %v586_v41 = vadd.f32 %v585_v63, %v473_v53  ;;  %v478_v43 = vpop.f32.mrf.mxu0 }
 0x13e   :  { %v479_v59 = vadd.f32 %v478_v43, %v361_v49  ;;  %v589_v39 = vpop.f32.mrf.mxu1 }
 0x13f   :  { %v590_v19 = vadd.f32 %v589_v39, %v477_v62 }
 0x140   :  { %v591_v13 = vpop.f32.mrf.mxu1 }
 0x141   :  { %v482_v42 = vpop.f32.mrf.mxu0  ;;  %v592_v40 = vadd.f32 %v591_v13, %v479_v59 }
 0x142   :  { %v483_v20 = vadd.f32 %v482_v42, %v3858_v54 }
 0x143   :  { %v484_v17 = vpop.f32.mrf.mxu0 }
 0x144   :  { %v485_v47 = vadd.f32 %v484_v17, %v361_v49  ;;  %v595_v38 = vpop.f32.mrf.mxu1 }
 0x145   :  { %v596_v51 = vadd.f32 %v595_v38, %v483_v20 }
 0x146   :  { %v488_v18 = vpop.f32.mrf.mxu0  ;;  %v597_v58 = vpop.f32.mrf.mxu1 }
 0x147   :  { %v489_v35 = vadd.f32 %v488_v18, %v3858_v54  ;;  %v598_v57 = vadd.f32 %v597_v58, %v485_v47 }
 0x148   :  { %v490_v15 = vpop.f32.mrf.mxu0 }
 0x149   :  { %v491_v53 = vadd.f32 %v490_v15, %v361_v49  ;;  %v601_v63 = vpop.f32.mrf.mxu1 }
 0x14a   :  { %v602_v43 = vadd.f32 %v601_v63, %v489_v35 }
 0x14b   :  { %v603_v11 = vpop.f32.mrf.mxu1 }
 0x14c   :  { %v494_v39 = vpop.f32.mrf.mxu0  ;;  %v604_v62 = vadd.f32 %v603_v11, %v491_v53 }
 0x14d   :  { %v495_v59 = vadd.f32 %v494_v39, %v3858_v54 }
 0x14e   :  { %v496_v13 = vpop.f32.mrf.mxu0 }
 0x14f   :  { %v497_v42 = vadd.f32 %v496_v13, %v361_v49  ;;  %v607_v31 = vpop.f32.mrf.mxu1 }
 0x150   :  { %v608_v17 = vadd.f32 %v607_v31, %v495_v59 }
 0x151   :  { %v500_v9 = vpop.f32.mrf.mxu0  ;;  %v609_v20 = vpop.f32.mrf.mxu1 }
 0x152   :  { %v501_v38 = vadd.f32 %v500_v9, %v3858_v54  ;;  %v610_v48 = vadd.f32 %v609_v20, %v497_v42 }
 0x153   :  { %v502_v18 = vpop.f32.mrf.mxu0 }
 0x154   :  { %v503_v58 = vadd.f32 %v502_v18, %v361_v49  ;;  %v613_v47 = vpop.f32.mrf.mxu1 }
 0x155   :  { %v614_v15 = vadd.f32 %v613_v47, %v501_v38 }
 0x156   :  { %v615_v33 = vpop.f32.mrf.mxu1 }
 0x157   :  { %v506_v35 = vpop.f32.mrf.mxu0  ;;  %v616_v63 = vadd.f32 %v615_v33, %v503_v58 }
 0x158   :  { %v507_v11 = vadd.f32 %v506_v35, %v3858_v54 }
 0x159   :  { %v508_v53 = vpop.f32.mrf.mxu0 }
 0x15a   :  { %v509_v39 = vadd.f32 %v508_v53, %v361_v49  ;;  %v619_v10 = vpop.f32.mrf.mxu1 }
 0x15b   :  { %v620_v13 = vadd.f32 %v619_v10, %v507_v11 }
 0x15c   :  { %v512_v7 = vpop.f32.mrf.mxu0  ;;  %v621_v31 = vpop.f32.mrf.mxu1 }
 0x15d   :  { %v513_v59 = vadd.f32 %v512_v7, %v3858_v54  ;;  %v622_v32 = vadd.f32 %v621_v31, %v509_v39  ;;  %v364_v39 = vsub.s32 2, %v3845_v44 }
 0x15e   :  { %v514_v9 = vpop.f32.mrf.mxu0 }
 0x15f   :  { %v515_v42 = vadd.f32 %v514_v9, %v361_v49  ;;  %v625_v20 = vpop.f32.mrf.mxu1 }
 0x160   :  { %v626_v18 = vadd.f32 %v625_v20, %v513_v59 }
 0x161   :  { %v627_v45 = vpop.f32.mrf.mxu1 }
 0x162   :  { %v628_v38 = vadd.f32 %v627_v45, %v515_v42  ;;  %v3869_v47 = vpop.f32.mrf.mxu0 }
 0x164   :  { %v698_v33 = vpop.f32.mrf.mxu0 }
 0x165   :  { %v3871_v58 = vadd.f32 %v698_v33, %v586_v41  ;;  %v3885_v41 = vrot.slane %v3851_v46, %v364_v39 }
 0x167   :  { %v3873_v35 = vpop.f32.mrf.mxu1 }
 0x168   :  { %v702_v53 = vpop.f32.mrf.mxu0 }
 0x169   :  { %v3875_v10 = vadd.f32 %v702_v53, %v590_v19  ;;  %v3877_v11 = vpop.f32.mrf.mxu1 }
 0x16a   :  { %v704_v7 = vpop.f32.mrf.mxu0 }
 0x16b   :  { %4607 = vst [vmem:[#allocation38_spill] sm:$0xff] %v3875_v10  ;;  %v3880_v49 = vadd.f32 %v704_v7, %v592_v40  ;;  %v2573_v31 = vpop.f32.mrf.mxu1 }
 0x16c   :  { %v708_v59 = vpop.f32.mrf.mxu0 }
 0x16d   :  { %4608 = vst [vmem:[#allocation39_spill] sm:$0xff] %v3880_v49  ;;  %v3882_v45 = vadd.f32 %v708_v59, %v596_v51  ;;  %v2574_v9 = vpop.f32.mrf.mxu1 }
 0x16e   :  { %v710_v42 = vpop.f32.mrf.mxu0  ;;  %v2575_v20 = vadd.f32 %v2574_v9, %v2573_v31 }
 0x16f   :  { %4609 = vst [vmem:[#allocation40_spill] sm:$0xff] %v3882_v45  ;;  %v3887_v33 = vadd.f32 %v710_v42, %v598_v57  ;;  %v2576_v19 = vpop.f32.mrf.mxu1 }
 0x170   :  { %v815_v53 = vadd.f32 %v2575_v20, %v3885_v41  ;;  %v714_v10 = vpop.f32.mrf.mxu0 }
 0x171   :  { %4610 = vst [vmem:[#allocation41_spill] sm:$0xff] %v3887_v33  ;;  %v3890_v36 = vadd.f32 %v714_v10, %v602_v43  ;;  %v2577_v40 = vpop.f32.mrf.mxu1 }
 0x172   :  { %v716_v44 = vpop.f32.mrf.mxu0  ;;  %v2578_v7 = vadd.f32 %v2577_v40, %v2576_v19 }
 0x173   :  { %4611 = vst [vmem:[#allocation42_spill] sm:$0xff] %v3890_v36  ;;  %v3892_v49 = vadd.f32 %v716_v44, %v604_v62 }
 0x174   :  { %v820_v51 = vadd.f32 %v2578_v7, %v3885_v41 }
 0x175   :  { %4612 = vst [vmem:[#allocation43_spill] sm:$0xff] %v3892_v49  ;;  %v720_v59 = vpop.f32.mrf.mxu0 }
 0x176   :  { %v3895_v46 = vadd.f32 %v720_v59, %v608_v17  ;;  %v2579_v39 = vpop.f32.mrf.mxu1 }
 0x177   :  { %v722_v31 = vpop.f32.mrf.mxu0 }
 0x178   :  { %4613 = vst [vmem:[#allocation44_spill] sm:$0xff] %v3895_v46  ;;  %v3897_v57 = vadd.f32 %v722_v31, %v610_v48  ;;  %v2580_v9 = vpop.f32.mrf.mxu1 }
 0x179   :  { %v2581_v42 = vadd.f32 %v2580_v9, %v2579_v39 }
 0x17a   :  { %4614 = vst [vmem:[#allocation45_spill] sm:$0xff] %v3897_v57 }
 0x17b   :  { %v825_v20 = vadd.f32 %v2581_v42, %v3885_v41  ;;  %v726_v43 = vpop.f32.mrf.mxu0 }
 0x17c   :  { %v3900_v10 = vadd.f32 %v726_v43, %v614_v15  ;;  %v2582_v36 = vpop.f32.mrf.mxu1 }
 0x17d   :  { %v728_v19 = vpop.f32.mrf.mxu0 }
 0x17e   :  { %4615 = vst [vmem:[#allocation46_spill] sm:$0xff] %v3900_v10  ;;  %v3902_v62 = vadd.f32 %v728_v19, %v616_v63  ;;  %v2583_v40 = vpop.f32.mrf.mxu1 }
 0x17f   :  { %v2584_v44 = vadd.f32 %v2583_v40, %v2582_v36 }
 0x180   :  { %4616 = vst [vmem:[#allocation47_spill] sm:$0xff] %v3902_v62 }
 0x181   :  { %v830_v17 = vadd.f32 %v2584_v44, %v3885_v41  ;;  %v732_v7 = vpop.f32.mrf.mxu0 }
 0x182   :  { %v3905_v59 = vadd.f32 %v732_v7, %v620_v13  ;;  %v2585_v48 = vpop.f32.mrf.mxu1 }
 0x183   :  { %v734_v31 = vpop.f32.mrf.mxu0 }
 0x184   :  { %4617 = vst [vmem:[#allocation48_spill] sm:$0xff] %v3905_v59  ;;  %v3907_v57 = vadd.f32 %v734_v31, %v622_v32  ;;  %v2586_v39 = vpop.f32.mrf.mxu1 }
 0x185   :  { %v2587_v9 = vadd.f32 %v2586_v39, %v2585_v48 }
 0x186   :  { %4618 = vst [vmem:[#allocation49_spill] sm:$0xff] %v3907_v57 }
 0x187   :  { %v835_v15 = vadd.f32 %v2587_v9, %v3885_v41  ;;  %v738_v42 = vpop.f32.mrf.mxu0 }
 0x188   :  { %v3910_v43 = vadd.f32 %v738_v42, %v626_v18  ;;  %v2588_v63 = vpop.f32.mrf.mxu1 }
 0x189   :  { %v740_v19 = vpop.f32.mrf.mxu0 }
 0x18a   :  { %4619 = vst [vmem:[#allocation50_spill] sm:$0xff] %v3910_v43  ;;  %v3912_v62 = vadd.f32 %v740_v19, %v628_v38  ;;  %v2589_v36 = vpop.f32.mrf.mxu1 }
 0x18b   :  { %v2590_v40 = vadd.f32 %v2589_v36, %v2588_v63 }
 0x18c   :  { %4620 = vst [vmem:[#allocation51_spill] sm:$0xff] %v3912_v62 }
 0x18d   :  { %v840_v13 = vadd.f32 %v2590_v40, %v3885_v41  ;;  %v3915_v44 = vpop.f32.mrf.mxu0 }
 0x18e   :  { %v2591_v7 = vpop.f32.mrf.mxu1 }
 0x18f   :  { %v3917_v31 = vpop.f32.mrf.mxu0 }
 0x190   :  { %v2592_v32 = vpop.f32.mrf.mxu1 }
 0x191   :  { %v2593_v48 = vadd.f32 %v2592_v32, %v2591_v7 }
 0x193   :  { %v845_v39 = vadd.f32 %v2593_v48, %v3885_v41  ;;  %v2832_v9 = vpop.f32.mrf.mxu1 }
 0x194   :  { %v2629_v18 = vpop.f32.mrf.mxu0 }
 0x195   :  { %v3920_v43 = vpop.f32.mrf.mxu1 }
 0x196   :  { %v2630_v42 = vpop.f32.mrf.mxu0 }
 0x197   :  { %v2631_v38 = vadd.f32 %v2630_v42, %v2629_v18  ;;  %v2835_v62 = vpop.f32.mrf.mxu1 }
 0x198   :  { %v2632_v19 = vpop.f32.mrf.mxu0 }
 0x199   :  { %v920_v63 = vadd.f32 %v2631_v38, %v815_v53  ;;  %v1029_v10 = vpop.f32.mrf.mxu1 }
 0x19a   :  { %v2633_v36 = vpop.f32.mrf.mxu0 }
 0x19b   :  { %v3922_v40 = vadd.f32 %v2832_v9, %v920_v63  ;;  %v2634_v57 = vadd.f32 %v2633_v36, %v2632_v19  ;;  %v2838_v33 = vpop.f32.mrf.mxu1 }
 0x19c   :  { %v2635_v59 = vpop.f32.mrf.mxu0 }
 0x19d   :  { %v925_v46 = vadd.f32 %v2634_v57, %v820_v51  ;;  %v1039_v53 = vpop.f32.mrf.mxu1 }
 0x19e   :  { %v2636_v49 = vpop.f32.mrf.mxu0 }
 0x19f   :  { %v2637_v7 = vadd.f32 %v2636_v49, %v2635_v59  ;;  %v3924_v32 = vadd.f32 %v1029_v10, %v925_v46  ;;  %v2841_v51 = vpop.f32.mrf.mxu1  ;;  %v471_v49 = vadd.f32 %v3855_v50, %v3858_v54 }
 0x1a0   :  { %v2638_v48 = vpop.f32.mrf.mxu0 }
 0x1a1   :  { %v930_v45 = vadd.f32 %v2637_v7, %v825_v20 }
 0x1a2   :  { %v2639_v28 = vpop.f32.mrf.mxu0 }
 0x1a3   :  { %v3926_v3 = vadd.f32 %v2835_v62, %v930_v45  ;;  %v2640_v18 = vadd.f32 %v2639_v28, %v2638_v48  ;;  %v1049_v62 = vpop.f32.mrf.mxu1  ;;  %v584_v28 = vadd.f32 %v3860_v55, %v471_v49 }
 0x1a4   :  { %v2641_v42 = vpop.f32.mrf.mxu0 }
 0x1a5   :  { %v935_v38 = vadd.f32 %v2640_v18, %v830_v17  ;;  %v697_v7 = vadd.f32 %v3869_v47, %v584_v28  ;;  %v2572_v47 = vadd.f32 %v3877_v11, %v3873_v35 }
 0x1a6   :  { %v2642_v9 = vpop.f32.mrf.mxu0 }
 0x1a7   :  { %v2643_v63 = vadd.f32 %v2642_v9, %v2641_v42  ;;  %v3928_v19 = vadd.f32 %v1039_v53, %v935_v38 }
 0x1a8   :  { %v2644_v36 = vpop.f32.mrf.mxu0 }
 0x1a9   :  { %4621 = vst [vmem:[#allocation52_spill] sm:$0xff] %v3928_v19  ;;  %v940_v46 = vadd.f32 %v2643_v63, %v835_v15 }
 0x1aa   :  { %v2645_v57 = vpop.f32.mrf.mxu0 }
 0x1ab   :  { %v3932_v10 = vadd.f32 %v2838_v33, %v940_v46  ;;  %v2646_v20 = vadd.f32 %v2645_v57, %v2644_v36 }
 0x1ac   :  { %v2647_v45 = vpop.f32.mrf.mxu0 }
 0x1ad   :  { %4622 = vst [vmem:[#allocation53_spill] sm:$0xff] %v3932_v10  ;;  %v945_v59 = vadd.f32 %v2646_v20, %v840_v13 }
 0x1ae   :  { %v2648_v17 = vpop.f32.mrf.mxu0 }
 0x1af   :  { %v2649_v48 = vadd.f32 %v2648_v17, %v2647_v45  ;;  %v3936_v18 = vadd.f32 %v1049_v62, %v945_v59 }
 0x1b0   :  { %v1207_v42 = vpop.f32.mrf.mxu0 }
 0x1b1   :  { %4623 = vst [vmem:[#allocation54_spill] sm:$0xff] %v3936_v18  ;;  %v950_v53 = vadd.f32 %v2649_v48, %v845_v39  ;;  %v1282_v38 = vadd.f32 %v1207_v42, %v697_v7  ;;  %v810_v39 = vadd.f32 %v2572_v47, %v3885_v41  ;;  %v4637_v7 = vld [vmem:[#allocation22_spill] sm:$0xff]  ;;  %v4638_v48 = vld [vmem:[#allocation23_spill] sm:$0xff]  ;;  %v4648_v47 = vld [vmem:[#allocation37_spill] sm:$0xff] }
 0x1b2   :  { %v1209_v33 = vpop.f32.mrf.mxu0  ;;  %v4639_v42 = vld [vmem:[#allocation34_spill] sm:$0xff] }
 0x1b3   :  { %v3938_v50 = vadd.f32 %v2841_v51, %v950_v53  ;;  %v2519_v54 = vmul.f32 -1.442695, %v1282_v38  ;;  %v1289_v15 = vadd.f32 %v1209_v33, %v3871_v58  ;;  %v2628_v51 = vadd.f32 %v3917_v31, %v3915_v44  ;;  %v3949_v58 = vld [vmem:[%s4520_s5] ss:$0 sm:$0xff]  ;;  %v4641_v38 = vld [vmem:[#allocation25_spill] sm:$0xff]  ;;  %v4643_v33 = vld [vmem:[#allocation26_spill] sm:$0xff] }
 0x1b4   :  { %v4640_v53 = vld [vmem:[#allocation24_spill] sm:$0xff] }
 0x1b5   :  { %4624 = vst [vmem:[#allocation55_spill] sm:$0xff] %v3938_v50  ;;  %3132 = vpow2.f32 %v2519_v54  ;;  %v2520_v9 = vmul.f32 -1.442695, %v1289_v15  ;;  %v915_v46 = vadd.f32 %v2628_v51, %v810_v39  ;;  %v4642_v54 = vld [vmem:[#allocation35_spill] sm:$0xff]  ;;  %v4650_v51 = vld [vmem:[#allocation38_spill] sm:$0xff] }
 0x1b6   :  { %v4644_v15 = vld [vmem:[#allocation27_spill] sm:$0xff] }
 0x1b7   :  { %3134 = vpow2.f32 %v2520_v9  ;;  %v1020_v35 = vadd.f32 %v3920_v43, %v915_v46  ;;  %v4625_v43 = vmov 0.0   ;;  %v4645_v9 = vld [vmem:[#allocation36_spill] sm:$0xff] }
 0x1c2   :  { %v3133_v55 = vpop.eup %3132 }
 0x1c3   :  { %v1286_v13 = vadd.f32 1.0, %v3133_v55  ;;  %v4646_v55 = vld [vmem:[#allocation28_spill] sm:$0xff] }
 0x1c4   :  { %v3135_v49 = vpop.eup %3134 }
 0x1c5   :  { %3136 = vrcp.f32 %v1286_v13  ;;  %v1293_v57 = vadd.f32 1.0, %v3135_v49  ;;  %v4647_v13 = vld [vmem:[#allocation29_spill] sm:$0xff] }
 0x1c7   :  { %3138 = vrcp.f32 %v1293_v57 }
 0x1c8   :  { %v1278_v63 = vpop.f32.mrf.mxu1 }
 0x1c9   :  { %v1296_v20 = vadd.f32 %v3949_v58, %v1278_v63  ;;  %v4649_v63 = vld [vmem:[#allocation14_spill] sm:$0xff] }
 0x1ca   :  { %v2876_v36 = vpop.f32.mrf.mxu1 }
 0x1d2   :  { %v3137_v45 = vpop.eup %3136 }
 0x1d3   :  { %v1297_v11 = vmul.f32 %v3137_v45, %v1296_v20  ;;  %v4651_v45 = vld [vmem:[#allocation39_spill] sm:$0xff] }
 0x1d4   :  { %v3139_v41 = vpop.eup %3138 }
 0x1d5   :  { %v1298_v62 = vadd.f32 %v1297_v11, %v1020_v35  ;;  %v1300_v28 = vsub.f32 1.0, %v3139_v41  ;;  %v1302_v59 = vmul.f32 %v3139_v41, %v3718_v22  ;;  %v4636_v22 = vld [vmem:[#allocation33_spill] sm:$0xff] }
 0x1d7   :  { %3140 = vtanh.f32 %v1298_v62 }
 0x1e4   :  { %v3141_v44 = vpop.eup %3140 }
 0x1e5   :  { %v1301_v31 = vmul.f32 %v3141_v44, %v1300_v28 }
 0x1e7   :  { %v3954_v17 = vadd.f32 %v1302_v59, %v1301_v31 }
 0x1e9   :  { %1372 = vmatmul.mubr.f32.vlgmr.msra.gmra.mxu0 %v3954_v17  ;;  %2910 = vmatmul.mubr.f32.vlgmr.msra.gmra.mxu1 %v3954_v17 }
 0x1ea   :  { %1474 = vmatpush1.msra.mxu0 %v3580_v2  ;;  %2913 = vmatpush3.msra.mxu1 %v3660_v5  ;;  %v4626_v2 = vld [vmem:[#allocation15_spill] sm:$0xff] }
 0x1eb   :  { %1475 = vmatprep.subr.mxu0 %v3583_v61  ;;  %2914 = vmatprep.subr.mxu1 %v4625_v43  ;;  %v4627_v61 = vld [vmem:[#allocation30_spill] sm:$0xff] }
 0x1ec   :  { %1476 = vmatpush1.msra.mxu0 %v3587_v4  ;;  %2915 = vmatpush3.msra.mxu1 %v3678_v56  ;;  %v4628_v4 = vld [vmem:[#allocation16_spill] sm:$0xff] }
 0x1ed   :  { %1477 = vmatprep.subr.mxu0 %v3591_v6  ;;  %2916 = vmatprep.subr.mxu1 %v4625_v43  ;;  %v4629_v6 = vld [vmem:[#allocation17_spill] sm:$0xff] }
 0x1ee   :  { %1478 = vmatpush1.msra.mxu0 %v3595_v16  ;;  %2917 = vmatpush3.msra.mxu1 %v3696_v8  ;;  %v4630_v16 = vld [vmem:[#allocation31_spill] sm:$0xff] }
 0x1ef   :  { %1479 = vmatprep.subr.mxu0 %v3600_v21  ;;  %2918 = vmatprep.subr.mxu1 %v4625_v43  ;;  %v4631_v21 = vld [vmem:[#allocation18_spill] sm:$0xff] }
 0x1f0   :  { %1480 = vmatpush1.msra.mxu0 %v3604_v12  ;;  %2919 = vmatpush3.msra.mxu1 %v3714_v25  ;;  %v4632_v12 = vld [vmem:[#allocation19_spill] sm:$0xff] }
 0x1f1   :  { %1481 = vmatprep.subr.mxu0 %v3608_v37  ;;  %2920 = vmatprep.subr.mxu1 %v4625_v43  ;;  %v4633_v37 = vld [vmem:[#allocation32_spill] sm:$0xff] }
 0x1f2   :  { %1482 = vmatpush1.msra.mxu0 %v3611_v0  ;;  %2921 = vmatpush3.msra.mxu1 %v3722_v24  ;;  %v4634_v0 = vld [vmem:[#allocation20_spill] sm:$0xff] }
 0x1f3   :  { %1483 = vmatprep.subr.mxu0 %v3616_v14  ;;  %2922 = vmatprep.subr.mxu1 %v4625_v43  ;;  %v4635_v14 = vld [vmem:[#allocation21_spill] sm:$0xff] }
 0x1f4   :  { %1484 = vmatpush1.msra.mxu0 %v3622_v23  ;;  %2923 = vmatpush3.msra.mxu1 %v3728_v29 }
 0x1f5   :  { %1485 = vmatprep.subr.mxu0 %v3626_v52  ;;  %2924 = vmatprep.subr.mxu1 %v4625_v43 }
 0x1f6   :  { %1486 = vmatpush1.msra.mxu0 %v3629_v60  ;;  %2925 = vmatpush3.msra.mxu1 %v3734_v27 }
 0x1f7   :  { %1487 = vmatprep.subr.mxu0 %v3634_v26  ;;  %2926 = vmatprep.subr.mxu1 %v4625_v43 }
 0x1f8   :  { %1488 = vmatpush1.msra.mxu0 %v3640_v34  ;;  %2927 = vmatpush3.msra.mxu1 %v3740_v30 }
 0x1f9   :  { %1489 = vmatprep.subr.mxu0 %v3644_v1  ;;  %2928 = vmatprep.subr.mxu1 %v4625_v43 }
 0x1fa   :  { %1490 = vmatpush1.msra.mxu0 %v4626_v2  ;;  %2929 = vmatpush3.msra.mxu1 %v4627_v61 }
 0x1fb   :  { %1491 = vmatprep.subr.mxu0 %v4628_v4  ;;  %2930 = vmatprep.subr.mxu1 %v4625_v43 }
 0x1fc   :  { %1492 = vmatpush1.msra.mxu0 %v4629_v6  ;;  %2931 = vmatpush3.msra.mxu1 %v4630_v16 }
 0x1fd   :  { %1493 = vmatprep.subr.mxu0 %v4631_v21  ;;  %2932 = vmatprep.subr.mxu1 %v4625_v43 }
 0x1fe   :  { %1494 = vmatpush1.msra.mxu0 %v4632_v12  ;;  %2933 = vmatpush3.msra.mxu1 %v4633_v37 }
 0x1ff   :  { %1495 = vmatprep.subr.mxu0 %v4634_v0  ;;  %2934 = vmatprep.subr.mxu1 %v4625_v43 }
 0x200   :  { %1496 = vmatpush1.msra.mxu0 %v4635_v14  ;;  %2935 = vmatpush3.msra.mxu1 %v4636_v22 }
 0x201   :  { %1497 = vmatprep.subr.mxu0 %v4637_v7  ;;  %2936 = vmatprep.subr.mxu1 %v4625_v43 }
 0x202   :  { %1498 = vmatpush1.msra.mxu0 %v4638_v48  ;;  %2937 = vmatpush3.msra.mxu1 %v4639_v42 }
 0x203   :  { %1499 = vmatprep.subr.mxu0 %v4640_v53  ;;  %2938 = vmatprep.subr.mxu1 %v4625_v43 }
 0x204   :  { %1500 = vmatpush1.msra.mxu0 %v4641_v38  ;;  %2939 = vmatpush3.msra.mxu1 %v4642_v54 }
 0x205   :  { %1501 = vmatprep.subr.mxu0 %v4643_v33  ;;  %2940 = vmatprep.subr.mxu1 %v4625_v43 }
 0x206   :  { %1502 = vmatpush1.msra.mxu0 %v4644_v15  ;;  %2941 = vmatpush3.msra.mxu1 %v4645_v9 }
 0x207   :  { %1503 = vmatprep.subr.mxu0 %v4646_v55  ;;  %2942 = vmatprep.subr.mxu1 %v4625_v43 }
 0x208   :  { %1504 = vmatpush1.msra.mxu0 %v4647_v13  ;;  %1537 = vmatprep.mubr.f32.mxu0 %v4625_v43 }
 0x209   :  { %2943 = vmatpush3.msra.mxu1 %v4648_v47  ;;  %2944 = vmatprep.mubr.msk.f32.mxu1 %vm3360_vm2, %v4625_v43 }
 0x20a   :  { %1639 = vmatprep.subr.mxu0 %v4649_v63  ;;  %2947 = vmatprep.subr.mxu1 %v4625_v43 }
 0x2a9   :  { %v1373_v36 = vpop.f32.mrf.mxu0  ;;  %v1444_v39 = vpop.f32.mrf.mxu1 }
 0x2aa   :  { %v1448_v49 = vadd.f32 %v1373_v36, %v4650_v51  ;;  %v1462_v31 = vadd.f32 %v3949_v58, %v1444_v39  ;;  %v4042_v39 = vld [vmem:[#allocation9 + $0x150] sm:$0xff] }
 0x2ab   :  { %v2911_v46 = vpop.f32.mrf.mxu1  ;;  %v1375_v20 = vpop.f32.mrf.mxu0 }
 0x2ac   :  { %v2521_v57 = vmul.f32 -1.442695, %v1448_v49  ;;  %v1455_v35 = vadd.f32 %v1375_v20, %v4651_v45 }
 0x2ae   :  { %3142 = vpow2.f32 %v2521_v57  ;;  %v2522_v11 = vmul.f32 -1.442695, %v1455_v35  ;;  %v4034_v35 = vld [vmem:[#allocation9 + $0x168] sm:$0xff] }
 0x2b0   :  { %3144 = vpow2.f32 %v2522_v11  ;;  %v4050_v11 = vld [vmem:[#allocation9 + $0x138] sm:$0xff] }
 0x2bb   :  { %v3143_v62 = vpop.eup %3142 }
 0x2bc   :  { %v1452_v41 = vadd.f32 1.0, %v3143_v62  ;;  %v4058_v62 = vld [vmem:[#allocation9 + $0x120] sm:$0xff] }
 0x2bd   :  { %v3145_v28 = vpop.eup %3144 }
 0x2be   :  { %3146 = vrcp.f32 %v1452_v41  ;;  %v1459_v44 = vadd.f32 1.0, %v3145_v28  ;;  %v4066_v41 = vld [vmem:[#allocation9 + $0x108] sm:$0xff] }
 0x2bf   :  { %v4178_v28 = vld [vmem:[#allocation9 + $0xc8] sm:$0xff] }
 0x2c0   :  { %3148 = vrcp.f32 %v1459_v44  ;;  %v4182_v44 = vld [vmem:[#allocation9 + $0xc0] sm:$0xff] }
 0x2cb   :  { %v3147_v59 = vpop.eup %3146 }
 0x2cc   :  { %v1463_v63 = vmul.f32 %v3147_v59, %v1462_v31  ;;  %v4185_v31 = vld [vmem:[#allocation9 + $0xd0] sm:$0xff] }
 0x2cd   :  { %v3149_v51 = vpop.eup %3148  ;;  %v4188_v59 = vld [vmem:[#allocation9 + $0xb0] sm:$0xff] }
 0x2ce   :  { %v1464_v36 = vadd.f32 %v1463_v63, %v3922_v40  ;;  %v1466_v49 = vsub.f32 1.0, %v3149_v51  ;;  %v1468_v20 = vmul.f32 %v3149_v51, %v3954_v17  ;;  %v4038_v40 = vld [vmem:[#allocation9 + $0x158] sm:$0xff]  ;;  %v4046_v17 = vld [vmem:[#allocation9 + $0x140] sm:$0xff]  ;;  %v4192_v63 = vld [vmem:[#allocation9 + $0xa8] sm:$0xff] }
 0x2cf   :  { %v4198_v51 = vld [vmem:[#allocation9 + $0x98] sm:$0xff] }
 0x2d0   :  { %3150 = vtanh.f32 %v1464_v36  ;;  %v4195_v36 = vld [vmem:[#allocation9 + $0xb8] sm:$0xff] }
 0x2dd   :  { %v3151_v46 = vpop.eup %3150 }
 0x2de   :  { %v1467_v57 = vmul.f32 %v3151_v46, %v1466_v49  ;;  %v4202_v49 = vld [vmem:[#allocation9 + $0x90] sm:$0xff]  ;;  %v4205_v46 = vld [vmem:[#allocation9 + $0xa0] sm:$0xff] }
 0x2e0   :  { %v4030_v45 = vadd.f32 %v1468_v20, %v1467_v57  ;;  %v4208_v57 = vld [vmem:[#allocation9 + $0x80] sm:$0xff]  ;;  %v4212_v20 = vld [vmem:[#allocation9 + $0x78] sm:$0xff] }
 0x2e2   :  { %1538 = vmatmul.mubr.f32.vlgmr.msra.gmra.mxu0 %v4030_v45  ;;  %2945 = vmatmul.mubr.f32.vlgmr.msra.gmra.mxu1 %v4030_v45 }
 0x2e3   :  { %1640 = vmatpush1.msra.mxu0 %v4034_v35  ;;  %2948 = vmatpush3.msra.mxu1 %v3660_v5  ;;  %v4054_v5 = vld [vmem:[#allocation9 + $0x128] sm:$0xff] }
 0x2e4   :  { %1641 = vmatprep.subr.mxu0 %v4038_v40  ;;  %2949 = vmatprep.subr.mxu1 %v4625_v43 }
 0x2e5   :  { %1642 = vmatpush1.msra.mxu0 %v4042_v39  ;;  %2950 = vmatpush3.msra.mxu1 %v3678_v56  ;;  %v4062_v56 = vld [vmem:[#allocation9 + $0x110] sm:$0xff] }
 0x2e6   :  { %1643 = vmatprep.subr.mxu0 %v4046_v17  ;;  %2951 = vmatprep.subr.mxu1 %v4625_v43 }
 0x2e7   :  { %1644 = vmatpush1.msra.mxu0 %v4050_v11  ;;  %2952 = vmatpush3.msra.mxu1 %v3696_v8  ;;  %v4070_v8 = vld [vmem:[#allocation9 + $0xf8] sm:$0xff] }
 0x2e8   :  { %1645 = vmatprep.subr.mxu0 %v4054_v5  ;;  %2953 = vmatprep.subr.mxu1 %v4625_v43 }
 0x2e9   :  { %1646 = vmatpush1.msra.mxu0 %v4058_v62  ;;  %2954 = vmatpush3.msra.mxu1 %v3714_v25 }
 0x2ea   :  { %1647 = vmatprep.subr.mxu0 %v4062_v56  ;;  %2955 = vmatprep.subr.mxu1 %v4625_v43 }
 0x2eb   :  { %1648 = vmatpush1.msra.mxu0 %v4066_v41  ;;  %2956 = vmatpush3.msra.mxu1 %v3722_v24 }
 0x2ec   :  { %1649 = vmatprep.subr.mxu0 %v4070_v8  ;;  %2957 = vmatprep.subr.mxu1 %v4625_v43 }
 0x2ed   :  { %1650 = vmatpush1.msra.mxu0 %v3622_v23  ;;  %2958 = vmatpush3.msra.mxu1 %v3728_v29  ;;  %v4119_v23 = vld [vmem:[#allocation9 + $0x170] sm:$0xff]  ;;  %v4654_v29 = vld [vmem:[#allocation41_spill] sm:$0xff] }
 0x2ee   :  { %1651 = vmatprep.subr.mxu0 %v3626_v52  ;;  %2959 = vmatprep.subr.mxu1 %v4625_v43  ;;  %4652 = vst [vmem:[#allocation15_spill] sm:$0xff] %v4119_v23 }
 0x2ef   :  { %1652 = vmatpush1.msra.mxu0 %v3629_v60  ;;  %2960 = vmatpush3.msra.mxu1 %v3734_v27 }
 0x2f0   :  { %1653 = vmatprep.subr.mxu0 %v3634_v26  ;;  %2961 = vmatprep.subr.mxu1 %v4625_v43  ;;  %v4653_v26 = vld [vmem:[#allocation40_spill] sm:$0xff] }
 0x2f1   :  { %1654 = vmatpush1.msra.mxu0 %v3640_v34  ;;  %2962 = vmatpush3.msra.mxu1 %v3740_v30 }
 0x2f2   :  { %1655 = vmatprep.subr.mxu0 %v3644_v1  ;;  %2963 = vmatprep.subr.mxu1 %v4625_v43 }
 0x2f3   :  { %1656 = vmatpush1.msra.mxu0 %v4626_v2  ;;  %2964 = vmatpush3.msra.mxu1 %v4627_v61 }
 0x2f4   :  { %1657 = vmatprep.subr.mxu0 %v4628_v4  ;;  %2965 = vmatprep.subr.mxu1 %v4625_v43 }
 0x2f5   :  { %1658 = vmatpush1.msra.mxu0 %v4629_v6  ;;  %2966 = vmatpush3.msra.mxu1 %v4630_v16 }
 0x2f6   :  { %1659 = vmatprep.subr.mxu0 %v4631_v21  ;;  %2967 = vmatprep.subr.mxu1 %v4625_v43 }
 0x2f7   :  { %1660 = vmatpush1.msra.mxu0 %v4632_v12  ;;  %2968 = vmatpush3.msra.mxu1 %v4633_v37 }
 0x2f8   :  { %1661 = vmatprep.subr.mxu0 %v4634_v0  ;;  %2969 = vmatprep.subr.mxu1 %v4625_v43 }
 0x2f9   :  { %1662 = vmatpush1.msra.mxu0 %v4635_v14  ;;  %2970 = vmatpush3.msra.mxu1 %v4636_v22 }
 0x2fa   :  { %1663 = vmatprep.subr.mxu0 %v4637_v7  ;;  %2971 = vmatprep.subr.mxu1 %v4625_v43 }
 0x2fb   :  { %1664 = vmatpush1.msra.mxu0 %v4638_v48  ;;  %2972 = vmatpush3.msra.mxu1 %v4639_v42 }
 0x2fc   :  { %1665 = vmatprep.subr.mxu0 %v4640_v53  ;;  %2973 = vmatprep.subr.mxu1 %v4625_v43  ;;  %v4133_v53 = vld [vmem:[#allocation9 + $0x178] sm:$0xff] }
 0x2fd   :  { %1666 = vmatpush1.msra.mxu0 %v4641_v38  ;;  %2974 = vmatpush3.msra.mxu1 %v4642_v54  ;;  %v4145_v38 = vld [vmem:[#allocation9 + $0x148] sm:$0xff]  ;;  %v4151_v54 = vld [vmem:[#allocation9 + $0x130] sm:$0xff] }
 0x2fe   :  { %1667 = vmatprep.subr.mxu0 %v4643_v33  ;;  %2975 = vmatprep.subr.mxu1 %v4625_v43  ;;  %v4157_v33 = vld [vmem:[#allocation9 + $0x118] sm:$0xff] }
 0x2ff   :  { %1668 = vmatpush1.msra.mxu0 %v4644_v15  ;;  %2976 = vmatpush3.msra.mxu1 %v4645_v9  ;;  %v4162_v15 = vld [vmem:[#allocation9 + $0xf0] sm:$0xff]  ;;  %v4165_v9 = vld [vmem:[#allocation9 + $0x100] sm:$0xff] }
 0x300   :  { %1669 = vmatprep.subr.mxu0 %v4646_v55  ;;  %2977 = vmatprep.subr.mxu1 %v4625_v43  ;;  %v4168_v55 = vld [vmem:[#allocation9 + $0xe0] sm:$0xff] }
 0x301   :  { %1670 = vmatpush1.msra.mxu0 %v4647_v13  ;;  %1703 = vmatprep.mubr.f32.mxu0 %v4625_v43  ;;  %v4172_v13 = vld [vmem:[#allocation9 + $0xd8] sm:$0xff] }
 0x302   :  { %2978 = vmatpush3.msra.mxu1 %v4648_v47  ;;  %2979 = vmatprep.mubr.msk.f32.mxu1 %vm3360_vm2, %v4625_v43  ;;  %v4175_v47 = vld [vmem:[#allocation9 + $0xe8] sm:$0xff] }
 0x303   :  { %1805 = vmatprep.subr.mxu0 %v4119_v23  ;;  %2982 = vmatprep.subr.mxu1 %v4625_v43 }
 0x3a2   :  { %v1539_v52 = vpop.f32.mrf.mxu0  ;;  %v1610_v60 = vpop.f32.mrf.mxu1 }
 0x3a3   :  { %v1614_v34 = vadd.f32 %v1539_v52, %v4653_v26  ;;  %v1628_v16 = vadd.f32 %v3949_v58, %v1610_v60  ;;  %v4218_v52 = vld [vmem:[#allocation9 + $0x68] sm:$0xff]  ;;  %v4222_v60 = vld [vmem:[#allocation9 + $0x60] sm:$0xff]  ;;  %v4225_v26 = vld [vmem:[#allocation9 + $0x70] sm:$0xff] }
 0x3a4   :  { %v2946_v1 = vpop.f32.mrf.mxu1  ;;  %v1541_v24 = vpop.f32.mrf.mxu0 }
 0x3a5   :  { %v2523_v25 = vmul.f32 -1.442695, %v1614_v34  ;;  %v1621_v27 = vadd.f32 %v1541_v24, %v4654_v29  ;;  %v4228_v34 = vld [vmem:[#allocation9 + $0x50] sm:$0xff]  ;;  %v4232_v1 = vld [vmem:[#allocation9 + $0x48] sm:$0xff]  ;;  %v4238_v24 = vld [vmem:[#allocation9 + $0x38] sm:$0xff] }
 0x3a6   :  { %v4242_v29 = vld [vmem:[#allocation9 + $0x30] sm:$0xff] }
 0x3a7   :  { %3152 = vpow2.f32 %v2523_v25  ;;  %v2524_v30 = vmul.f32 -1.442695, %v1621_v27  ;;  %v4235_v25 = vld [vmem:[#allocation9 + $0x58] sm:$0xff]  ;;  %v4245_v27 = vld [vmem:[#allocation9 + $0x40] sm:$0xff] }
 0x3a9   :  { %3154 = vpow2.f32 %v2524_v30  ;;  %v4248_v30 = vld [vmem:[#allocation9 + $0x20] sm:$0xff] }
 0x3b4   :  { %v3153_v2 = vpop.eup %3152 }
 0x3b5   :  { %v1618_v61 = vadd.f32 1.0, %v3153_v2  ;;  %v4252_v2 = vld [vmem:[#allocation9 + $0x18] sm:$0xff] }
 0x3b6   :  { %v3155_v4 = vpop.eup %3154 }
 0x3b7   :  { %3156 = vrcp.f32 %v1618_v61  ;;  %v1625_v6 = vadd.f32 1.0, %v3155_v4  ;;  %v4255_v61 = vld [vmem:[#allocation9 + $0x28] sm:$0xff] }
 0x3b8   :  { %4655 = vst [vmem:[#allocation30_spill] sm:$0xff] %v4255_v61  ;;  %v4258_v4 = vld [vmem:[#allocation9 + $0x8] sm:$0xff] }
 0x3b9   :  { %3158 = vrcp.f32 %v1625_v6  ;;  %4656 = vst [vmem:[#allocation16_spill] sm:$0xff] %v4258_v4  ;;  %v4262_v6 = vld [vmem:[#allocation9] sm:$0xff] }
 0x3ba   :  { %4657 = vst [vmem:[#allocation17_spill] sm:$0xff] %v4262_v6 }
 0x3c4   :  { %v3157_v21 = vpop.eup %3156 }
 0x3c5   :  { %v1629_v12 = vmul.f32 %v3157_v21, %v1628_v16  ;;  %v4266_v16 = vld [vmem:[#allocation9 + $0x10] sm:$0xff] }
 0x3c6   :  { %v3159_v0 = vpop.eup %3158  ;;  %4658 = vst [vmem:[#allocation31_spill] sm:$0xff] %v4266_v16 }
 0x3c7   :  { %v1630_v37 = vadd.f32 %v1629_v12, %v3924_v32  ;;  %v1632_v14 = vsub.f32 1.0, %v3159_v0  ;;  %v1634_v48 = vmul.f32 %v3159_v0, %v4030_v45  ;;  %v4139_v32 = vld [vmem:[#allocation9 + $0x160] sm:$0xff]  ;;  %v4215_v45 = vld [vmem:[#allocation9 + $0x88] sm:$0xff] }
 0x3c9   :  { %3160 = vtanh.f32 %v1630_v37  ;;  %v4659_v37 = vld [vmem:[#allocation42_spill] sm:$0xff] }
 0x3d6   :  { %v3161_v22 = vpop.eup %3160 }
 0x3d7   :  { %v1633_v7 = vmul.f32 %v3161_v22, %v1632_v14 }
 0x3d9   :  { %v4128_v42 = vadd.f32 %v1634_v48, %v1633_v7  ;;  %v4660_v48 = vld [vmem:[#allocation43_spill] sm:$0xff] }
 0x3db   :  { %1704 = vmatmul.mubr.f32.vlgmr.msra.gmra.mxu0 %v4128_v42  ;;  %2980 = vmatmul.mubr.f32.vlgmr.msra.gmra.mxu1 %v4128_v42 }
 0x3dc   :  { %1806 = vmatpush1.msra.mxu0 %v4034_v35  ;;  %2983 = vmatpush3.msra.mxu1 %v4133_v53 }
 0x3dd   :  { %1807 = vmatprep.subr.mxu0 %v4038_v40  ;;  %2984 = vmatprep.subr.mxu1 %v4625_v43 }
 0x3de   :  { %1808 = vmatpush1.msra.mxu0 %v4042_v39  ;;  %2985 = vmatpush3.msra.mxu1 %v4139_v32 }
 0x3df   :  { %1809 = vmatprep.subr.mxu0 %v4046_v17  ;;  %2986 = vmatprep.subr.mxu1 %v4625_v43 }
 0x3e0   :  { %1810 = vmatpush1.msra.mxu0 %v4050_v11  ;;  %2987 = vmatpush3.msra.mxu1 %v4145_v38 }
 0x3e1   :  { %1811 = vmatprep.subr.mxu0 %v4054_v5  ;;  %2988 = vmatprep.subr.mxu1 %v4625_v43 }
 0x3e2   :  { %1812 = vmatpush1.msra.mxu0 %v4058_v62  ;;  %2989 = vmatpush3.msra.mxu1 %v4151_v54 }
 0x3e3   :  { %1813 = vmatprep.subr.mxu0 %v4062_v56  ;;  %2990 = vmatprep.subr.mxu1 %v4625_v43 }
 0x3e4   :  { %1814 = vmatpush1.msra.mxu0 %v4066_v41  ;;  %2991 = vmatpush3.msra.mxu1 %v4157_v33 }
 0x3e5   :  { %1815 = vmatprep.subr.mxu0 %v4070_v8  ;;  %2992 = vmatprep.subr.mxu1 %v4625_v43 }
 0x3e6   :  { %1816 = vmatpush1.msra.mxu0 %v4162_v15  ;;  %2993 = vmatpush3.msra.mxu1 %v4165_v9 }
 0x3e7   :  { %1817 = vmatprep.subr.mxu0 %v4168_v55  ;;  %2994 = vmatprep.subr.mxu1 %v4625_v43 }
 0x3e8   :  { %1818 = vmatpush1.msra.mxu0 %v4172_v13  ;;  %2995 = vmatpush3.msra.mxu1 %v4175_v47 }
 0x3e9   :  { %1819 = vmatprep.subr.mxu0 %v4178_v28  ;;  %2996 = vmatprep.subr.mxu1 %v4625_v43 }
 0x3ea   :  { %1820 = vmatpush1.msra.mxu0 %v4182_v44  ;;  %2997 = vmatpush3.msra.mxu1 %v4185_v31 }
 0x3eb   :  { %1821 = vmatprep.subr.mxu0 %v4188_v59  ;;  %2998 = vmatprep.subr.mxu1 %v4625_v43 }
 0x3ec   :  { %1822 = vmatpush1.msra.mxu0 %v4192_v63  ;;  %2999 = vmatpush3.msra.mxu1 %v4195_v36 }
 0x3ed   :  { %1823 = vmatprep.subr.mxu0 %v4198_v51  ;;  %3000 = vmatprep.subr.mxu1 %v4625_v43 }
 0x3ee   :  { %1824 = vmatpush1.msra.mxu0 %v4202_v49  ;;  %3001 = vmatpush3.msra.mxu1 %v4205_v46 }
 0x3ef   :  { %1825 = vmatprep.subr.mxu0 %v4208_v57  ;;  %3002 = vmatprep.subr.mxu1 %v4625_v43 }
 0x3f0   :  { %1826 = vmatpush1.msra.mxu0 %v4212_v20  ;;  %3003 = vmatpush3.msra.mxu1 %v4215_v45 }
 0x3f1   :  { %1827 = vmatprep.subr.mxu0 %v4218_v52  ;;  %3004 = vmatprep.subr.mxu1 %v4625_v43 }
 0x3f2   :  { %1828 = vmatpush1.msra.mxu0 %v4222_v60  ;;  %3005 = vmatpush3.msra.mxu1 %v4225_v26 }
 0x3f3   :  { %1829 = vmatprep.subr.mxu0 %v4228_v34  ;;  %3006 = vmatprep.subr.mxu1 %v4625_v43 }
 0x3f4   :  { %1830 = vmatpush1.msra.mxu0 %v4232_v1  ;;  %3007 = vmatpush3.msra.mxu1 %v4235_v25 }
 0x3f5   :  { %1831 = vmatprep.subr.mxu0 %v4238_v24  ;;  %3008 = vmatprep.subr.mxu1 %v4625_v43 }
 0x3f6   :  { %1832 = vmatpush1.msra.mxu0 %v4242_v29  ;;  %3009 = vmatpush3.msra.mxu1 %v4245_v27 }
 0x3f7   :  { %1833 = vmatprep.subr.mxu0 %v4248_v30  ;;  %3010 = vmatprep.subr.mxu1 %v4625_v43 }
 0x3f8   :  { %1834 = vmatpush1.msra.mxu0 %v4252_v2  ;;  %3011 = vmatpush3.msra.mxu1 %v4255_v61 }
 0x3f9   :  { %1835 = vmatprep.subr.mxu0 %v4258_v4  ;;  %3012 = vmatprep.subr.mxu1 %v4625_v43 }
 0x3fa   :  { %1836 = vmatpush1.msra.mxu0 %v4262_v6  ;;  %1869 = vmatprep.mubr.f32.mxu0 %v4625_v43 }
 0x3fb   :  { %3013 = vmatpush3.msra.mxu1 %v4266_v16  ;;  %3014 = vmatprep.mubr.msk.f32.mxu1 %vm3360_vm2, %v4625_v43 }
 0x3fc   :  { %1971 = vmatprep.subr.mxu0 %v4119_v23  ;;  %3017 = vmatprep.subr.mxu1 %v4625_v43 }
 0x49b   :  { %v1705_v21 = vpop.f32.mrf.mxu0  ;;  %v1776_v12 = vpop.f32.mrf.mxu1 }
 0x49c   :  { %v1780_v0 = vadd.f32 %v1705_v21, %v4659_v37  ;;  %v1794_v23 = vadd.f32 %v3949_v58, %v1776_v12 }
 0x49d   :  { %v2981_v14 = vpop.f32.mrf.mxu1  ;;  %v1707_v7 = vpop.f32.mrf.mxu0 }
 0x49e   :  { %v2525_v22 = vmul.f32 -1.442695, %v1780_v0  ;;  %v1787_v50 = vadd.f32 %v1707_v7, %v4660_v48 }
 0x4a0   :  { %3162 = vpow2.f32 %v2525_v22  ;;  %v2526_v18 = vmul.f32 -1.442695, %v1787_v50 }
 0x4a2   :  { %3164 = vpow2.f32 %v2526_v18 }
 0x4ad   :  { %v3163_v10 = vpop.eup %3162 }
 0x4ae   :  { %v1784_v19 = vadd.f32 1.0, %v3163_v10  ;;  %v4663_v10 = vld [vmem:[#allocation17_spill] sm:$0xff] }
 0x4af   :  { %v3165_v16 = vpop.eup %3164 }
 0x4b0   :  { %3166 = vrcp.f32 %v1784_v19  ;;  %v1791_v6 = vadd.f32 1.0, %v3165_v16  ;;  %v4662_v19 = vld [vmem:[#allocation16_spill] sm:$0xff] }
 0x4b2   :  { %3168 = vrcp.f32 %v1791_v6  ;;  %v4666_v6 = vld [vmem:[#allocation44_spill] sm:$0xff] }
 0x4bd   :  { %v3167_v4 = vpop.eup %3166 }
 0x4be   :  { %v1795_v61 = vmul.f32 %v3167_v4, %v1794_v23  ;;  %v4664_v23 = vld [vmem:[#allocation31_spill] sm:$0xff] }
 0x4bf   :  { %v3169_v37 = vpop.eup %3168 }
 0x4c0   :  { %v1796_v21 = vadd.f32 %v1795_v61, %v3926_v3  ;;  %v1798_v0 = vsub.f32 1.0, %v3169_v37  ;;  %v1800_v50 = vmul.f32 %v3169_v37, %v4128_v42  ;;  %v4661_v3 = vld [vmem:[#allocation30_spill] sm:$0xff]  ;;  %v4665_v42 = vld [vmem:[#allocation15_spill] sm:$0xff] }
 0x4c2   :  { %3170 = vtanh.f32 %v1796_v21  ;;  %v4667_v21 = vld [vmem:[#allocation45_spill] sm:$0xff] }
 0x4cf   :  { %v3171_v14 = vpop.eup %3170 }
 0x4d0   :  { %v1799_v22 = vmul.f32 %v3171_v14, %v1798_v0 }
 0x4d2   :  { %v4278_v18 = vadd.f32 %v1800_v50, %v1799_v22 }
 0x4d4   :  { %1870 = vmatmul.mubr.f32.vlgmr.msra.gmra.mxu0 %v4278_v18  ;;  %3015 = vmatmul.mubr.f32.vlgmr.msra.gmra.mxu1 %v4278_v18 }
 0x4d5   :  { %1972 = vmatpush1.msra.mxu0 %v4034_v35  ;;  %3018 = vmatpush3.msra.mxu1 %v4133_v53 }
 0x4d6   :  { %1973 = vmatprep.subr.mxu0 %v4038_v40  ;;  %3019 = vmatprep.subr.mxu1 %v4625_v43 }
 0x4d7   :  { %1974 = vmatpush1.msra.mxu0 %v4042_v39  ;;  %3020 = vmatpush3.msra.mxu1 %v4139_v32 }
 0x4d8   :  { %1975 = vmatprep.subr.mxu0 %v4046_v17  ;;  %3021 = vmatprep.subr.mxu1 %v4625_v43 }
 0x4d9   :  { %1976 = vmatpush1.msra.mxu0 %v4050_v11  ;;  %3022 = vmatpush3.msra.mxu1 %v4145_v38 }
 0x4da   :  { %1977 = vmatprep.subr.mxu0 %v4054_v5  ;;  %3023 = vmatprep.subr.mxu1 %v4625_v43 }
 0x4db   :  { %1978 = vmatpush1.msra.mxu0 %v4058_v62  ;;  %3024 = vmatpush3.msra.mxu1 %v4151_v54 }
 0x4dc   :  { %1979 = vmatprep.subr.mxu0 %v4062_v56  ;;  %3025 = vmatprep.subr.mxu1 %v4625_v43 }
 0x4dd   :  { %1980 = vmatpush1.msra.mxu0 %v4066_v41  ;;  %3026 = vmatpush3.msra.mxu1 %v4157_v33 }
 0x4de   :  { %1981 = vmatprep.subr.mxu0 %v4070_v8  ;;  %3027 = vmatprep.subr.mxu1 %v4625_v43 }
 0x4df   :  { %1982 = vmatpush1.msra.mxu0 %v4162_v15  ;;  %3028 = vmatpush3.msra.mxu1 %v4165_v9 }
 0x4e0   :  { %1983 = vmatprep.subr.mxu0 %v4168_v55  ;;  %3029 = vmatprep.subr.mxu1 %v4625_v43 }
 0x4e1   :  { %1984 = vmatpush1.msra.mxu0 %v4172_v13  ;;  %3030 = vmatpush3.msra.mxu1 %v4175_v47 }
 0x4e2   :  { %1985 = vmatprep.subr.mxu0 %v4178_v28  ;;  %3031 = vmatprep.subr.mxu1 %v4625_v43 }
 0x4e3   :  { %1986 = vmatpush1.msra.mxu0 %v4182_v44  ;;  %3032 = vmatpush3.msra.mxu1 %v4185_v31 }
 0x4e4   :  { %1987 = vmatprep.subr.mxu0 %v4188_v59  ;;  %3033 = vmatprep.subr.mxu1 %v4625_v43 }
 0x4e5   :  { %1988 = vmatpush1.msra.mxu0 %v4192_v63  ;;  %3034 = vmatpush3.msra.mxu1 %v4195_v36 }
 0x4e6   :  { %1989 = vmatprep.subr.mxu0 %v4198_v51  ;;  %3035 = vmatprep.subr.mxu1 %v4625_v43 }
 0x4e7   :  { %1990 = vmatpush1.msra.mxu0 %v4202_v49  ;;  %3036 = vmatpush3.msra.mxu1 %v4205_v46 }
 0x4e8   :  { %1991 = vmatprep.subr.mxu0 %v4208_v57  ;;  %3037 = vmatprep.subr.mxu1 %v4625_v43 }
 0x4e9   :  { %1992 = vmatpush1.msra.mxu0 %v4212_v20  ;;  %3038 = vmatpush3.msra.mxu1 %v4215_v45 }
 0x4ea   :  { %1993 = vmatprep.subr.mxu0 %v4218_v52  ;;  %3039 = vmatprep.subr.mxu1 %v4625_v43 }
 0x4eb   :  { %1994 = vmatpush1.msra.mxu0 %v4222_v60  ;;  %3040 = vmatpush3.msra.mxu1 %v4225_v26 }
 0x4ec   :  { %1995 = vmatprep.subr.mxu0 %v4228_v34  ;;  %3041 = vmatprep.subr.mxu1 %v4625_v43 }
 0x4ed   :  { %1996 = vmatpush1.msra.mxu0 %v4232_v1  ;;  %3042 = vmatpush3.msra.mxu1 %v4235_v25 }
 0x4ee   :  { %1997 = vmatprep.subr.mxu0 %v4238_v24  ;;  %3043 = vmatprep.subr.mxu1 %v4625_v43 }
 0x4ef   :  { %1998 = vmatpush1.msra.mxu0 %v4242_v29  ;;  %3044 = vmatpush3.msra.mxu1 %v4245_v27 }
 0x4f0   :  { %1999 = vmatprep.subr.mxu0 %v4248_v30  ;;  %3045 = vmatprep.subr.mxu1 %v4625_v43 }
 0x4f1   :  { %2000 = vmatpush1.msra.mxu0 %v4252_v2  ;;  %3046 = vmatpush3.msra.mxu1 %v4661_v3  ;;  %v4668_v3 = vld [vmem:[#allocation52_spill] sm:$0xff] }
 0x4f2   :  { %2001 = vmatprep.subr.mxu0 %v4662_v19  ;;  %3047 = vmatprep.subr.mxu1 %v4625_v43 }
 0x4f3   :  { %2002 = vmatpush1.msra.mxu0 %v4663_v10  ;;  %2035 = vmatprep.mubr.f32.mxu0 %v4625_v43 }
 0x4f4   :  { %3048 = vmatpush3.msra.mxu1 %v4664_v23  ;;  %3049 = vmatprep.mubr.msk.f32.mxu1 %vm3360_vm2, %v4625_v43 }
 0x4f5   :  { %2137 = vmatprep.subr.mxu0 %v4665_v42  ;;  %3052 = vmatprep.subr.mxu1 %v4625_v43 }
 0x594   :  { %v1871_v61 = vpop.f32.mrf.mxu0  ;;  %v1942_v4 = vpop.f32.mrf.mxu1 }
 0x595   :  { %v1946_v16 = vadd.f32 %v1871_v61, %v4666_v6  ;;  %v1960_v42 = vadd.f32 %v3949_v58, %v1942_v4 }
 0x596   :  { %v3016_v12 = vpop.f32.mrf.mxu1  ;;  %v1873_v48 = vpop.f32.mrf.mxu0 }
 0x597   :  { %v2527_v7 = vmul.f32 -1.442695, %v1946_v16  ;;  %v1953_v37 = vadd.f32 %v1873_v48, %v4667_v21 }
 0x599   :  { %3172 = vpow2.f32 %v2527_v7  ;;  %v2528_v0 = vmul.f32 -1.442695, %v1953_v37  ;;  %v4674_v37 = vld [vmem:[#allocation46_spill] sm:$0xff] }
 0x59b   :  { %3174 = vpow2.f32 %v2528_v0 }
 0x5a6   :  { %v3173_v14 = vpop.eup %3172 }
 0x5a7   :  { %v1950_v22 = vadd.f32 1.0, %v3173_v14 }
 0x5a8   :  { %v3175_v50 = vpop.eup %3174 }
 0x5a9   :  { %3176 = vrcp.f32 %v1950_v22  ;;  %v1957_v23 = vadd.f32 1.0, %v3175_v50 }
 0x5ab   :  { %3178 = vrcp.f32 %v1957_v23  ;;  %v4673_v23 = vld [vmem:[#allocation15_spill] sm:$0xff] }
 0x5b6   :  { %v3177_v10 = vpop.eup %3176 }
 0x5b7   :  { %v1961_v19 = vmul.f32 %v3177_v10, %v1960_v42  ;;  %v4672_v10 = vld [vmem:[#allocation31_spill] sm:$0xff] }
 0x5b8   :  { %v3179_v6 = vpop.eup %3178 }
 0x5b9   :  { %v1962_v61 = vadd.f32 %v1961_v19, %v4668_v3  ;;  %v1964_v16 = vsub.f32 1.0, %v3179_v6  ;;  %v1966_v48 = vmul.f32 %v3179_v6, %v4278_v18  ;;  %v4669_v18 = vld [vmem:[#allocation30_spill] sm:$0xff]  ;;  %v4670_v3 = vld [vmem:[#allocation16_spill] sm:$0xff]  ;;  %v4671_v19 = vld [vmem:[#allocation17_spill] sm:$0xff] }
 0x5bb   :  { %3180 = vtanh.f32 %v1962_v61  ;;  %v4675_v61 = vld [vmem:[#allocation47_spill] sm:$0xff] }
 0x5c8   :  { %v3181_v12 = vpop.eup %3180 }
 0x5c9   :  { %v1965_v7 = vmul.f32 %v3181_v12, %v1964_v16 }
 0x5cb   :  { %v4354_v21 = vadd.f32 %v1966_v48, %v1965_v7 }
 0x5cd   :  { %2036 = vmatmul.mubr.f32.vlgmr.msra.gmra.mxu0 %v4354_v21  ;;  %3050 = vmatmul.mubr.f32.vlgmr.msra.gmra.mxu1 %v4354_v21 }
 0x5ce   :  { %2138 = vmatpush1.msra.mxu0 %v4034_v35  ;;  %3053 = vmatpush3.msra.mxu1 %v4133_v53 }
 0x5cf   :  { %2139 = vmatprep.subr.mxu0 %v4038_v40  ;;  %3054 = vmatprep.subr.mxu1 %v4625_v43 }
 0x5d0   :  { %2140 = vmatpush1.msra.mxu0 %v4042_v39  ;;  %3055 = vmatpush3.msra.mxu1 %v4139_v32 }
 0x5d1   :  { %2141 = vmatprep.subr.mxu0 %v4046_v17  ;;  %3056 = vmatprep.subr.mxu1 %v4625_v43 }
 0x5d2   :  { %2142 = vmatpush1.msra.mxu0 %v4050_v11  ;;  %3057 = vmatpush3.msra.mxu1 %v4145_v38 }
 0x5d3   :  { %2143 = vmatprep.subr.mxu0 %v4054_v5  ;;  %3058 = vmatprep.subr.mxu1 %v4625_v43 }
 0x5d4   :  { %2144 = vmatpush1.msra.mxu0 %v4058_v62  ;;  %3059 = vmatpush3.msra.mxu1 %v4151_v54 }
 0x5d5   :  { %2145 = vmatprep.subr.mxu0 %v4062_v56  ;;  %3060 = vmatprep.subr.mxu1 %v4625_v43 }
 0x5d6   :  { %2146 = vmatpush1.msra.mxu0 %v4066_v41  ;;  %3061 = vmatpush3.msra.mxu1 %v4157_v33 }
 0x5d7   :  { %2147 = vmatprep.subr.mxu0 %v4070_v8  ;;  %3062 = vmatprep.subr.mxu1 %v4625_v43 }
 0x5d8   :  { %2148 = vmatpush1.msra.mxu0 %v4162_v15  ;;  %3063 = vmatpush3.msra.mxu1 %v4165_v9 }
 0x5d9   :  { %2149 = vmatprep.subr.mxu0 %v4168_v55  ;;  %3064 = vmatprep.subr.mxu1 %v4625_v43 }
 0x5da   :  { %2150 = vmatpush1.msra.mxu0 %v4172_v13  ;;  %3065 = vmatpush3.msra.mxu1 %v4175_v47 }
 0x5db   :  { %2151 = vmatprep.subr.mxu0 %v4178_v28  ;;  %3066 = vmatprep.subr.mxu1 %v4625_v43 }
 0x5dc   :  { %2152 = vmatpush1.msra.mxu0 %v4182_v44  ;;  %3067 = vmatpush3.msra.mxu1 %v4185_v31 }
 0x5dd   :  { %2153 = vmatprep.subr.mxu0 %v4188_v59  ;;  %3068 = vmatprep.subr.mxu1 %v4625_v43 }
 0x5de   :  { %2154 = vmatpush1.msra.mxu0 %v4192_v63  ;;  %3069 = vmatpush3.msra.mxu1 %v4195_v36 }
 0x5df   :  { %2155 = vmatprep.subr.mxu0 %v4198_v51  ;;  %3070 = vmatprep.subr.mxu1 %v4625_v43 }
 0x5e0   :  { %2156 = vmatpush1.msra.mxu0 %v4202_v49  ;;  %3071 = vmatpush3.msra.mxu1 %v4205_v46 }
 0x5e1   :  { %2157 = vmatprep.subr.mxu0 %v4208_v57  ;;  %3072 = vmatprep.subr.mxu1 %v4625_v43 }
 0x5e2   :  { %2158 = vmatpush1.msra.mxu0 %v4212_v20  ;;  %3073 = vmatpush3.msra.mxu1 %v4215_v45 }
 0x5e3   :  { %2159 = vmatprep.subr.mxu0 %v4218_v52  ;;  %3074 = vmatprep.subr.mxu1 %v4625_v43 }
 0x5e4   :  { %2160 = vmatpush1.msra.mxu0 %v4222_v60  ;;  %3075 = vmatpush3.msra.mxu1 %v4225_v26 }
 0x5e5   :  { %2161 = vmatprep.subr.mxu0 %v4228_v34  ;;  %3076 = vmatprep.subr.mxu1 %v4625_v43 }
 0x5e6   :  { %2162 = vmatpush1.msra.mxu0 %v4232_v1  ;;  %3077 = vmatpush3.msra.mxu1 %v4235_v25 }
 0x5e7   :  { %2163 = vmatprep.subr.mxu0 %v4238_v24  ;;  %3078 = vmatprep.subr.mxu1 %v4625_v43 }
 0x5e8   :  { %2164 = vmatpush1.msra.mxu0 %v4242_v29  ;;  %3079 = vmatpush3.msra.mxu1 %v4245_v27 }
 0x5e9   :  { %2165 = vmatprep.subr.mxu0 %v4248_v30  ;;  %3080 = vmatprep.subr.mxu1 %v4625_v43 }
 0x5ea   :  { %2166 = vmatpush1.msra.mxu0 %v4252_v2  ;;  %3081 = vmatpush3.msra.mxu1 %v4669_v18  ;;  %v4676_v18 = vld [vmem:[#allocation53_spill] sm:$0xff] }
 0x5eb   :  { %2167 = vmatprep.subr.mxu0 %v4670_v3  ;;  %3082 = vmatprep.subr.mxu1 %v4625_v43 }
 0x5ec   :  { %2168 = vmatpush1.msra.mxu0 %v4671_v19  ;;  %2201 = vmatprep.mubr.f32.mxu0 %v4625_v43 }
 0x5ed   :  { %3083 = vmatpush3.msra.mxu1 %v4672_v10  ;;  %3084 = vmatprep.mubr.msk.f32.mxu1 %vm3360_vm2, %v4625_v43 }
 0x5ee   :  { %2303 = vmatprep.subr.mxu0 %v4673_v23  ;;  %3087 = vmatprep.subr.mxu1 %v4625_v43 }
 0x68d   :  { %v2037_v42 = vpop.f32.mrf.mxu0  ;;  %v2108_v4 = vpop.f32.mrf.mxu1 }
 0x68e   :  { %v2112_v0 = vadd.f32 %v2037_v42, %v4674_v37  ;;  %v2126_v23 = vadd.f32 %v3949_v58, %v2108_v4  ;;  %v4677_v58 = vld [vmem:[#allocation30_spill] sm:$0xff] }
 0x68f   :  { %v3051_v14 = vpop.f32.mrf.mxu1  ;;  %v2039_v50 = vpop.f32.mrf.mxu0 }
 0x690   :  { %v2529_v22 = vmul.f32 -1.442695, %v2112_v0  ;;  %v2119_v6 = vadd.f32 %v2039_v50, %v4675_v61 }
 0x692   :  { %3182 = vpow2.f32 %v2529_v22  ;;  %v2530_v16 = vmul.f32 -1.442695, %v2119_v6 }
 0x694   :  { %3184 = vpow2.f32 %v2530_v16 }
 0x69f   :  { %v3183_v12 = vpop.eup %3182 }
 0x6a0   :  { %v2116_v7 = vadd.f32 1.0, %v3183_v12 }
 0x6a1   :  { %v3185_v48 = vpop.eup %3184 }
 0x6a2   :  { %3186 = vrcp.f32 %v2116_v7  ;;  %v2123_v10 = vadd.f32 1.0, %v3185_v48  ;;  %v2535_v7 = vld [vmem:[%s4521_s6] ss:$0 sm:$0xff] }
 0x6a4   :  { %3188 = vrcp.f32 %v2123_v10 }
 0x6af   :  { %v3187_v19 = vpop.eup %3186 }
 0x6b0   :  { %v2127_v3 = vmul.f32 %v3187_v19, %v2126_v23 }
 0x6b1   :  { %v3189_v37 = vpop.eup %3188 }
 0x6b2   :  { %v2128_v42 = vadd.f32 %v2127_v3, %v4676_v18  ;;  %v2130_v0 = vsub.f32 1.0, %v3189_v37  ;;  %v2132_v50 = vmul.f32 %v3189_v37, %v4354_v21  ;;  %v4686_v3 = vld [vmem:[#allocation55_spill] sm:$0xff] }
 0x6b4   :  { %3190 = vtanh.f32 %v2128_v42  ;;  %v2536_v42 = vld [vmem:[#allocation3] ss:$0 sm:$0xff] }
 0x6c1   :  { %v3191_v14 = vpop.eup %3190 }
 0x6c2   :  { %v2131_v22 = vmul.f32 %v3191_v14, %v2130_v0 }
 0x6c4   :  { %v4430_v61 = vadd.f32 %v2132_v50, %v2131_v22 }
 0x6c6   :  { %2202 = vmatmul.mubr.f32.vlgmr.msra.gmra.mxu0 %v4430_v61  ;;  %3085 = vmatmul.mubr.f32.vlgmr.msra.gmra.mxu1 %v4430_v61 }
 0x6c7   :  { %2304 = vmatpush1.msra.mxu0 %v4034_v35  ;;  %3088 = vmatpush3.msra.mxu1 %v4133_v53  ;;  %v4678_v35 = vld [vmem:[#allocation16_spill] sm:$0xff]  ;;  %v4682_v53 = vld [vmem:[#allocation49_spill] sm:$0xff] }
 0x6c8   :  { %2305 = vmatprep.subr.mxu0 %v4038_v40  ;;  %3089 = vmatprep.subr.mxu1 %v4625_v43  ;;  %v4679_v40 = vld [vmem:[#allocation17_spill] sm:$0xff] }
 0x6c9   :  { %2306 = vmatpush1.msra.mxu0 %v4042_v39  ;;  %3090 = vmatpush3.msra.mxu1 %v4139_v32  ;;  %v4680_v39 = vld [vmem:[#allocation31_spill] sm:$0xff] }
 0x6ca   :  { %2307 = vmatprep.subr.mxu0 %v4046_v17  ;;  %3091 = vmatprep.subr.mxu1 %v4625_v43 }
 0x6cb   :  { %2308 = vmatpush1.msra.mxu0 %v4050_v11  ;;  %3092 = vmatpush3.msra.mxu1 %v4145_v38 }
 0x6cc   :  { %2309 = vmatprep.subr.mxu0 %v4054_v5  ;;  %3093 = vmatprep.subr.mxu1 %v4625_v43  ;;  %v4681_v5 = vld [vmem:[#allocation48_spill] sm:$0xff] }
 0x6cd   :  { %2310 = vmatpush1.msra.mxu0 %v4058_v62  ;;  %3094 = vmatpush3.msra.mxu1 %v4151_v54 }
 0x6ce   :  { %2311 = vmatprep.subr.mxu0 %v4062_v56  ;;  %3095 = vmatprep.subr.mxu1 %v4625_v43 }
 0x6cf   :  { %2312 = vmatpush1.msra.mxu0 %v4066_v41  ;;  %3096 = vmatpush3.msra.mxu1 %v4157_v33 }
 0x6d0   :  { %2313 = vmatprep.subr.mxu0 %v4070_v8  ;;  %3097 = vmatprep.subr.mxu1 %v4625_v43 }
 0x6d1   :  { %2314 = vmatpush1.msra.mxu0 %v4162_v15  ;;  %3098 = vmatpush3.msra.mxu1 %v4165_v9 }
 0x6d2   :  { %2315 = vmatprep.subr.mxu0 %v4168_v55  ;;  %3099 = vmatprep.subr.mxu1 %v4625_v43 }
 0x6d3   :  { %2316 = vmatpush1.msra.mxu0 %v4172_v13  ;;  %3100 = vmatpush3.msra.mxu1 %v4175_v47 }
 0x6d4   :  { %2317 = vmatprep.subr.mxu0 %v4178_v28  ;;  %3101 = vmatprep.subr.mxu1 %v4625_v43  ;;  %v4683_v28 = vld [vmem:[#allocation54_spill] sm:$0xff] }
 0x6d5   :  { %2318 = vmatpush1.msra.mxu0 %v4182_v44  ;;  %3102 = vmatpush3.msra.mxu1 %v4185_v31 }
 0x6d6   :  { %2319 = vmatprep.subr.mxu0 %v4188_v59  ;;  %3103 = vmatprep.subr.mxu1 %v4625_v43 }
 0x6d7   :  { %2320 = vmatpush1.msra.mxu0 %v4192_v63  ;;  %3104 = vmatpush3.msra.mxu1 %v4195_v36 }
 0x6d8   :  { %2321 = vmatprep.subr.mxu0 %v4198_v51  ;;  %3105 = vmatprep.subr.mxu1 %v4625_v43 }
 0x6d9   :  { %2322 = vmatpush1.msra.mxu0 %v4202_v49  ;;  %3106 = vmatpush3.msra.mxu1 %v4205_v46 }
 0x6da   :  { %2323 = vmatprep.subr.mxu0 %v4208_v57  ;;  %3107 = vmatprep.subr.mxu1 %v4625_v43 }
 0x6db   :  { %2324 = vmatpush1.msra.mxu0 %v4212_v20  ;;  %3108 = vmatpush3.msra.mxu1 %v4215_v45  ;;  %v4684_v20 = vld [vmem:[#allocation50_spill] sm:$0xff] }
 0x6dc   :  { %2325 = vmatprep.subr.mxu0 %v4218_v52  ;;  %3109 = vmatprep.subr.mxu1 %v4625_v43 }
 0x6dd   :  { %2326 = vmatpush1.msra.mxu0 %v4222_v60  ;;  %3110 = vmatpush3.msra.mxu1 %v4225_v26 }
 0x6de   :  { %2327 = vmatprep.subr.mxu0 %v4228_v34  ;;  %3111 = vmatprep.subr.mxu1 %v4625_v43  ;;  %v4685_v34 = vld [vmem:[#allocation51_spill] sm:$0xff] }
 0x6df   :  { %2328 = vmatpush1.msra.mxu0 %v4232_v1  ;;  %3112 = vmatpush3.msra.mxu1 %v4235_v25 }
 0x6e0   :  { %2329 = vmatprep.subr.mxu0 %v4238_v24  ;;  %3113 = vmatprep.subr.mxu1 %v4625_v43 }
 0x6e1   :  { %2330 = vmatpush1.msra.mxu0 %v4242_v29  ;;  %3114 = vmatpush3.msra.mxu1 %v4245_v27 }
 0x6e2   :  { %2331 = vmatprep.subr.mxu0 %v4248_v30  ;;  %3115 = vmatprep.subr.mxu1 %v4625_v43 }
 0x6e3   :  { %2332 = vmatpush1.msra.mxu0 %v4252_v2  ;;  %3116 = vmatpush3.msra.mxu1 %v4677_v58 }
 0x6e4   :  { %2333 = vmatprep.subr.mxu0 %v4678_v35  ;;  %3117 = vmatprep.subr.mxu1 %v4625_v43 }
 0x6e5   :  { %2334 = vmatpush1.msra.mxu0 %v4679_v40  ;;  %2367 = vmatprep.mubr.f32.mxu0 %v4625_v43 }
 0x6e6   :  { %3118 = vmatpush3.msra.mxu1 %v4680_v39  ;;  %3119 = vmatprep.mubr.msk.f32.mxu1 %vm3360_vm2, %v4625_v43  ;;  %v3264_v43 = vld [vmem:[%s4520_s5] ss:$0 sm:$0xff] }
 0x786   :  { %v2203_v17 = vpop.f32.mrf.mxu0  ;;  %v2274_v11 = vpop.f32.mrf.mxu1 }
 0x787   :  { %v2278_v62 = vadd.f32 %v2203_v17, %v4681_v5  ;;  %v2292_v55 = vadd.f32 %v3264_v43, %v2274_v11 }
 0x788   :  { %v3086_v56 = vpop.f32.mrf.mxu1  ;;  %v2205_v8 = vpop.f32.mrf.mxu0 }
 0x789   :  { %v2531_v41 = vmul.f32 -1.442695, %v2278_v62  ;;  %v2285_v32 = vadd.f32 %v2205_v8, %v4682_v53 }
 0x78b   :  { %3192 = vpow2.f32 %v2531_v41  ;;  %v2532_v38 = vmul.f32 -1.442695, %v2285_v32 }
 0x78d   :  { %3194 = vpow2.f32 %v2532_v38 }
 0x798   :  { %v3193_v54 = vpop.eup %3192 }
 0x799   :  { %v2282_v33 = vadd.f32 1.0, %v3193_v54 }
 0x79a   :  { %v3195_v15 = vpop.eup %3194 }
 0x79b   :  { %3196 = vrcp.f32 %v2282_v33  ;;  %v2289_v9 = vadd.f32 1.0, %v3195_v15 }
 0x79d   :  { %3198 = vrcp.f32 %v2289_v9 }
 0x7a8   :  { %v3197_v13 = vpop.eup %3196 }
 0x7a9   :  { %v2293_v47 = vmul.f32 %v3197_v13, %v2292_v55 }
 0x7aa   :  { %v3199_v31 = vpop.eup %3198 }
 0x7ab   :  { %v2294_v44 = vadd.f32 %v2293_v47, %v4683_v28  ;;  %v2296_v59 = vsub.f32 1.0, %v3199_v31  ;;  %v2298_v51 = vmul.f32 %v3199_v31, %v4430_v61 }
 0x7ad   :  { %3200 = vtanh.f32 %v2294_v44 }
 0x7ba   :  { %v3201_v63 = vpop.eup %3200 }
 0x7bb   :  { %v2297_v36 = vmul.f32 %v3201_v63, %v2296_v59 }
 0x7bd   :  { %v2299_v49 = vadd.f32 %v2298_v51, %v2297_v36 }
 0x7bf   :  { %2368 = vmatmul.mubr.f32.vlgmr.msra.gmra.mxu0 %v2299_v49  ;;  %3120 = vmatmul.mubr.f32.vlgmr.msra.gmra.mxu1 %v2299_v49 }
 0x87f   :  { %v2369_v46 = vpop.f32.mrf.mxu0  ;;  %v2440_v57 = vpop.f32.mrf.mxu1 }
 0x880   :  { %v2444_v45 = vadd.f32 %v2369_v46, %v4684_v20  ;;  %v2458_v2 = vadd.f32 %v3264_v43, %v2440_v57 }
 0x881   :  { %v3121_v52 = vpop.f32.mrf.mxu1  ;;  %v2371_v26 = vpop.f32.mrf.mxu0 }
 0x882   :  { %v2533_v60 = vmul.f32 -1.442695, %v2444_v45  ;;  %v2451_v1 = vadd.f32 %v2371_v26, %v4685_v34 }
 0x884   :  { %3202 = vpow2.f32 %v2533_v60  ;;  %v2534_v25 = vmul.f32 -1.442695, %v2451_v1 }
 0x886   :  { %3204 = vpow2.f32 %v2534_v25 }
 0x891   :  { %v3203_v24 = vpop.eup %3202 }
 0x892   :  { %v2448_v29 = vadd.f32 1.0, %v3203_v24 }
 0x893   :  { %v3205_v27 = vpop.eup %3204 }
 0x894   :  { %3206 = vrcp.f32 %v2448_v29  ;;  %v2455_v30 = vadd.f32 1.0, %v3205_v27 }
 0x896   :  { %3208 = vrcp.f32 %v2455_v30 }
 0x8a1   :  { %v3207_v21 = vpop.eup %3206 }
 0x8a2   :  { %v2459_v18 = vmul.f32 %v3207_v21, %v2458_v2 }
 0x8a3   :  { %v3209_v10 = vpop.eup %3208 }
 0x8a4   :  { %v2460_v19 = vadd.f32 %v2459_v18, %v4686_v3  ;;  %v2462_v4 = vsub.f32 1.0, %v3209_v10  ;;  %v2464_v12 = vmul.f32 %v3209_v10, %v2299_v49 }
 0x8a6   :  { %3210 = vtanh.f32 %v2460_v19 }
 0x8b3   :  { %v3211_v6 = vpop.eup %3210 }
 0x8b4   :  { %v2463_v16 = vmul.f32 %v3211_v6, %v2462_v4 }
 0x8b6   :  { %v2465_v48 = vadd.f32 %v2464_v12, %v2463_v16 }
 0x8b8   :  { %v2473_v23 = vmul.f32 %v2535_v7, %v2465_v48 }
 0x8ba   :  { %2474 = vadd.xlane.f32.xlu0 %v2473_v23 }
 0x943   :  { %v2475_v37 = vpop.xlane.xlu0 %2474 }
 0x944   :  { %v2483_v0 = vadd.f32 %v2536_v42, %v2475_v37 }
 0x946   :  { %v2537_v14 = vmul.f32 -1.442695, %v2483_v0 }
 0x948   :  { %3212 = vpow2.f32 %v2537_v14 }
 0x955   :  { %v3213_v22 = vpop.eup %3212 }
 0x956   :  { %v2487_v50 = vadd.f32 1.0, %v3213_v22 }
 0x958   :  { %3214 = vrcp.f32 %v2487_v50 }
 0x965   :  { %v3215_v61 = vpop.eup %3214 }
 0x966   :  { %2491 = vst.msk [vmem:[%s4523_s8] sm:$0x3] %vm2490_vm3, %v3215_v61 }
 0x967   :  { %2496 = vsyncpa [#allocation5], 1 }
 0x968   :  { %2497 = vsyncpa [#allocation7], 1 }
 0x969   :  { %2498 = vsyncpa [#allocation10], 1 }

</bundles_post_ra>
